<compile_context>
chip_gen: v5e
topology: v5e:2x2
jax: 0.10.0
libtpu: 0.0.40
codegen_flags: <defaults>
</compile_context>

<pallas_src>
import math
from functools import partial

import jax
import jax.numpy as jnp
from jax.experimental import pallas as pl
from jax.experimental.pallas import tpu as pltpu

LN_EPS = 1e-12
NEG_INF = -1e9


def _layer_norm(y, gamma, beta):
    mean = jnp.mean(y, axis=-1, keepdims=True)
    var = jnp.mean((y - mean) ** 2, axis=-1, keepdims=True)
    return (y - mean) * jax.lax.rsqrt(var + LN_EPS) * gamma + beta


def _mha_core(q, k, v, n_heads, mask):
    """q:(Sq,D) k,v:(Skv,D) in bf16.  mask: None | "causal" | (Sq,Skv) array."""
    s_q, d_model = q.shape
    s_kv = k.shape[0]
    d_k = d_model // n_heads
    scale = 1.0 / math.sqrt(d_k)

    qh = q.reshape(s_q, n_heads, d_k)
    kh = k.reshape(s_kv, n_heads, d_k)
    vh = v.reshape(s_kv, n_heads, d_k)

    s = jnp.einsum("qhd,khd->hqk", qh, kh,
                   preferred_element_type=jnp.float32) * scale   # (H,Sq,Skv) f32

    if isinstance(mask, str) and mask == "causal":
        row = jax.lax.broadcasted_iota(jnp.int32, s.shape, 1)
        col = jax.lax.broadcasted_iota(jnp.int32, s.shape, 2)
        s = jnp.where(row >= col, s, jnp.float32(NEG_INF))
    elif mask is not None:
        s = jnp.where(mask[None, :, :] == 0, jnp.float32(NEG_INF), s)

    s = s - jnp.max(s, axis=-1, keepdims=True)
    p = jnp.exp(s)
    p = p * pl.reciprocal(jnp.sum(p, axis=-1, keepdims=True), approx=True)

    ctx = jnp.einsum("hqk,khd->qhd", p.astype(v.dtype), vh,
                     preferred_element_type=jnp.float32)          # (Sq,H,dk) f32
    return ctx.reshape(s_q, d_model)


# ---------------------------------------------------------------------------
# Fused kernel: one batch element per grid step, all stages in VMEM
# ---------------------------------------------------------------------------
def _decoder_layer_kernel(n_heads, has_enc, self_mask_mode, cross_mask_mode, *refs):
    it = iter(refs)
    dec_ref = next(it)
    enc_ref = next(it) if has_enc else None
    tgt_mask_ref = next(it) if self_mask_mode == "tensor" else None
    src_mask_ref = next(it) if (has_enc and cross_mask_mode == "tensor") else None

    sa_wqkv, sa_bqkv, sa_wo, sa_bo, sa_g, sa_b = [next(it) for _ in range(6)]
    if has_enc:
        (ca_wq, ca_bq, ca_wkv, ca_bkv,
         ca_wo, ca_bo, ca_g, ca_b) = [next(it) for _ in range(8)]
    w1, b1, w2, b2, f_g, f_b = [next(it) for _ in range(6)]
    o_ref = next(it)

    d_model = dec_ref.shape[-1]

    x = dec_ref[0].astype(jnp.float32)                 # (S, D) residual (f32)

    # ---------------- self attention + add & norm ----------------
    xb = x.astype(jnp.bfloat16)
    qkv = (jnp.dot(xb, sa_wqkv[...], preferred_element_type=jnp.float32)
           + sa_bqkv[...])                             # (S, 3D) f32
    q = qkv[:, :d_model].astype(jnp.bfloat16)
    k = qkv[:, d_model:2 * d_model].astype(jnp.bfloat16)
    v = qkv[:, 2 * d_model:].astype(jnp.bfloat16)

    if self_mask_mode == "causal":
        mask = "causal"
    elif self_mask_mode == "tensor":
        mask = tgt_mask_ref[0]
    else:
        mask = None

    ctx = _mha_core(q, k, v, n_heads, mask)
    attn = (jnp.dot(ctx.astype(jnp.bfloat16), sa_wo[...],
                    preferred_element_type=jnp.float32) + sa_bo[...])
    # TODO(synk): dropout treated as identity (eval mode)
    x = _layer_norm(attn + x, sa_g[...], sa_b[...])

    # ---------------- encoder-decoder attention + add & norm ----------------
    if has_enc:
        xb = x.astype(jnp.bfloat16)
        enc = enc_ref[0].astype(jnp.bfloat16)
        q = (jnp.dot(xb, ca_wq[...], preferred_element_type=jnp.float32)
             + ca_bq[...]).astype(jnp.bfloat16)
        kv = (jnp.dot(enc, ca_wkv[...], preferred_element_type=jnp.float32)
              + ca_bkv[...])                            # (S_enc, 2D) f32
        k = kv[:, :d_model].astype(jnp.bfloat16)
        v = kv[:, d_model:].astype(jnp.bfloat16)

        mask = src_mask_ref[0] if cross_mask_mode == "tensor" else None
        ctx = _mha_core(q, k, v, n_heads, mask)
        attn = (jnp.dot(ctx.astype(jnp.bfloat16), ca_wo[...],
                        preferred_element_type=jnp.float32) + ca_bo[...])
        x = _layer_norm(attn + x, ca_g[...], ca_b[...])

    # ---------------- position-wise FFN + add & norm ----------------
    xb = x.astype(jnp.bfloat16)
    h = jnp.dot(xb, w1[...], preferred_element_type=jnp.float32) + b1[...]
    h = jnp.maximum(h, 0.0).astype(jnp.bfloat16)
    y = jnp.dot(h, w2[...], preferred_element_type=jnp.float32) + b2[...]
    x = _layer_norm(y + x, f_g[...], f_b[...])

    o_ref[0] = x.astype(o_ref.dtype)


# ---------------------------------------------------------------------------
# Wrapper
# ---------------------------------------------------------------------------
def _full_spec(a):
    return pl.BlockSpec(a.shape, lambda b, _nd=a.ndim: (0,) * _nd)


def _prep_attn_params(p, fuse_qkv):
    wq, bq, wk, bk, wv, bv, wo, bo, gamma, beta = p
    if fuse_qkv:
        wqkv = jnp.concatenate([wq, wk, wv], axis=1).astype(jnp.bfloat16)
        bqkv = jnp.concatenate([bq, bk, bv], axis=1).astype(jnp.float32)
        return (wqkv, bqkv, wo.astype(jnp.bfloat16), bo.astype(jnp.float32),
                gamma.astype(jnp.float32), beta.astype(jnp.float32))
    wkv = jnp.concatenate([wk, wv], axis=1).astype(jnp.bfloat16)
    bkv = jnp.concatenate([bk, bv], axis=1).astype(jnp.float32)
    return (wq.astype(jnp.bfloat16), bq.astype(jnp.float32), wkv, bkv,
            wo.astype(jnp.bfloat16), bo.astype(jnp.float32),
            gamma.astype(jnp.float32), beta.astype(jnp.float32))


def _prep_ffn_params(p):
    w1, b1, w2, b2, gamma, beta = p
    return (w1.astype(jnp.bfloat16), b1.astype(jnp.float32),
            w2.astype(jnp.bfloat16), b2.astype(jnp.float32),
            gamma.astype(jnp.float32), beta.astype(jnp.float32))


def decoder_layer(dec, enc, src_mask, tgt_mask, params, n_heads, *, causal_tgt=False):
    """Fused DecoderLayer forward (dropout = identity).

    tgt_mask: (B,S,S) tensor or None.  If None and causal_tgt=True, the causal
      mask is generated in-kernel (no HBM mask traffic).
    src_mask: (B,S,S_enc) tensor or None (None == all-ones == no masking).
    """
    sa_p, ca_p, ffn_p = params
    B, S, D = dec.shape
    has_enc = enc is not None

    if tgt_mask is not None:
        self_mask_mode = "tensor"
    elif causal_tgt:
        self_mask_mode = "causal"
    else:
        self_mask_mode = "none"
    cross_mask_mode = "tensor" if (has_enc and src_mask is not None) else "none"

    operands = [dec]
    in_specs = [pl.BlockSpec((1, S, D), lambda b: (b, 0, 0))]
    if has_enc:
        S_enc = enc.shape[1]
        operands.append(enc)
        in_specs.append(pl.BlockSpec((1, S_enc, D), lambda b: (b, 0, 0)))
    if self_mask_mode == "tensor":
        operands.append(tgt_mask)
        in_specs.append(pl.BlockSpec((1, S, S), lambda b: (b, 0, 0)))
    if cross_mask_mode == "tensor":
        operands.append(src_mask)
        in_specs.append(pl.BlockSpec((1, S, enc.shape[1]), lambda b: (b, 0, 0)))

    weights = list(_prep_attn_params(sa_p, fuse_qkv=True))
    if has_enc:
        weights += list(_prep_attn_params(ca_p, fuse_qkv=False))
    weights += list(_prep_ffn_params(ffn_p))
    operands += weights
    in_specs += [_full_spec(w) for w in weights]

    kernel = partial(_decoder_layer_kernel, n_heads, has_enc,
                     self_mask_mode, cross_mask_mode)

    return pl.pallas_call(
        kernel,
        out_shape=jax.ShapeDtypeStruct((B, S, D), dec.dtype),
        grid=(B,),
        in_specs=in_specs,
        out_specs=pl.BlockSpec((1, S, D), lambda b: (b, 0, 0)),
        compiler_params=pltpu.CompilerParams(dimension_semantics=("parallel",)),
    )(*operands)


# ---------------------------------------------------------------------------
# Deterministic parameter init (synthetic; shapes match the PyTorch module)
# ---------------------------------------------------------------------------
def _linear_params(key, fan_in, fan_out):
    kw, kb = jax.random.split(key)
    w = jax.random.normal(kw, (fan_in, fan_out), jnp.float32) / math.sqrt(fan_in)
    b = 0.01 * jax.random.normal(kb, (1, fan_out), jnp.float32)
    return w, b


def _attn_params(key, d_model):
    ks = jax.random.split(key, 4)
    wq, bq = _linear_params(ks[0], d_model, d_model)
    wk, bk = _linear_params(ks[1], d_model, d_model)
    wv, bv = _linear_params(ks[2], d_model, d_model)
    wo, bo = _linear_params(ks[3], d_model, d_model)
    gamma = jnp.ones((1, d_model), jnp.float32)
    beta = jnp.zeros((1, d_model), jnp.float32)
    return (wq, bq, wk, bk, wv, bv, wo, bo, gamma, beta)


def _ffn_params(key, d_model, d_hidden):
    k1, k2 = jax.random.split(key)
    w1, b1 = _linear_params(k1, d_model, d_hidden)
    w2, b2 = _linear_params(k2, d_hidden, d_model)
    gamma = jnp.ones((1, d_model), jnp.float32)
    beta = jnp.zeros((1, d_model), jnp.float32)
    return (w1, b1, w2, b2, gamma, beta)


def init_decoder_params(key, d_model, d_hidden):
    k_sa, k_ca, k_ffn = jax.random.split(key, 3)
    return (_attn_params(k_sa, d_model),
            _attn_params(k_ca, d_model),
            _ffn_params(k_ffn, d_model, d_hidden))


# ---------------------------------------------------------------------------
if __name__ == "__main__":
    B, S_DEC, S_ENC = 2, 16, 24
    D_MODEL, N_HEADS, D_HIDDEN = 128, 4, 256

    key = jax.random.PRNGKey(0)
    k_dec, k_enc, k_params = jax.random.split(key, 3)

    dec = jax.random.normal(k_dec, (B, S_DEC, D_MODEL), jnp.float32)
    enc = jax.random.normal(k_enc, (B, S_ENC, D_MODEL), jnp.float32)
    params = init_decoder_params(k_params, D_MODEL, D_HIDDEN)

    # Fast path: causal tgt mask generated in-kernel, all-ones src mask skipped.
    out = decoder_layer(dec, enc, None, None, params, N_HEADS, causal_tgt=True)
    out = jax.block_until_ready(out)
    assert out.shape == (B, S_DEC, D_MODEL)
    assert bool(jnp.all(jnp.isfinite(out)))

    # Reference path: explicit dense masks with identical semantics.
    tgt_mask = jnp.broadcast_to(
        jnp.tril(jnp.ones((S_DEC, S_DEC), jnp.float32)), (B, S_DEC, S_DEC))
    src_mask = jnp.ones((B, S_DEC, S_ENC), jnp.float32)
    out_ref = decoder_layer(dec, enc, src_mask, tgt_mask, params, N_HEADS)
    out_ref = jax.block_until_ready(out_ref)
    assert bool(jnp.allclose(out, out_ref, atol=1e-5, rtol=1e-5))

    print("KERNEL_OK")
</pallas_src>

<mosaic_0001>
module attributes {stable_mosaic.version = 11 : i64} {
  func.func @_decoder_layer_kernel(%arg0: i32, %arg1: memref<1x16x128xf32, #tpu.memory_space<vmem>>, %arg2: memref<1x24x128xf32, #tpu.memory_space<vmem>>, %arg3: memref<128x384xbf16, #tpu.memory_space<vmem>>, %arg4: memref<1x384xf32, #tpu.memory_space<vmem>>, %arg5: memref<128x128xbf16, #tpu.memory_space<vmem>>, %arg6: memref<1x128xf32, #tpu.memory_space<vmem>>, %arg7: memref<1x128xf32, #tpu.memory_space<vmem>>, %arg8: memref<1x128xf32, #tpu.memory_space<vmem>>, %arg9: memref<128x128xbf16, #tpu.memory_space<vmem>>, %arg10: memref<1x128xf32, #tpu.memory_space<vmem>>, %arg11: memref<128x256xbf16, #tpu.memory_space<vmem>>, %arg12: memref<1x256xf32, #tpu.memory_space<vmem>>, %arg13: memref<128x128xbf16, #tpu.memory_space<vmem>>, %arg14: memref<1x128xf32, #tpu.memory_space<vmem>>, %arg15: memref<1x128xf32, #tpu.memory_space<vmem>>, %arg16: memref<1x128xf32, #tpu.memory_space<vmem>>, %arg17: memref<128x256xbf16, #tpu.memory_space<vmem>>, %arg18: memref<1x256xf32, #tpu.memory_space<vmem>>, %arg19: memref<256x128xbf16, #tpu.memory_space<vmem>>, %arg20: memref<1x128xf32, #tpu.memory_space<vmem>>, %arg21: memref<1x128xf32, #tpu.memory_space<vmem>>, %arg22: memref<1x128xf32, #tpu.memory_space<vmem>>, %arg23: memref<1x16x128xf32, #tpu.memory_space<vmem>>) attributes {dimension_semantics = [#tpu.dimension_semantics<parallel>], iteration_bounds = array<i64: 2>, scalar_prefetch = 0 : i64, scratch_operands = 0 : i64, tpu.core_type = #tpu.core_type<tc>, window_params = [{transform_indices = @transform_0, window_bounds = array<i64: 1, 16, 128>}, {transform_indices = @transform_1, window_bounds = array<i64: 1, 24, 128>}, {pipeline_mode = #tpu.pipeline_mode<synchronous>, transform_indices = @transform_2, window_bounds = array<i64: 128, 384>}, {pipeline_mode = #tpu.pipeline_mode<synchronous>, transform_indices = @transform_3, window_bounds = array<i64: 1, 384>}, {pipeline_mode = #tpu.pipeline_mode<synchronous>, transform_indices = @transform_4, window_bounds = array<i64: 128, 128>}, {pipeline_mode = #tpu.pipeline_mode<synchronous>, transform_indices = @transform_5, window_bounds = array<i64: 1, 128>}, {pipeline_mode = #tpu.pipeline_mode<synchronous>, transform_indices = @transform_6, window_bounds = array<i64: 1, 128>}, {pipeline_mode = #tpu.pipeline_mode<synchronous>, transform_indices = @transform_7, window_bounds = array<i64: 1, 128>}, {pipeline_mode = #tpu.pipeline_mode<synchronous>, transform_indices = @transform_8, window_bounds = array<i64: 128, 128>}, {pipeline_mode = #tpu.pipeline_mode<synchronous>, transform_indices = @transform_9, window_bounds = array<i64: 1, 128>}, {pipeline_mode = #tpu.pipeline_mode<synchronous>, transform_indices = @transform_10, window_bounds = array<i64: 128, 256>}, {pipeline_mode = #tpu.pipeline_mode<synchronous>, transform_indices = @transform_11, window_bounds = array<i64: 1, 256>}, {pipeline_mode = #tpu.pipeline_mode<synchronous>, transform_indices = @transform_12, window_bounds = array<i64: 128, 128>}, {pipeline_mode = #tpu.pipeline_mode<synchronous>, transform_indices = @transform_13, window_bounds = array<i64: 1, 128>}, {pipeline_mode = #tpu.pipeline_mode<synchronous>, transform_indices = @transform_14, window_bounds = array<i64: 1, 128>}, {pipeline_mode = #tpu.pipeline_mode<synchronous>, transform_indices = @transform_15, window_bounds = array<i64: 1, 128>}, {pipeline_mode = #tpu.pipeline_mode<synchronous>, transform_indices = @transform_16, window_bounds = array<i64: 128, 256>}, {pipeline_mode = #tpu.pipeline_mode<synchronous>, transform_indices = @transform_17, window_bounds = array<i64: 1, 256>}, {pipeline_mode = #tpu.pipeline_mode<synchronous>, transform_indices = @transform_18, window_bounds = array<i64: 256, 128>}, {pipeline_mode = #tpu.pipeline_mode<synchronous>, transform_indices = @transform_19, window_bounds = array<i64: 1, 128>}, {pipeline_mode = #tpu.pipeline_mode<synchronous>, transform_indices = @transform_20, window_bounds = array<i64: 1, 128>}, {pipeline_mode = #tpu.pipeline_mode<synchronous>, transform_indices = @transform_21, window_bounds = array<i64: 1, 128>}, {transform_indices = @transform_22, window_bounds = array<i64: 1, 16, 128>}]} {
    %c0 = arith.constant 0 : index
    %c0_0 = arith.constant 0 : index
    %c0_1 = arith.constant 0 : index
    %0 = vector.load %arg1[%c0, %c0_0, %c0_1] : memref<1x16x128xf32, #tpu.memory_space<vmem>>, vector<1x16x128xf32>
    %1 = vector.shape_cast %0 : vector<1x16x128xf32> to vector<16x128xf32>
    %2 = arith.truncf %1 : vector<16x128xf32> to vector<16x128xbf16>
    %c0_2 = arith.constant 0 : index
    %c0_3 = arith.constant 0 : index
    %3 = vector.load %arg3[%c0_2, %c0_3] : memref<128x384xbf16, #tpu.memory_space<vmem>>, vector<128x384xbf16>
    %cst = arith.constant dense<0.000000e+00> : vector<16x384xf32>
    %4 = tpu.matmul %2, %3, %cst {dimension_numbers = #tpu.dot_dimension_numbers<[1], [0], [0], [1], [0, 0, 1, 1], [], []>} : vector<16x128xbf16>, vector<128x384xbf16>, vector<16x384xf32> -> vector<16x384xf32>
    %c0_4 = arith.constant 0 : index
    %c0_5 = arith.constant 0 : index
    %5 = vector.load %arg4[%c0_4, %c0_5] : memref<1x384xf32, #tpu.memory_space<vmem>>, vector<1x384xf32>
    %6 = vector.broadcast %5 : vector<1x384xf32> to vector<16x384xf32>
    %7 = arith.addf %4, %6 : vector<16x384xf32>
    %8 = vector.extract_strided_slice %7 {offsets = [0, 0], sizes = [16, 128], strides = [1, 1]} : vector<16x384xf32> to vector<16x128xf32>
    %9 = arith.truncf %8 : vector<16x128xf32> to vector<16x128xbf16>
    %10 = vector.extract_strided_slice %7 {offsets = [0, 128], sizes = [16, 128], strides = [1, 1]} : vector<16x384xf32> to vector<16x128xf32>
    %11 = arith.truncf %10 : vector<16x128xf32> to vector<16x128xbf16>
    %12 = vector.extract_strided_slice %7 {offsets = [0, 256], sizes = [16, 128], strides = [1, 1]} : vector<16x384xf32> to vector<16x128xf32>
    %13 = arith.truncf %12 : vector<16x128xf32> to vector<16x128xbf16>
    %14 = vector.shape_cast %9 : vector<16x128xbf16> to vector<16x4x32xbf16>
    %15 = vector.shape_cast %11 : vector<16x128xbf16> to vector<16x4x32xbf16>
    %16 = vector.shape_cast %13 : vector<16x128xbf16> to vector<16x4x32xbf16>
    "tpu.trace_start"() <{level = 10 : i32, message = "qhd,khd->hqk"}> : () -> ()
    %cst_6 = arith.constant dense<0.000000e+00> : vector<4x16x16xf32>
    %17 = tpu.matmul %14, %15, %cst_6 {dimension_numbers = #tpu.dot_dimension_numbers<[2], [2], [0], [0], [0, 1, 0, 0, 1, 0], [1], [1]>} : vector<16x4x32xbf16>, vector<16x4x32xbf16>, vector<4x16x16xf32> -> vector<4x16x16xf32>
    "tpu.trace_stop"() : () -> ()
    %cst_7 = arith.constant 0.176776692 : f32
    %18 = vector.broadcast %cst_7 : f32 to vector<4x16x16xf32>
    %19 = arith.mulf %17, %18 : vector<4x16x16xf32>
    %20 = tpu.iota {dimensions = array<i32: 1>} : vector<4x16x16xi32>
    %21 = tpu.iota {dimensions = array<i32: 2>} : vector<4x16x16xi32>
    %22 = arith.cmpi sge, %20, %21 : vector<4x16x16xi32>
    %cst_8 = arith.constant -1.000000e+09 : f32
    %23 = vector.broadcast %cst_8 : f32 to vector<4x16x16xf32>
    %24 = arith.select %22, %19, %23 : vector<4x16x16xi1>, vector<4x16x16xf32>
    %cst_9 = arith.constant dense<0xFF800000> : vector<4x16xf32>
    %25 = vector.multi_reduction <maximumf>, %24, %cst_9 [2] : vector<4x16x16xf32> to vector<4x16xf32>
    %26 = vector.shape_cast %25 : vector<4x16xf32> to vector<4x16x1xf32>
    %27 = vector.broadcast %26 : vector<4x16x1xf32> to vector<4x16x16xf32>
    %28 = arith.subf %24, %27 : vector<4x16x16xf32>
    %29 = math.exp %28 : vector<4x16x16xf32>
    %cst_10 = arith.constant dense<0.000000e+00> : vector<4x16xf32>
    %30 = vector.multi_reduction <add>, %29, %cst_10 [2] : vector<4x16x16xf32> to vector<4x16xf32>
    %31 = vector.shape_cast %30 : vector<4x16xf32> to vector<4x16x1xf32>
    %32 = tpu.reciprocal %31 {approx = true} : vector<4x16x1xf32> -> vector<4x16x1xf32>
    %33 = vector.broadcast %32 : vector<4x16x1xf32> to vector<4x16x16xf32>
    %34 = arith.mulf %29, %33 : vector<4x16x16xf32>
    %35 = arith.truncf %34 : vector<4x16x16xf32> to vector<4x16x16xbf16>
    "tpu.trace_start"() <{level = 10 : i32, message = "hqk,khd->qhd"}> : () -> ()
    %cst_11 = arith.constant dense<0.000000e+00> : vector<4x32x16xf32>
    %36 = tpu.matmul %16, %35, %cst_11 {dimension_numbers = #tpu.dot_dimension_numbers<[0], [2], [2], [1], [0, 1, 0, 2, 1, 1], [1], [0]>} : vector<16x4x32xbf16>, vector<4x16x16xbf16>, vector<4x32x16xf32> -> vector<4x32x16xf32>
    %37 = tpu.transpose %36, [2, 0, 1] : vector<4x32x16xf32> -> vector<16x4x32xf32>
    "tpu.trace_stop"() : () -> ()
    %38 = vector.shape_cast %37 : vector<16x4x32xf32> to vector<16x128xf32>
    %39 = arith.truncf %38 : vector<16x128xf32> to vector<16x128xbf16>
    %c0_12 = arith.constant 0 : index
    %c0_13 = arith.constant 0 : index
    %40 = vector.load %arg5[%c0_12, %c0_13] : memref<128x128xbf16, #tpu.memory_space<vmem>>, vector<128x128xbf16>
    %cst_14 = arith.constant dense<0.000000e+00> : vector<16x128xf32>
    %41 = tpu.matmul %39, %40, %cst_14 {dimension_numbers = #tpu.dot_dimension_numbers<[1], [0], [0], [1], [0, 0, 1, 1], [], []>} : vector<16x128xbf16>, vector<128x128xbf16>, vector<16x128xf32> -> vector<16x128xf32>
    %c0_15 = arith.constant 0 : index
    %c0_16 = arith.constant 0 : index
    %42 = vector.load %arg6[%c0_15, %c0_16] : memref<1x128xf32, #tpu.memory_space<vmem>>, vector<1x128xf32>
    %43 = vector.broadcast %42 : vector<1x128xf32> to vector<16x128xf32>
    %44 = arith.addf %41, %43 : vector<16x128xf32>
    %45 = arith.addf %44, %1 : vector<16x128xf32>
    %c0_17 = arith.constant 0 : index
    %c0_18 = arith.constant 0 : index
    %46 = vector.load %arg7[%c0_17, %c0_18] : memref<1x128xf32, #tpu.memory_space<vmem>>, vector<1x128xf32>
    %c0_19 = arith.constant 0 : index
    %c0_20 = arith.constant 0 : index
    %47 = vector.load %arg8[%c0_19, %c0_20] : memref<1x128xf32, #tpu.memory_space<vmem>>, vector<1x128xf32>
    %cst_21 = arith.constant dense<0.000000e+00> : vector<16xf32>
    %48 = vector.multi_reduction <add>, %45, %cst_21 [1] : vector<16x128xf32> to vector<16xf32>
    %49 = vector.shape_cast %48 : vector<16xf32> to vector<16x1xf32>
    %cst_22 = arith.constant 1.280000e+02 : f32
    %50 = vector.broadcast %cst_22 : f32 to vector<16x1xf32>
    %51 = arith.divf %49, %50 : vector<16x1xf32>
    %52 = vector.broadcast %51 : vector<16x1xf32> to vector<16x128xf32>
    %53 = arith.subf %45, %52 : vector<16x128xf32>
    %54 = arith.mulf %53, %53 : vector<16x128xf32>
    %cst_23 = arith.constant dense<0.000000e+00> : vector<16xf32>
    %55 = vector.multi_reduction <add>, %54, %cst_23 [1] : vector<16x128xf32> to vector<16xf32>
    %56 = vector.shape_cast %55 : vector<16xf32> to vector<16x1xf32>
    %cst_24 = arith.constant 1.280000e+02 : f32
    %57 = vector.broadcast %cst_24 : f32 to vector<16x1xf32>
    %58 = arith.divf %56, %57 : vector<16x1xf32>
    %59 = vector.broadcast %51 : vector<16x1xf32> to vector<16x128xf32>
    %60 = arith.subf %45, %59 : vector<16x128xf32>
    %cst_25 = arith.constant 9.99999996E-13 : f32
    %61 = vector.broadcast %cst_25 : f32 to vector<16x1xf32>
    %62 = arith.addf %58, %61 : vector<16x1xf32>
    %63 = math.rsqrt %62 : vector<16x1xf32>
    %64 = vector.broadcast %63 : vector<16x1xf32> to vector<16x128xf32>
    %65 = arith.mulf %60, %64 : vector<16x128xf32>
    %66 = vector.broadcast %46 : vector<1x128xf32> to vector<16x128xf32>
    %67 = arith.mulf %65, %66 : vector<16x128xf32>
    %68 = vector.broadcast %47 : vector<1x128xf32> to vector<16x128xf32>
    %69 = arith.addf %67, %68 : vector<16x128xf32>
    %70 = arith.truncf %69 : vector<16x128xf32> to vector<16x128xbf16>
    %c0_26 = arith.constant 0 : index
    %c0_27 = arith.constant 0 : index
    %c0_28 = arith.constant 0 : index
    %71 = vector.load %arg2[%c0_26, %c0_27, %c0_28] : memref<1x24x128xf32, #tpu.memory_space<vmem>>, vector<1x24x128xf32>
    %72 = vector.shape_cast %71 : vector<1x24x128xf32> to vector<24x128xf32>
    %73 = arith.truncf %72 : vector<24x128xf32> to vector<24x128xbf16>
    %c0_29 = arith.constant 0 : index
    %c0_30 = arith.constant 0 : index
    %74 = vector.load %arg9[%c0_29, %c0_30] : memref<128x128xbf16, #tpu.memory_space<vmem>>, vector<128x128xbf16>
    %cst_31 = arith.constant dense<0.000000e+00> : vector<16x128xf32>
    %75 = tpu.matmul %70, %74, %cst_31 {dimension_numbers = #tpu.dot_dimension_numbers<[1], [0], [0], [1], [0, 0, 1, 1], [], []>} : vector<16x128xbf16>, vector<128x128xbf16>, vector<16x128xf32> -> vector<16x128xf32>
    %c0_32 = arith.constant 0 : index
    %c0_33 = arith.constant 0 : index
    %76 = vector.load %arg10[%c0_32, %c0_33] : memref<1x128xf32, #tpu.memory_space<vmem>>, vector<1x128xf32>
    %77 = vector.broadcast %76 : vector<1x128xf32> to vector<16x128xf32>
    %78 = arith.addf %75, %77 : vector<16x128xf32>
    %79 = arith.truncf %78 : vector<16x128xf32> to vector<16x128xbf16>
    %c0_34 = arith.constant 0 : index
    %c0_35 = arith.constant 0 : index
    %80 = vector.load %arg11[%c0_34, %c0_35] : memref<128x256xbf16, #tpu.memory_space<vmem>>, vector<128x256xbf16>
    %cst_36 = arith.constant dense<0.000000e+00> : vector<24x256xf32>
    %81 = tpu.matmul %73, %80, %cst_36 {dimension_numbers = #tpu.dot_dimension_numbers<[1], [0], [0], [1], [0, 0, 1, 1], [], []>} : vector<24x128xbf16>, vector<128x256xbf16>, vector<24x256xf32> -> vector<24x256xf32>
    %c0_37 = arith.constant 0 : index
    %c0_38 = arith.constant 0 : index
    %82 = vector.load %arg12[%c0_37, %c0_38] : memref<1x256xf32, #tpu.memory_space<vmem>>, vector<1x256xf32>
    %83 = vector.broadcast %82 : vector<1x256xf32> to vector<24x256xf32>
    %84 = arith.addf %81, %83 : vector<24x256xf32>
    %85 = vector.extract_strided_slice %84 {offsets = [0, 0], sizes = [24, 128], strides = [1, 1]} : vector<24x256xf32> to vector<24x128xf32>
    %86 = arith.truncf %85 : vector<24x128xf32> to vector<24x128xbf16>
    %87 = vector.extract_strided_slice %84 {offsets = [0, 128], sizes = [24, 128], strides = [1, 1]} : vector<24x256xf32> to vector<24x128xf32>
    %88 = arith.truncf %87 : vector<24x128xf32> to vector<24x128xbf16>
    %89 = vector.shape_cast %79 : vector<16x128xbf16> to vector<16x4x32xbf16>
    %90 = vector.shape_cast %86 : vector<24x128xbf16> to vector<24x4x32xbf16>
    %91 = vector.shape_cast %88 : vector<24x128xbf16> to vector<24x4x32xbf16>
    "tpu.trace_start"() <{level = 10 : i32, message = "qhd,khd->hqk"}> : () -> ()
    %cst_39 = arith.constant dense<0.000000e+00> : vector<4x16x24xf32>
    %92 = tpu.matmul %89, %90, %cst_39 {dimension_numbers = #tpu.dot_dimension_numbers<[2], [2], [0], [0], [0, 1, 0, 0, 1, 0], [1], [1]>} : vector<16x4x32xbf16>, vector<24x4x32xbf16>, vector<4x16x24xf32> -> vector<4x16x24xf32>
    "tpu.trace_stop"() : () -> ()
    %cst_40 = arith.constant 0.176776692 : f32
    %93 = vector.broadcast %cst_40 : f32 to vector<4x16x24xf32>
    %94 = arith.mulf %92, %93 : vector<4x16x24xf32>
    %cst_41 = arith.constant dense<0xFF800000> : vector<4x16xf32>
    %95 = vector.multi_reduction <maximumf>, %94, %cst_41 [2] : vector<4x16x24xf32> to vector<4x16xf32>
    %96 = vector.shape_cast %95 : vector<4x16xf32> to vector<4x16x1xf32>
    %97 = vector.broadcast %96 : vector<4x16x1xf32> to vector<4x16x24xf32>
    %98 = arith.subf %94, %97 : vector<4x16x24xf32>
    %99 = math.exp %98 : vector<4x16x24xf32>
    %cst_42 = arith.constant dense<0.000000e+00> : vector<4x16xf32>
    %100 = vector.multi_reduction <add>, %99, %cst_42 [2] : vector<4x16x24xf32> to vector<4x16xf32>
    %101 = vector.shape_cast %100 : vector<4x16xf32> to vector<4x16x1xf32>
    %102 = tpu.reciprocal %101 {approx = true} : vector<4x16x1xf32> -> vector<4x16x1xf32>
    %103 = vector.broadcast %102 : vector<4x16x1xf32> to vector<4x16x24xf32>
    %104 = arith.mulf %99, %103 : vector<4x16x24xf32>
    %105 = arith.truncf %104 : vector<4x16x24xf32> to vector<4x16x24xbf16>
    "tpu.trace_start"() <{level = 10 : i32, message = "hqk,khd->qhd"}> : () -> ()
    %cst_43 = arith.constant dense<0.000000e+00> : vector<4x32x16xf32>
    %106 = tpu.matmul %91, %105, %cst_43 {dimension_numbers = #tpu.dot_dimension_numbers<[0], [2], [2], [1], [0, 1, 0, 2, 1, 1], [1], [0]>} : vector<24x4x32xbf16>, vector<4x16x24xbf16>, vector<4x32x16xf32> -> vector<4x32x16xf32>
    %107 = tpu.transpose %106, [2, 0, 1] : vector<4x32x16xf32> -> vector<16x4x32xf32>
    "tpu.trace_stop"() : () -> ()
    %108 = vector.shape_cast %107 : vector<16x4x32xf32> to vector<16x128xf32>
    %109 = arith.truncf %108 : vector<16x128xf32> to vector<16x128xbf16>
    %c0_44 = arith.constant 0 : index
    %c0_45 = arith.constant 0 : index
    %110 = vector.load %arg13[%c0_44, %c0_45] : memref<128x128xbf16, #tpu.memory_space<vmem>>, vector<128x128xbf16>
    %cst_46 = arith.constant dense<0.000000e+00> : vector<16x128xf32>
    %111 = tpu.matmul %109, %110, %cst_46 {dimension_numbers = #tpu.dot_dimension_numbers<[1], [0], [0], [1], [0, 0, 1, 1], [], []>} : vector<16x128xbf16>, vector<128x128xbf16>, vector<16x128xf32> -> vector<16x128xf32>
    %c0_47 = arith.constant 0 : index
    %c0_48 = arith.constant 0 : index
    %112 = vector.load %arg14[%c0_47, %c0_48] : memref<1x128xf32, #tpu.memory_space<vmem>>, vector<1x128xf32>
    %113 = vector.broadcast %112 : vector<1x128xf32> to vector<16x128xf32>
    %114 = arith.addf %111, %113 : vector<16x128xf32>
    %115 = arith.addf %114, %69 : vector<16x128xf32>
    %c0_49 = arith.constant 0 : index
    %c0_50 = arith.constant 0 : index
    %116 = vector.load %arg15[%c0_49, %c0_50] : memref<1x128xf32, #tpu.memory_space<vmem>>, vector<1x128xf32>
    %c0_51 = arith.constant 0 : index
    %c0_52 = arith.constant 0 : index
    %117 = vector.load %arg16[%c0_51, %c0_52] : memref<1x128xf32, #tpu.memory_space<vmem>>, vector<1x128xf32>
    %cst_53 = arith.constant dense<0.000000e+00> : vector<16xf32>
    %118 = vector.multi_reduction <add>, %115, %cst_53 [1] : vector<16x128xf32> to vector<16xf32>
    %119 = vector.shape_cast %118 : vector<16xf32> to vector<16x1xf32>
    %cst_54 = arith.constant 1.280000e+02 : f32
    %120 = vector.broadcast %cst_54 : f32 to vector<16x1xf32>
    %121 = arith.divf %119, %120 : vector<16x1xf32>
    %122 = vector.broadcast %121 : vector<16x1xf32> to vector<16x128xf32>
    %123 = arith.subf %115, %122 : vector<16x128xf32>
    %124 = arith.mulf %123, %123 : vector<16x128xf32>
    %cst_55 = arith.constant dense<0.000000e+00> : vector<16xf32>
    %125 = vector.multi_reduction <add>, %124, %cst_55 [1] : vector<16x128xf32> to vector<16xf32>
    %126 = vector.shape_cast %125 : vector<16xf32> to vector<16x1xf32>
    %cst_56 = arith.constant 1.280000e+02 : f32
    %127 = vector.broadcast %cst_56 : f32 to vector<16x1xf32>
    %128 = arith.divf %126, %127 : vector<16x1xf32>
    %129 = vector.broadcast %121 : vector<16x1xf32> to vector<16x128xf32>
    %130 = arith.subf %115, %129 : vector<16x128xf32>
    %cst_57 = arith.constant 9.99999996E-13 : f32
    %131 = vector.broadcast %cst_57 : f32 to vector<16x1xf32>
    %132 = arith.addf %128, %131 : vector<16x1xf32>
    %133 = math.rsqrt %132 : vector<16x1xf32>
    %134 = vector.broadcast %133 : vector<16x1xf32> to vector<16x128xf32>
    %135 = arith.mulf %130, %134 : vector<16x128xf32>
    %136 = vector.broadcast %116 : vector<1x128xf32> to vector<16x128xf32>
    %137 = arith.mulf %135, %136 : vector<16x128xf32>
    %138 = vector.broadcast %117 : vector<1x128xf32> to vector<16x128xf32>
    %139 = arith.addf %137, %138 : vector<16x128xf32>
    %140 = arith.truncf %139 : vector<16x128xf32> to vector<16x128xbf16>
    %c0_58 = arith.constant 0 : index
    %c0_59 = arith.constant 0 : index
    %141 = vector.load %arg17[%c0_58, %c0_59] : memref<128x256xbf16, #tpu.memory_space<vmem>>, vector<128x256xbf16>
    %cst_60 = arith.constant dense<0.000000e+00> : vector<16x256xf32>
    %142 = tpu.matmul %140, %141, %cst_60 {dimension_numbers = #tpu.dot_dimension_numbers<[1], [0], [0], [1], [0, 0, 1, 1], [], []>} : vector<16x128xbf16>, vector<128x256xbf16>, vector<16x256xf32> -> vector<16x256xf32>
    %c0_61 = arith.constant 0 : index
    %c0_62 = arith.constant 0 : index
    %143 = vector.load %arg18[%c0_61, %c0_62] : memref<1x256xf32, #tpu.memory_space<vmem>>, vector<1x256xf32>
    %144 = vector.broadcast %143 : vector<1x256xf32> to vector<16x256xf32>
    %145 = arith.addf %142, %144 : vector<16x256xf32>
    %cst_63 = arith.constant 0.000000e+00 : f32
    %146 = vector.broadcast %cst_63 : f32 to vector<16x256xf32>
    %147 = arith.maximumf %145, %146 : vector<16x256xf32>
    %148 = arith.truncf %147 : vector<16x256xf32> to vector<16x256xbf16>
    %c0_64 = arith.constant 0 : index
    %c0_65 = arith.constant 0 : index
    %149 = vector.load %arg19[%c0_64, %c0_65] : memref<256x128xbf16, #tpu.memory_space<vmem>>, vector<256x128xbf16>
    %cst_66 = arith.constant dense<0.000000e+00> : vector<16x128xf32>
    %150 = tpu.matmul %148, %149, %cst_66 {dimension_numbers = #tpu.dot_dimension_numbers<[1], [0], [0], [1], [0, 0, 1, 1], [], []>} : vector<16x256xbf16>, vector<256x128xbf16>, vector<16x128xf32> -> vector<16x128xf32>
    %c0_67 = arith.constant 0 : index
    %c0_68 = arith.constant 0 : index
    %151 = vector.load %arg20[%c0_67, %c0_68] : memref<1x128xf32, #tpu.memory_space<vmem>>, vector<1x128xf32>
    %152 = vector.broadcast %151 : vector<1x128xf32> to vector<16x128xf32>
    %153 = arith.addf %150, %152 : vector<16x128xf32>
    %154 = arith.addf %153, %139 : vector<16x128xf32>
    %c0_69 = arith.constant 0 : index
    %c0_70 = arith.constant 0 : index
    %155 = vector.load %arg21[%c0_69, %c0_70] : memref<1x128xf32, #tpu.memory_space<vmem>>, vector<1x128xf32>
    %c0_71 = arith.constant 0 : index
    %c0_72 = arith.constant 0 : index
    %156 = vector.load %arg22[%c0_71, %c0_72] : memref<1x128xf32, #tpu.memory_space<vmem>>, vector<1x128xf32>
    %cst_73 = arith.constant dense<0.000000e+00> : vector<16xf32>
    %157 = vector.multi_reduction <add>, %154, %cst_73 [1] : vector<16x128xf32> to vector<16xf32>
    %158 = vector.shape_cast %157 : vector<16xf32> to vector<16x1xf32>
    %cst_74 = arith.constant 1.280000e+02 : f32
    %159 = vector.broadcast %cst_74 : f32 to vector<16x1xf32>
    %160 = arith.divf %158, %159 : vector<16x1xf32>
    %161 = vector.broadcast %160 : vector<16x1xf32> to vector<16x128xf32>
    %162 = arith.subf %154, %161 : vector<16x128xf32>
    %163 = arith.mulf %162, %162 : vector<16x128xf32>
    %cst_75 = arith.constant dense<0.000000e+00> : vector<16xf32>
    %164 = vector.multi_reduction <add>, %163, %cst_75 [1] : vector<16x128xf32> to vector<16xf32>
    %165 = vector.shape_cast %164 : vector<16xf32> to vector<16x1xf32>
    %cst_76 = arith.constant 1.280000e+02 : f32
    %166 = vector.broadcast %cst_76 : f32 to vector<16x1xf32>
    %167 = arith.divf %165, %166 : vector<16x1xf32>
    %168 = vector.broadcast %160 : vector<16x1xf32> to vector<16x128xf32>
    %169 = arith.subf %154, %168 : vector<16x128xf32>
    %cst_77 = arith.constant 9.99999996E-13 : f32
    %170 = vector.broadcast %cst_77 : f32 to vector<16x1xf32>
    %171 = arith.addf %167, %170 : vector<16x1xf32>
    %172 = math.rsqrt %171 : vector<16x1xf32>
    %173 = vector.broadcast %172 : vector<16x1xf32> to vector<16x128xf32>
    %174 = arith.mulf %169, %173 : vector<16x128xf32>
    %175 = vector.broadcast %155 : vector<1x128xf32> to vector<16x128xf32>
    %176 = arith.mulf %174, %175 : vector<16x128xf32>
    %177 = vector.broadcast %156 : vector<1x128xf32> to vector<16x128xf32>
    %178 = arith.addf %176, %177 : vector<16x128xf32>
    %c0_78 = arith.constant 0 : index
    %c0_79 = arith.constant 0 : index
    %c0_80 = arith.constant 0 : index
    %179 = vector.load %arg23[%c0_78, %c0_79, %c0_80] : memref<1x16x128xf32, #tpu.memory_space<vmem>>, vector<1x16x128xf32>
    %180 = vector.shape_cast %179 : vector<1x16x128xf32> to vector<16x128xf32>
    %181 = vector.shape_cast %178 : vector<16x128xf32> to vector<1x16x128xf32>
    tpu.vector_store %arg23[%c0_78, %c0_79, %c0_80], %181 {strides = array<i32>} : memref<1x16x128xf32, #tpu.memory_space<vmem>>, vector<1x16x128xf32>,
    return
  }
  func.func @transform_0(%arg0: i32) -> (i32, i32, i32) {
    %c0_i32 = arith.constant 0 : i32
    %c0_i32_0 = arith.constant 0 : i32
    %c0_i32_1 = arith.constant 0 : i32
    return %arg0, %c0_i32, %c0_i32_0 : i32, i32, i32
  }
  func.func @transform_1(%arg0: i32) -> (i32, i32, i32) {
    %c0_i32 = arith.constant 0 : i32
    %c0_i32_0 = arith.constant 0 : i32
    %c0_i32_1 = arith.constant 0 : i32
    return %arg0, %c0_i32, %c0_i32_0 : i32, i32, i32
  }
  func.func @transform_2(%arg0: i32) -> (i32, i32) {
    %c0_i32 = arith.constant 0 : i32
    %c0_i32_0 = arith.constant 0 : i32
    %c0_i32_1 = arith.constant 0 : i32
    return %c0_i32, %c0_i32_0 : i32, i32
  }
  func.func @transform_3(%arg0: i32) -> (i32, i32) {
    %c0_i32 = arith.constant 0 : i32
    %c0_i32_0 = arith.constant 0 : i32
    %c0_i32_1 = arith.constant 0 : i32
    return %c0_i32, %c0_i32_0 : i32, i32
  }
  func.func @transform_4(%arg0: i32) -> (i32, i32) {
    %c0_i32 = arith.constant 0 : i32
    %c0_i32_0 = arith.constant 0 : i32
    %c0_i32_1 = arith.constant 0 : i32
    return %c0_i32, %c0_i32_0 : i32, i32
  }
  func.func @transform_5(%arg0: i32) -> (i32, i32) {
    %c0_i32 = arith.constant 0 : i32
    %c0_i32_0 = arith.constant 0 : i32
    %c0_i32_1 = arith.constant 0 : i32
    return %c0_i32, %c0_i32_0 : i32, i32
  }
  func.func @transform_6(%arg0: i32) -> (i32, i32) {
    %c0_i32 = arith.constant 0 : i32
    %c0_i32_0 = arith.constant 0 : i32
    %c0_i32_1 = arith.constant 0 : i32
    return %c0_i32, %c0_i32_0 : i32, i32
  }
  func.func @transform_7(%arg0: i32) -> (i32, i32) {
    %c0_i32 = arith.constant 0 : i32
    %c0_i32_0 = arith.constant 0 : i32
    %c0_i32_1 = arith.constant 0 : i32
    return %c0_i32, %c0_i32_0 : i32, i32
  }
  func.func @transform_8(%arg0: i32) -> (i32, i32) {
    %c0_i32 = arith.constant 0 : i32
    %c0_i32_0 = arith.constant 0 : i32
    %c0_i32_1 = arith.constant 0 : i32
    return %c0_i32, %c0_i32_0 : i32, i32
  }
  func.func @transform_9(%arg0: i32) -> (i32, i32) {
    %c0_i32 = arith.constant 0 : i32
    %c0_i32_0 = arith.constant 0 : i32
    %c0_i32_1 = arith.constant 0 : i32
    return %c0_i32, %c0_i32_0 : i32, i32
  }
  func.func @transform_10(%arg0: i32) -> (i32, i32) {
    %c0_i32 = arith.constant 0 : i32
    %c0_i32_0 = arith.constant 0 : i32
    %c0_i32_1 = arith.constant 0 : i32
    return %c0_i32, %c0_i32_0 : i32, i32
  }
  func.func @transform_11(%arg0: i32) -> (i32, i32) {
    %c0_i32 = arith.constant 0 : i32
    %c0_i32_0 = arith.constant 0 : i32
    %c0_i32_1 = arith.constant 0 : i32
    return %c0_i32, %c0_i32_0 : i32, i32
  }
  func.func @transform_12(%arg0: i32) -> (i32, i32) {
    %c0_i32 = arith.constant 0 : i32
    %c0_i32_0 = arith.constant 0 : i32
    %c0_i32_1 = arith.constant 0 : i32
    return %c0_i32, %c0_i32_0 : i32, i32
  }
  func.func @transform_13(%arg0: i32) -> (i32, i32) {
    %c0_i32 = arith.constant 0 : i32
    %c0_i32_0 = arith.constant 0 : i32
    %c0_i32_1 = arith.constant 0 : i32
    return %c0_i32, %c0_i32_0 : i32, i32
  }
  func.func @transform_14(%arg0: i32) -> (i32, i32) {
    %c0_i32 = arith.constant 0 : i32
    %c0_i32_0 = arith.constant 0 : i32
    %c0_i32_1 = arith.constant 0 : i32
    return %c0_i32, %c0_i32_0 : i32, i32
  }
  func.func @transform_15(%arg0: i32) -> (i32, i32) {
    %c0_i32 = arith.constant 0 : i32
    %c0_i32_0 = arith.constant 0 : i32
    %c0_i32_1 = arith.constant 0 : i32
    return %c0_i32, %c0_i32_0 : i32, i32
  }
  func.func @transform_16(%arg0: i32) -> (i32, i32) {
    %c0_i32 = arith.constant 0 : i32
    %c0_i32_0 = arith.constant 0 : i32
    %c0_i32_1 = arith.constant 0 : i32
    return %c0_i32, %c0_i32_0 : i32, i32
  }
  func.func @transform_17(%arg0: i32) -> (i32, i32) {
    %c0_i32 = arith.constant 0 : i32
    %c0_i32_0 = arith.constant 0 : i32
    %c0_i32_1 = arith.constant 0 : i32
    return %c0_i32, %c0_i32_0 : i32, i32
  }
  func.func @transform_18(%arg0: i32) -> (i32, i32) {
    %c0_i32 = arith.constant 0 : i32
    %c0_i32_0 = arith.constant 0 : i32
    %c0_i32_1 = arith.constant 0 : i32
    return %c0_i32, %c0_i32_0 : i32, i32
  }
  func.func @transform_19(%arg0: i32) -> (i32, i32) {
    %c0_i32 = arith.constant 0 : i32
    %c0_i32_0 = arith.constant 0 : i32
    %c0_i32_1 = arith.constant 0 : i32
    return %c0_i32, %c0_i32_0 : i32, i32
  }
  func.func @transform_20(%arg0: i32) -> (i32, i32) {
    %c0_i32 = arith.constant 0 : i32
    %c0_i32_0 = arith.constant 0 : i32
    %c0_i32_1 = arith.constant 0 : i32
    return %c0_i32, %c0_i32_0 : i32, i32
  }
  func.func @transform_21(%arg0: i32) -> (i32, i32) {
    %c0_i32 = arith.constant 0 : i32
    %c0_i32_0 = arith.constant 0 : i32
    %c0_i32_1 = arith.constant 0 : i32
    return %c0_i32, %c0_i32_0 : i32, i32
  }
  func.func @transform_22(%arg0: i32) -> (i32, i32, i32) {
    %c0_i32 = arith.constant 0 : i32
    %c0_i32_0 = arith.constant 0 : i32
    %c0_i32_1 = arith.constant 0 : i32
    return %arg0, %c0_i32, %c0_i32_0 : i32, i32, i32
  }
}

</mosaic_0001>

<bundles_post_ra>
// kernel: tpu_custom_call.1
= control target key start
LH: loop header
LB: loop body
LE: loop exit
PB: predicated region body
PF: predicated region fallthrough
CT: control target
= control target key end

     0   :  { %s6284_s0 = inlined_call_operand.hbm [shape: f32[2,16,128], index: 0, kind: input, shape index: {}]   ;;  %s6285_s1 = inlined_call_operand.hbm [shape: f32[2,24,128], index: 1, kind: input, shape index: {}]   ;;  %s6286_s2 = inlined_call_operand.hbm [shape: bf16[128,384], index: 2, kind: input, shape index: {}]   ;;  %s6287_s3 = inlined_call_operand.hbm [shape: f32[1,384], index: 3, kind: input, shape index: {}]   ;;  %s6288_s4 = inlined_call_operand.hbm [shape: bf16[128,128], index: 4, kind: input, shape index: {}]   ;;  %s6289_s5 = inlined_call_operand.hbm [shape: f32[1,128], index: 5, kind: input, shape index: {}]   ;;  %s6290_s6 = inlined_call_operand.vmem [shape: f32[1,128], index: 6, kind: input, shape index: {}]   ;;  %s6291_s7 = inlined_call_operand.vmem [shape: f32[1,128], index: 7, kind: input, shape index: {}]   ;;  %s6292_s8 = inlined_call_operand.hbm [shape: bf16[128,128], index: 8, kind: input, shape index: {}]   ;;  %s6293_s9 = inlined_call_operand.vmem [shape: f32[1,128], index: 9, kind: input, shape index: {}]   ;;  %s6294_s10 = inlined_call_operand.hbm [shape: bf16[128,256], index: 10, kind: input, shape index: {}]   ;;  %s6295_s11 = inlined_call_operand.vmem [shape: f32[1,256], index: 11, kind: input, shape index: {}]   ;;  %s6296_s12 = inlined_call_operand.hbm [shape: bf16[128,128], index: 12, kind: input, shape index: {}]   ;;  %s6297_s13 = inlined_call_operand.vmem [shape: f32[1,128], index: 13, kind: input, shape index: {}]   ;;  %s6298_s14 = inlined_call_operand.vmem [shape: f32[1,128], index: 14, kind: input, shape index: {}]   ;;  %s6299_s15 = inlined_call_operand.vmem [shape: f32[1,128], index: 15, kind: input, shape index: {}]   ;;  %s6300_s16 = inlined_call_operand.hbm [shape: bf16[128,256], index: 16, kind: input, shape index: {}]   ;;  %s6301_s17 = inlined_call_operand.vmem [shape: f32[1,256], index: 17, kind: input, shape index: {}]   ;;  %s6302_s18 = inlined_call_operand.hbm [shape: bf16[256,128], index: 18, kind: input, shape index: {}]   ;;  %s6303_s19 = inlined_call_operand.vmem [shape: f32[1,128], index: 19, kind: input, shape index: {}]   ;;  %s6304_s20 = inlined_call_operand.vmem [shape: f32[1,128], index: 20, kind: input, shape index: {}]   ;;  %s6305_s21 = inlined_call_operand.vmem [shape: f32[1,128], index: 21, kind: input, shape index: {}]   ;;  %s6306_s22 = inlined_call_operand.hbm [shape: f32[2,16,128], index: 22, kind: output, shape index: {}]  }
   0x1   :  { %6319 = sst [smem:[#allocation34_spill]] %s6284_s0 }
   0x2   :  { %6320 = sst [smem:[#allocation35_spill]] %s6285_s1 }
   0x3   :  { %6321 = sst [smem:[#allocation36_spill]] %s6286_s2 }
   0x4   :  { %6322 = sst [smem:[#allocation37_spill]] %s6287_s3 }
   0x5   :  { %6323 = sst [smem:[#allocation38_spill]] %s6288_s4 }
   0x6   :  { %6324 = sst [smem:[#allocation39_spill]] %s6289_s5 }
   0x7   :  { %6325 = sst [smem:[#allocation40_spill]] %s6290_s6 }
   0x8   :  { %6326 = sst [smem:[#allocation41_spill]] %s6292_s8 }
   0x9   :  { %6327 = sst [smem:[#allocation42_spill]] %s6294_s10 }
   0xa   :  { %6328 = sst [smem:[#allocation43_spill]] %s6296_s12 }
   0xb   :  { %6329 = sst [smem:[#allocation44_spill]] %s6297_s13 }
   0xc   :  { %6330 = sst [smem:[#allocation45_spill]] %s6298_s14 }
   0xd   :  { %6331 = sst [smem:[#allocation46_spill]] %s6299_s15 }
   0xe   :  { %6332 = sst [smem:[#allocation47_spill]] %s6300_s16 }
   0xf   :  { %6333 = sst [smem:[#allocation48_spill]] %s6301_s17 }
  0x10   :  { %6334 = sst [smem:[#allocation49_spill]] %s6302_s18 }
  0x11   :  { %6335 = sst [smem:[#allocation50_spill]] %s6303_s19 }
  0x12   :  { %6336 = sst [smem:[#allocation51_spill]] %s6304_s20 }
  0x13   :  { %6337 = sst [smem:[#allocation52_spill]] %s6305_s21 }
  0x14   :  { %6338 = sst [smem:[#allocation53_spill]] %s6306_s22 }
  0x15   :  { %27 = vsyncpa [#allocation3], 0 }
  0x16   :  { %29 = vsyncpa [#allocation3 + $0x1], 0 }
  0x17   :  { %30 = vsyncpa [#allocation6], 0 }
  0x18   :  { %32 = vsyncpa [#allocation6 + $0x1], 0 }
  0x19   :  { %33 = vsyncpa [#allocation9], 0 }
  0x1a   :  { %34 = vsyncpa [#allocation12], 0 }
  0x1b   :  { %35 = vsyncpa [#allocation15], 0 }
  0x1c   :  { %36 = vsyncpa [#allocation18], 0 }
  0x1d   :  { %37 = vsyncpa [#allocation4], 0 }
  0x1e   :  { %39 = vsyncpa [#allocation4 + $0x1], 0  ;;  %s5517_s3 = smov 0   ;;  %s5519_s28 = smov 0  }
  0x1f   :  { %s5521_s29 = smov 0   ;;  %s5523_s30 = smov 0  }
  0x20 LB: > { %6339 = sst [smem:[#allocation29_spill]] %s5373_s29  ;;  %s5541_s5 = sadd.s32 4294967295, %s5377_s30   ;;  %s5377_s30 = sphi %s5523_s30, %s6376_s30   ;;  %s5373_s29 = sphi %s5521_s29, %s6381_s29   ;;  %s5369_s28 = sphi %s5519_s28, %s6380_s28   ;;  %s5365_s3 = sphi %s5517_s3, %s6379_s3  }
  0x21   : > { %6340 = sst [smem:[#allocation30_spill]] %s5377_s30  ;;  %p4027_p0 = scmp.ge.s32.totalorder %s5377_s30, 1 }
  0x22   : > { %s6341_s23 = sld [smem:[#allocation36_spill]]  ;;  %p66_p1 = scmp.eq.s32.totalorder %s5541_s5, 0 }
  0x23   : > { %p548_p2 = scmp.lt.s32.totalorder %s5377_s30, 3  ;;  %s5379_s6 = smov [#allocation7]  }
  0x24   : > { %s561_s25 = sshll.u32 %s5379_s6, 4  ;;  %s6343_s27 = sld [smem:[#allocation37_spill]]  ;;  %s562_s25 = int_to_ptr.vmem [resolvable:$true] %s561_s25 }
  0x25   : > { %p5546_p3 = pnand %p4027_p0, %p548_p2  ;;  %s6345_s6 = sld [smem:[#allocation39_spill]] }
  0x26   : > { %s5380_s20 = smov [#allocation8]   ;;  %s5381_s17 = smov 192  }
  0x27   : > { %p4610_p4 = pneg %p5546_p3  ;;  %s576_s19 = sshll.u32 %s5380_s20, 4  ;;  %s577_s19 = int_to_ptr.vmem [resolvable:$true] %s576_s19 }
  0x28   : > { %s559_s1 = sshll.u32 %s6341_s23, 4  ;;  %s5382_s15 = smov 12   ;;  %s560_s1 = int_to_ptr.hbm [resolvable:$true] %s559_s1 }
  0x29   : > { %p5558_p6 = pnand %p4610_p4, %p66_p1  ;;  %s6346_s10 = sld [smem:[#allocation42_spill]] }
  0x2a   : > { %s574_s4 = sshll.u32 %s6343_s27, 4  ;;  %s5383_s14 = smov [#allocation11]   ;;  %s575_s4 = int_to_ptr.hbm [resolvable:$true] %s574_s4 }
  0x2b   : > { %s600_s21 = sshll.u32 %s6345_s6, 4  ;;  %s602_s13 = sshll.u32 %s5383_s14, 4  ;;  %s601_s21 = int_to_ptr.hbm [resolvable:$true] %s600_s21  ;;  %s603_s13 = int_to_ptr.vmem [resolvable:$true] %s602_s13 }
  0x2c   : > { %4613 = dma.hbm_to_vmem [thread:$0]  (!%p5558_p6), %s560_s1, 3072, %s562_s25, [#allocation6], %s5381_s17, %s5381_s17, %s5382_s15  }
  0x2d   : > { %4616 = dma.hbm_to_vmem [thread:$0]  (!%p5558_p6), %s575_s4, 48, %s577_s19, [#allocation9]  }
  0x2e   : > { %4622 = dma.hbm_to_vmem [thread:$0]  (!%p5558_p6), %s601_s21, 16, %s603_s13, [#allocation12]  }
  0x2f   : > { %s634_s27 = sshll.u32 %s6346_s10, 4  ;;  %s5384_s20 = smov [#allocation14]   ;;  %s635_s27 = int_to_ptr.hbm [resolvable:$true] %s634_s27 }
  0x30   : > { %s636_s22 = sshll.u32 %s5384_s20, 4  ;;  %s6310_s23 = smov 128   ;;  %s637_s22 = int_to_ptr.vmem [resolvable:$true] %s636_s22 }
  0x31   : > { %s6312_s15 = smov 8   ;;  %s6347_s16 = sld [smem:[#allocation47_spill]] }
  0x32   : > { %4628 = dma.hbm_to_vmem [thread:$0]  (!%p5558_p6), %s635_s27, 2048, %s637_s22, [#allocation15], %s6310_s23, %s6310_s23, %s6312_s15  }
  0x33   : > { %s5387_s1 = smov [#allocation17]   ;;  %s6348_s4 = sld [smem:[#allocation38_spill]] }
  0x34   : > { %s676_s25 = sshll.u32 %s5387_s1, 4  ;;  %s5388_s26 = smov [#allocation10]   ;;  %s677_s25 = int_to_ptr.vmem [resolvable:$true] %s676_s25 }
  0x35   : > { %s587_s2 = sshll.u32 %s5388_s26, 4  ;;  %s5389_s27 = smov 64   ;;  %s588_s2 = int_to_ptr.vmem [resolvable:$true] %s587_s2 }
  0x36   : > { %s5390_s20 = smov 4   ;;  %s6349_s8 = sld [smem:[#allocation41_spill]] }
  0x37   : > { %s674_s14 = sshll.u32 %s6347_s16, 4  ;;  %s5391_s1 = smov [#allocation13]   ;;  %s675_s14 = int_to_ptr.hbm [resolvable:$true] %s674_s14 }
  0x38   : > { %4634 = dma.hbm_to_vmem [thread:$0]  (!%p5558_p6), %s675_s14, 2048, %s677_s25, [#allocation18], %s6310_s23, %s6310_s23, %s6312_s15  }
  0x39   : > { %s585_s6 = sshll.u32 %s6348_s4, 4  ;;  %s619_s13 = sshll.u32 %s5391_s1, 4  ;;  %s586_s6 = int_to_ptr.hbm [resolvable:$true] %s585_s6  ;;  %s620_s13 = int_to_ptr.vmem [resolvable:$true] %s619_s13 }
  0x3a   : > { %4619 = dma.hbm_to_vmem [thread:$0]  (!%p5558_p6), %s586_s6, 1024, %s588_s2, [#allocation9], %s5389_s27, %s5389_s27, %s5390_s20  }
  0x3b   : > { %s6350_s12 = sld [smem:[#allocation43_spill]]  ;;  %s5392_s4 = smov [#allocation16]  }
  0x3c   : > { %s617_s19 = sshll.u32 %s6349_s8, 4  ;;  %s653_s6 = sshll.u32 %s5392_s4, 4  ;;  %s618_s19 = int_to_ptr.hbm [resolvable:$true] %s617_s19  ;;  %s654_s6 = int_to_ptr.vmem [resolvable:$true] %s653_s6 }
  0x3d   : > { %4625 = dma.hbm_to_vmem [thread:$0]  (!%p5558_p6), %s618_s19, 1024, %s620_s13, [#allocation12], %s5389_s27, %s5389_s27, %s5390_s20  }
  0x3e   : > { %s6351_s18 = sld [smem:[#allocation49_spill]]  ;;  %s5393_s17 = smov [#allocation19]  }
  0x3f   : > { %s693_s19 = sshll.u32 %s5393_s17, 4  ;;  %s4026_s1 = sadd.s32 4294967294, %s5377_s30   ;;  %s694_s19 = int_to_ptr.vmem [resolvable:$true] %s693_s19 }
  0x40   : > { %s5609_s13 = sadd.s32 1, %s5377_s30   ;;  %s52_s14 = sadd.s32 1, %s5373_s29 }
  0x41   : > { %s651_s21 = sshll.u32 %s6350_s12, 4  ;;  %6352 = sst [smem:[#allocation31_spill]] %s5609_s13  ;;  %s652_s21 = int_to_ptr.hbm [resolvable:$true] %s651_s21 }
  0x42   : > { %4631 = dma.hbm_to_vmem [thread:$0]  (!%p5558_p6), %s652_s21, 1024, %s654_s6, [#allocation15], %s5389_s27, %s5389_s27, %s5390_s20  }
  0x43   : > { %s49_s25 = ssub.s32 %s5377_s30, %s5609_s13  ;;  %p59_p7 = scmp.ne.s32.totalorder %s5373_s29, %s5369_s28 }
  0x44   : > { %s691_s22 = sshll.u32 %s6351_s18, 4  ;;  %p50_p8 = scmp.eq.s32.totalorder %s49_s25, 0  ;;  %s692_s22 = int_to_ptr.hbm [resolvable:$true] %s691_s22 }
  0x45   : > { %4637 = dma.hbm_to_vmem [thread:$0]  (!%p5558_p6), %s692_s22, 2048, %s694_s19, [#allocation18], %s5389_s27, %s5389_s27, %s5390_s20  }
  0x46   : > { %p60_p9 = scmp.eq.s32.totalorder %s5377_s30, 0  ;;  %p65_p10 = scmp.ne.s32.totalorder %s5369_s28, %s5365_s3 }
  0x47   : > { %p535_p11 = scmp.eq.s32.totalorder %s5541_s5, 1  ;;  %p541_p2 = scmp.eq.s32.totalorder %s4026_s1, 1 }
  0x48   : > { %s5621_s21 = scalar_select %p50_p8, %s5373_s29, %s52_s14  }
  0x49   : > { %p5623_p12 = por %p60_p9, %p59_p7  ;;  %p5629_p13 = por %p66_p1, %p65_p10 }
  0x4a   : > { %6353 = sst [smem:[#allocation32_spill]] %s5621_s21  ;;  %p5633_p0 = por %p535_p11, %p59_p7 }
  0x4b   : > { %p4658_p4 = scmp.lt.s32.totalorder %s5377_s30, 2  ;;  %s5639_s20 = sand.u32 1, %s5373_s29  }
  0x4c   : > { %p5641_p6 = por %p541_p2, %p65_p10  ;;  %s4038_s26 = sshll.u32 %s5639_s20, 4 }
  0x4d   : > { %s4467_s2 = sshll.u32 %s5377_s30, 4  ;;  %s6359_s19 = sld [smem:[#allocation34_spill]] }
  0x4e   : > { %s6357_s6 = scalar_select %p5641_p6, 1, 0 }
  0x4f   : > { %s720_s23 = scalar_lea.vmem [#allocation2], %s4038_s26  ;;  %p5652_p7 = pnand %p4658_p4, %p5623_p12 }
  0x50   : > { %6358 = sst [smem:[#allocation33_spill]] %s6357_s6  ;;  %s728_s15 = sshll.u32 %s720_s23, 4  ;;  %s729_s15 = int_to_ptr.vmem [resolvable:$true] %s728_s15 }
  0x51   : > { %s738_s8 = sand.u32 1, %s5377_s30   ;;  %s4565_s10 = smul.u32 24, %s5639_s20 }
  0x52   : > { %s4566_s12 = smul.u32 24, %s5377_s30  ;;  %s717_s16 = scalar_lea.sflag [#allocation3], %s5639_s20 }
  0x53   : > { %s725_s14 = scalar_lea.hbm %s6359_s19, %s4467_s2  ;;  %p5231_p9 = pneg %p5652_p7 }
  0x54   : > { %s726_s25 = sshll.u32 %s725_s14, 4  ;;  %s5234_s26 = scalar_lea.hbm %s6359_s19, 32  ;;  %s727_s25 = int_to_ptr.hbm [resolvable:$true] %s726_s25 }
  0x55   : > { %s5227_s18 = sshra.s32 %s727_s25, 4  ;;  %s5228_s18 = int_to_ptr.hbm [resolvable:$true] %s5227_s18 }
  0x56   : > { %s5229_s22 = scalar_lea.hbm %s5228_s18, 16  ;;  %p5235_p12 = scmp.lt.s32.totalorder %s5228_s18, %s6359_s19 }
  0x57   : > { %p5230_p8 = scmp.ne.s32.totalorder %s5228_s18, %s5229_s22  ;;  %p5236_p2 = scmp.lt.s32.totalorder %s5234_s26, %s5229_s22 }
  0x59   : > { %p5232_p10 = pnand %p5231_p9, %p5230_p8  ;;  %p5237_p4 = por %p5236_p2, %p5235_p12 }
  0x5b   : > { %p5233_p11 = pneg %p5232_p10 }
  0x5d   : > { %p5238_p5 = pnand %p5237_p4, %p5233_p11 }
  0x5f   : > { %5241 = shalt.err (!%p5238_p5)
}
  0x60   : > { %s6361_s20 = smov 8   ;;  %s6362_s14 = smov 128  }
  0x61   : > { %4641 = dma.hbm_to_vmem [thread:$0]  (!%p5652_p7), %s727_s25, 256, %s729_s15, %s717_s16, %s6362_s14, %s6362_s14, %s6361_s20  }
  0x62   : > { %s6363_s13 = sld [smem:[#allocation35_spill]]  ;;  %s742_s30 = scalar_lea.vmem [#allocation5], %s4565_s10 }
  0x63   : > { %s750_s6 = sshll.u32 %s742_s30, 4  ;;  %s739_s18 = scalar_lea.sflag [#allocation6], %s738_s8  ;;  %s751_s6 = int_to_ptr.vmem [resolvable:$true] %s750_s6 }
  0x68   : > { %s747_s23 = scalar_lea.hbm %s6363_s13, %s4566_s12  ;;  %s5264_s15 = scalar_lea.hbm %s6363_s13, 48 }
  0x69   : > { %s748_s4 = sshll.u32 %s747_s23, 4  ;;  %s749_s4 = int_to_ptr.hbm [resolvable:$true] %s748_s4 }
  0x6a   : > { %s5257_s22 = sshra.s32 %s749_s4, 4  ;;  %s5258_s22 = int_to_ptr.hbm [resolvable:$true] %s5257_s22 }
  0x6b   : > { %s5259_s26 = scalar_lea.hbm %s5258_s22, 24  ;;  %p5265_p11 = scmp.lt.s32.totalorder %s5258_s22, %s6363_s13 }
  0x6c   : > { %p5260_p5 = scmp.ne.s32.totalorder %s5258_s22, %s5259_s26  ;;  %p5266_p12 = scmp.lt.s32.totalorder %s5264_s15, %s5259_s26 }
  0x6e   : > { %p5262_p8 = pnand %p5260_p5, %p5231_p9  ;;  %p5267_p2 = por %p5266_p12, %p5265_p11 }
  0x70   : > { %p5263_p10 = pneg %p5262_p8 }
  0x72   : > { %p5268_p4 = pnand %p5267_p2, %p5263_p10 }
  0x74   : > { %5271 = shalt.err (!%p5268_p4)
}
  0x75   : > { %4644 = dma.hbm_to_vmem [thread:$0]  (!%p5652_p7), %s749_s4, 384, %s751_s6, %s739_s18, %s6362_s14, %s6362_s14, %s6361_s20  }
  0x76   : > { %762 = sbr.rel (%p5546_p3) target bundleno = 4311 (0x10d7), region = 108  ;;  %s5696_s8 = sand.u32 (!%p5546_p3), 1, %s5369_s28  }
  0x77   : > { %s4043_s10 = sshll.u32 (!%p5546_p3), %s5696_s8, 4  ;;  %s765_s30 = scalar_lea.sflag (!%p5546_p3), [#allocation3], %s5696_s8 }
  0x78   : > { %s5702_s21 = scalar_lea.vmem (!%p5546_p3), [#allocation2], %s4043_s10 }
  0x7b   : > { %5332 = dma.done.wait (%p5629_p13), %s765_s30, 256  }
  0x7c   : > { %5334 = vsyncadd (%p5629_p13), %s765_s30, 4294967040  ;;  %s774_s24 = sand.u32 1, %s5541_s5   ;;  %s4567_s6 = smul.u32 24, %s5696_s8 }
  0x7d   : > { %s775_s25 = scalar_lea.sflag [#allocation6], %s774_s24 }
  0x7e   : > { %s5710_s1 = scalar_lea.vmem [#allocation5], %s4567_s6 }
  0x7f   : > { %5336 = dma.done.wait (%p5629_p13), %s775_s25, 384  }
  0x80   : > { %5338 = vsyncadd (%p5629_p13), %s775_s25, 4294966912 }
  0x81   : > { %5340 = dma.done.wait (%p66_p1), [#allocation6], 3072  }
  0x82   : > { %5342 = vsyncadd (%p66_p1), [#allocation6], 4294964224 }
  0x83   : > { %5344 = dma.done.wait (%p66_p1), [#allocation9], 1072  }
  0x84   : > { %5346 = vsyncadd (%p66_p1), [#allocation9], 4294966224 }
  0x85   : > { %5348 = dma.done.wait (%p66_p1), [#allocation12], 1040  }
  0x86   : > { %5350 = vsyncadd (%p66_p1), [#allocation12], 4294966256 }
  0x87   : > { %5352 = dma.done.wait (%p66_p1), [#allocation15], 3072  }
  0x88   : > { %5354 = vsyncadd (%p66_p1), [#allocation15], 4294964224 }
  0x89   : > { %5356 = dma.done.wait (%p66_p1), [#allocation18], 4096  }
  0x8a   : > { %5358 = vsyncadd (%p66_p1), [#allocation18], 4294963200  ;;  %v4140_v0 = vld [vmem:[#allocation7 + $0xa8] sm:$0xf]  ;;  %v4490_v1 = vld [vmem:[#allocation7 + $0xb0] sm:$0xf0] }
  0x8b   : > { %v4489_v2 = vld [vmem:[#allocation7 + $0xac] sm:$0xf]  ;;  %v4141_v3 = vor.u32 %v4490_v1, %v4140_v0  ;;  %v4142_v4 = vld [vmem:[#allocation7 + $0xb4] sm:$0xf0]  ;;  %v4128_v5 = vld [vmem:[#allocation7 + $0x90] sm:$0xf] }
  0x8c   : > { %v4487_v6 = vld [vmem:[#allocation7 + $0x98] sm:$0xf0]  ;;  %v4145_v7 = vor.u32 %v4489_v2, %v4142_v4  ;;  %v4486_v8 = vld [vmem:[#allocation7 + $0x94] sm:$0xf]  ;;  %v4130_v9 = vld [vmem:[#allocation7 + $0x9c] sm:$0xf0] }
  0x8d   : > { %1062 = vmatpush.bf16.msra.mxu0 %v4141_v3  ;;  %v4129_v10 = vor.u32 %v4487_v6, %v4128_v5  ;;  %v4133_v11 = vor.u32 %v4486_v8, %v4130_v9  ;;  %v4116_v12 = vld [vmem:[#allocation7 + $0x78] sm:$0xf]  ;;  %v4484_v13 = vld [vmem:[#allocation7 + $0x80] sm:$0xf0]  ;;  %v4483_v14 = vld [vmem:[#allocation7 + $0x7c] sm:$0xf] }
  0x8e   : > { %1076 = vmatpush.bf16.msra.mxu1 %v4145_v7  ;;  %v4118_v15 = vld [vmem:[#allocation7 + $0x84] sm:$0xf0]  ;;  %v4117_v16 = vor.u32 %v4484_v13, %v4116_v12  ;;  %v4104_v18 = vld [vmem:[#allocation7 + $0x60] sm:$0xf]  ;;  %v4481_v19 = vld [vmem:[#allocation7 + $0x68] sm:$0xf0] }
  0x8f   : > { %v4121_v17 = vor.u32 %v4483_v14, %v4118_v15  ;;  %v4480_v20 = vld [vmem:[#allocation7 + $0x64] sm:$0xf]  ;;  %v4106_v21 = vld [vmem:[#allocation7 + $0x6c] sm:$0xf0]  ;;  %v4092_v22 = vld [vmem:[#allocation7 + $0x48] sm:$0xf]  ;;  %v4105_v23 = vor.u32 %v4481_v19, %v4104_v18 }
  0x90   : > { %v4478_v24 = vld [vmem:[#allocation7 + $0x50] sm:$0xf0]  ;;  %v4477_v25 = vld [vmem:[#allocation7 + $0x4c] sm:$0xf]  ;;  %v4109_v26 = vor.u32 %v4480_v20, %v4106_v21  ;;  %v4094_v27 = vld [vmem:[#allocation7 + $0x54] sm:$0xf0] }
  0x91   : > { %1063 = vmatpush.bf16.msra.mxu0 %v4129_v10  ;;  %v4093_v28 = vor.u32 %v4478_v24, %v4092_v22  ;;  %v4097_v29 = vor.u32 %v4477_v25, %v4094_v27  ;;  %v4080_v30 = vld [vmem:[#allocation7 + $0x30] sm:$0xf]  ;;  %v4475_v31 = vld [vmem:[#allocation7 + $0x38] sm:$0xf0]  ;;  %v4474_v32 = vld [vmem:[#allocation7 + $0x34] sm:$0xf] }
  0x92   : > { %1077 = vmatpush.bf16.msra.mxu1 %v4133_v11  ;;  %v4082_v33 = vld [vmem:[#allocation7 + $0x3c] sm:$0xf0]  ;;  %v4081_v34 = vor.u32 %v4475_v31, %v4080_v30  ;;  %v4068_v36 = vld [vmem:[#allocation7 + $0x18] sm:$0xf]  ;;  %v4472_v37 = vld [vmem:[#allocation7 + $0x20] sm:$0xf0] }
  0x93   : > { %v4085_v35 = vor.u32 %v4474_v32, %v4082_v33  ;;  %v4471_v38 = vld [vmem:[#allocation7 + $0x1c] sm:$0xf]  ;;  %v4070_v39 = vld [vmem:[#allocation7 + $0x24] sm:$0xf0]  ;;  %v4069_v40 = vor.u32 %v4472_v37, %v4068_v36  ;;  %v4056_v42 = vld [vmem:[#allocation7] sm:$0xf] }
  0x94   : > { %v4073_v41 = vor.u32 %v4471_v38, %v4070_v39  ;;  %v4469_v43 = vld [vmem:[#allocation7 + $0x8] sm:$0xf0]  ;;  %v4468_v44 = vld [vmem:[#allocation7 + $0x4] sm:$0xf]  ;;  %v4058_v45 = vld [vmem:[#allocation7 + $0xc] sm:$0xf0] }
  0x95   : > { %1064 = vmatpush.bf16.msra.mxu0 %v4117_v16  ;;  %v4057_v46 = vor.u32 %v4469_v43, %v4056_v42  ;;  %v891_v47 = vld [vmem:[%s5702_s21] sm:$0xff]  ;;  %v892_v48 = vld [vmem:[%s5702_s21 + $0x8] sm:$0xff]  ;;  %v4061_v49 = vor.u32 %v4468_v44, %v4058_v45  ;;  %s5394_s0 = smov 32   ;;  %s5395_s17 = smov 64   ;;  %vm1235_vm0 = vcmask 261120   ;;  %vm1336_vm2 = vcmask 130048  }
  0x96   : > { %1078 = vmatpush.bf16.msra.mxu1 %v4121_v17  ;;  %v5738_v50 = vpack.c.bf16 %v892_v48, %v891_v47  ;;  %v5742_v51 = vld [vmem:[#allocation8] sm:$0x7]  ;;  %s5396_s20 = smov 96   ;;  %v4148_v25 = vld [vmem:[#allocation7 + $0xb0] sm:$0xf]  ;;  %vm1774_vm4 = vcmask 1047556  }
  0x97   : > { %v929_v52 = vperm.slane %v5742_v51, 1  ;;  %v928_v53 = vperm.slane %v5742_v51, 0  ;;  %v4124_v32 = vld [vmem:[#allocation7 + $0x80] sm:$0xf]  ;;  %v4485_v33 = vld [vmem:[#allocation7 + $0x88] sm:$0xf0] }
  0x98   : > { %v4482_v36 = vld [vmem:[#allocation7 + $0x70] sm:$0xf0]  ;;  %v4100_v39 = vld [vmem:[#allocation7 + $0x50] sm:$0xf]  ;;  %v4088_v44 = vld [vmem:[#allocation7 + $0x38] sm:$0xf] }
  0x99   : > { %1065 = vmatpush.bf16.msra.mxu0 %v4105_v23  ;;  %v4476_v45 = vld [vmem:[#allocation7 + $0x40] sm:$0xf0]  ;;  %v4076_v47 = vld [vmem:[#allocation7 + $0x20] sm:$0xf]  ;;  %v4473_v48 = vld [vmem:[#allocation7 + $0x28] sm:$0xf0] }
  0x9a   : > { %1079 = vmatpush.bf16.msra.mxu1 %v4109_v26  ;;  %v4491_v26 = vld [vmem:[#allocation7 + $0xb8] sm:$0xf0]  ;;  %vm2020_vm5 = vcmask 523264   ;;  %vm2023_vm6 = vcmask 785408   ;;  %s6364_s22 = sld [smem:[#allocation40_spill]]  ;;  %vm2640_vm14 = vcmask 195584  }
  0x9b   : > { %v4149_v27 = vor.u32 %v4491_v26, %v4148_v25  ;;  %v930_v25 = vperm.slane %v5742_v51, 2  ;;  %s6365_s30 = sld [smem:[#allocation44_spill]]  ;;  %s4564_s12 = sshll.u32 %s5541_s5, 4 }
  0x9c   : > { %s6366_s6 = sld [smem:[#allocation45_spill]]  ;;  %s889_s25 = scalar_lea.vmem [#allocation20], %s4043_s10 }
  0x9d   : > { %1066 = vmatpush.bf16.msra.mxu0 %v4093_v28  ;;  %1090 = vmatpush.bf16.msra.mxu2 %v4149_v27  ;;  %v4136_v28 = vld [vmem:[#allocation7 + $0x98] sm:$0xf]  ;;  %s6368_s14 = sld [smem:[#allocation48_spill]]  ;;  %s3830_s5 = scalar_lea.sflag [#allocation4], %s5696_s8 }
  0x9e   : > { %1080 = vmatpush.bf16.msra.mxu1 %v4097_v29  ;;  %v4488_v29 = vld [vmem:[#allocation7 + $0xa0] sm:$0xf0]  ;;  %s6369_s18 = sld [smem:[#allocation50_spill]] }
  0x9f   : > { %v4137_v30 = vor.u32 %v4488_v29, %v4136_v28  ;;  %s6370_s2 = sld [smem:[#allocation51_spill]] }
  0xa0   : > { %s6371_s29 = sld [smem:[#allocation52_spill]] }
  0xa1   : > { %1067 = vmatpush.bf16.msra.mxu0 %v4081_v34  ;;  %1091 = vmatpush.bf16.msra.mxu2 %v4137_v30  ;;  %v4125_v34 = vor.u32 %v4485_v33, %v4124_v32  ;;  %s6372_s24 = sld [smem:[#allocation53_spill]] }
  0xa2   : > { %1081 = vmatpush.bf16.msra.mxu1 %v4085_v35  ;;  %v4112_v35 = vld [vmem:[#allocation7 + $0x68] sm:$0xf] }
  0xa3   : > { %v4113_v37 = vor.u32 %v4482_v36, %v4112_v35 }
  0xa5   : > { %1068 = vmatpush.bf16.msra.mxu0 %v4069_v40  ;;  %1092 = vmatpush.bf16.msra.mxu2 %v4125_v34  ;;  %v4479_v40 = vld [vmem:[#allocation7 + $0x58] sm:$0xf0] }
  0xa6   : > { %1082 = vmatpush.bf16.msra.mxu1 %v4073_v41  ;;  %v4101_v42 = vor.u32 %v4479_v40, %v4100_v39 }
  0xa7   : > { %s5307_s23 = scalar_lea.hbm %s6372_s24, 32 }
  0xa9   : > { %1069 = vmatpush.bf16.msra.mxu0 %v4057_v46  ;;  %1093 = vmatpush.bf16.msra.mxu2 %v4113_v37  ;;  %v4089_v46 = vor.u32 %v4476_v45, %v4088_v44 }
  0xaa   : > { %1083 = vmatpush.bf16.msra.mxu1 %v4061_v49 }
  0xac   : > { %1070 = vmatmul.bf16.vlgmr.msra.gmra.mxu0 %v5738_v50 }
  0xad   : > { %1084 = vmatmul.bf16.vlgmr.msra.gmra.mxu1 %v5738_v50  ;;  %1094 = vmatpush.bf16.msra.mxu2 %v4101_v42 }
  0xb1   : > { %1095 = vmatpush.bf16.msra.mxu2 %v4089_v46 }
 0x129   : > { %v1071_v54 = vpop.f32.mrf.mxu0 }
 0x12a   : > { %v1085_v55 = vpop.f32.mrf.mxu1  ;;  %v1072_v57 = vadd.f32 %v1071_v54, %v928_v53  ;;  %v4470_v54 = vld [vmem:[#allocation7 + $0x10] sm:$0xf0] }
 0x12b   : > { %v1086_v56 = vadd.f32 %v1085_v55, %v929_v52 }
 0x12c   : > { %v1104_v59 = vpack.c.bf16 %v1072_v57, %v1072_v57 }
 0x12d   : > { %v1106_v58 = vpack.c.bf16 %v1086_v56, %v1086_v56 }
 0x12e   : > { %v1232_v0 = vunpack.c.l.b16 %v1104_v59 }
 0x12f   : > { %1134 = vrot.lane.b32.xlu2 %v1106_v58, %s5394_s0  ;;  %1130 = vrot.lane.b32.xlu1 %v1106_v58, %s5395_s17  ;;  %v1152_v4 = vunpack.c.l.b16 %v1106_v58 }
 0x130   : > { %1126 = vrot.lane.b32.xlu0 %v1106_v58, %s5396_s20 }
 0x131   : > { %v1073_v60 = vpop.f32.mrf.mxu0 }
 0x132   : > { %v1074_v61 = vadd.f32 %v1073_v60, %v928_v53  ;;  %v1087_v62 = vpop.f32.mrf.mxu1  ;;  %v4064_v53 = vld [vmem:[#allocation7 + $0x8] sm:$0xf] }
 0x133   : > { %v1088_v63 = vadd.f32 %v1087_v62, %v929_v52  ;;  %v4077_v52 = vor.u32 %v4473_v48, %v4076_v47  ;;  %v4065_v57 = vor.u32 %v4470_v54, %v4064_v53 }
 0x134   : > { %v1105_v1 = vpack.c.bf16 %v1074_v61, %v1074_v61 }
 0x135   : > { %v1107_v2 = vpack.c.bf16 %v1088_v63, %v1088_v63  ;;  %1096 = vmatpush.bf16.msra.mxu2 %v4077_v52 }
 0x136   : > { %v1233_v3 = vunpack.c.l.b16 %v1105_v1 }
 0x137   : > { %1136 = vrot.lane.b32.xlu2 %v1107_v2, %s5394_s0  ;;  %1132 = vrot.lane.b32.xlu1 %v1107_v2, %s5395_s17  ;;  %v1153_v5 = vunpack.c.l.b16 %v1107_v2 }
 0x138   : > { %1112 = vrot.lane.b32.xlu0 %v1104_v59, %s5396_s20  ;;  %v5752_v6 = vpack.c.b16 %v1233_v3, %v1232_v0 }
 0x139   : > { %v1160_v7 = vpack.c.b16 %v1153_v5, %v1152_v4  ;;  %1097 = vmatpush.bf16.msra.mxu2 %v4065_v57 }
 0x13c   : > { %1098 = vmatmul.bf16.vlgmr.msra.gmra.mxu2 %v5738_v50 }
 0x13f   : > { %1114 = vrot.lane.b32.xlu1 %v1105_v1, %s5396_s20 }
 0x140   : > { %1128 = vrot.lane.b32.xlu0 %v1107_v2, %s5396_s20 }
 0x147   : > { %1118 = vrot.lane.b32.xlu1 %v1105_v1, %s5395_s17 }
 0x148   : > { %1116 = vrot.lane.b32.xlu0 %v1104_v59, %s5395_s17 }
 0x14f   : > { %1120 = vrot.lane.b32.xlu1 %v1104_v59, %s5394_s0 }
 0x157   : > { %1122 = vrot.lane.b32.xlu1 %v1105_v1, %s5394_s0 }
 0x189   : > { %v1135_v8 = vpop.permute.xlu2 %1134 }
 0x18a   : > { %v1158_v10 = vunpack.c.l.b16 %v1135_v8  ;;  %v1321_v8 = vlaneseq }
 0x191   : > { %v1137_v9 = vpop.permute.xlu2 %1136 }
 0x192   : > { %v1159_v11 = vunpack.c.l.b16 %v1137_v9  ;;  %v1322_v9 = vshrl.u32 %v1321_v8, 7 }
 0x194   : > { %v1163_v12 = vpack.c.b16 %v1159_v11, %v1158_v10  ;;  %v1325_v10 = vand.u32 127, %v1321_v8 }
 0x196   : > { %1216 = vxpose.xlu1.c.b16.start.end [1/1] (short) (narrow) %v1163_v12, 32  ;;  %vm1326_vm1 = vcmp.ge.s32.totalorder %v1322_v9, %v1325_v10 }
 0x1a1   : > { %v1131_v13 = vpop.permute.xlu1 %1130 }
 0x1a2   : > { %v1127_v14 = vpop.permute.xlu0 %1126  ;;  %v1156_v16 = vunpack.c.l.b16 %v1131_v13 }
 0x1a3   : > { %v1154_v21 = vunpack.c.l.b16 %v1127_v14 }
 0x1a9   : > { %v1133_v15 = vpop.permute.xlu1 %1132 }
 0x1aa   : > { %v1157_v17 = vunpack.c.l.b16 %v1133_v15  ;;  %v1113_v18 = vpop.permute.xlu0 %1112 }
 0x1ab   : > { %v1253_v62 = vunpack.c.l.b16 %v1113_v18  ;;  %v1323_v18 = vadd.s32 8, %v1322_v9 }
 0x1ac   : > { %v1162_v19 = vpack.c.b16 %v1157_v17, %v1156_v16 }
 0x1ad   : > { %vm1327_vm3 = vcmp.ge.s32.totalorder %v1323_v18, %v1325_v10 }
 0x1ae   : > { %1200 = vxpose.xlu0.c.b16.start.end [1/1] (short) (narrow) %v1162_v19, 32 }
 0x1b1   : > { %v1115_v24 = vpop.permute.xlu1 %1114 }
 0x1b2   : > { %v1129_v20 = vpop.permute.xlu0 %1128  ;;  %v1254_v60 = vunpack.c.l.b16 %v1115_v24 }
 0x1b3   : > { %v1155_v22 = vunpack.c.l.b16 %v1129_v20 }
 0x1b4   : > { %v1255_v63 = vpack.c.b16 %v1254_v60, %v1253_v62 }
 0x1b5   : > { %v1161_v23 = vpack.c.b16 %v1155_v22, %v1154_v21 }
 0x1b7   : > { %4726 = vxpose.binary.xlu2.c.b16.start.end [1/2] (short) (narrow) %v1160_v7, %v1161_v23, 32 }
 0x1b9   : > { %v1119_v31 = vpop.permute.xlu1 %1118 }
 0x1ba   : > { %v1117_v43 = vpop.permute.xlu0 %1116  ;;  %v1274_v2 = vunpack.c.l.b16 %v1119_v31 }
 0x1bb   : > { %v1273_v50 = vunpack.c.l.b16 %v1117_v43 }
 0x1bd   : > { %v1275_v3 = vpack.c.b16 %v1274_v2, %v1273_v50 }
 0x1bf   : > { %v1099_v27 = vpop.f32.mrf.mxu2 }
 0x1c0   : > { %v1100_v30 = vadd.f32 %v1099_v27, %v930_v25 }
 0x1c1   : > { %v1121_v38 = vpop.permute.xlu1 %1120 }
 0x1c2   : > { %v1293_v5 = vunpack.c.l.b16 %v1121_v38  ;;  %v5778_v32 = vpack.c.bf16 %v1100_v30, %v1100_v30 }
 0x1c9   : > { %v1123_v55 = vpop.permute.xlu1 %1122 }
 0x1ca   : > { %v1294_v4 = vunpack.c.l.b16 %v1123_v55 }
 0x1cc   : > { %v1295_v7 = vpack.c.b16 %v1294_v4, %v1293_v5 }
 0x242   : > { %v1224_v59 = vpop.trf.xlu1 }
 0x252   : > { %v1225_v1 = vpop.trf.xlu1 }
 0x258   : > { %v4727_v41 = vpop.trf.xlu2 }
 0x25a   : > { %v1208_v56 = vpop.trf.xlu0 }
 0x260   : > { %v4728_v49 = vpop.trf.xlu2 }
 0x268   : > { %v4729_v58 = vpop.trf.xlu2 }
 0x269   : > { %1265 = vmatpush.bf16.msra.mxu3 %v4729_v58 }
 0x26a   : > { %v1209_v61 = vpop.trf.xlu0 }
 0x26d   : > { %1266 = vmatpush.bf16.msra.mxu3 %v4727_v41  ;;  %v1101_v41 = vpop.f32.mrf.mxu2 }
 0x26e   : > { %v1102_v43 = vadd.f32 %v1101_v41, %v930_v25 }
 0x270   : > { %4151 = vmatmul.msk.bf16.vlgmr.msra.gmra.mxu3 %vm1235_vm0, %v1255_v63  ;;  %v4730_v0 = vpop.trf.xlu2  ;;  %v5790_v44 = vpack.c.bf16 %v1102_v43, %v1102_v43 }
 0x271   : > { %1285 = vmatpush.bf16.msrb.mxu3 %v1209_v61  ;;  %1245 = vmatpush.bf16.msrb.mxu0 %v4730_v0 }
 0x275   : > { %1286 = vmatpush.bf16.msrb.mxu3 %v1208_v56  ;;  %1246 = vmatpush.bf16.msrb.mxu0 %v4728_v49 }
 0x278   : > { %4150 = vmatmul.msk.bf16.vlgmr.msrb.gmra.mxu0 %vm1235_vm0, %v5752_v6 }
 0x279   : > { %1305 = vmatpush.bf16.msra.mxu0 %v1225_v1 }
 0x27d   : > { %1306 = vmatpush.bf16.msra.mxu0 %v1224_v59 }
 0x280   : > { %4152 = vmatmul.msk.bf16.vlgmr.msrb.gmra.mxu3 %vm1235_vm0, %v1275_v3 }
 0x288   : > { %4153 = vmatmul.msk.bf16.vlgmr.msra.gmra.mxu0 %vm1235_vm0, %v1295_v7 }
 0x2f3   : > { %v1268_v11 = vpop.f32.mrf.mxu3 }
 0x2f4   : > { %v1315_v12 = vmul.f32 0.17677669, %v1268_v11 }
 0x2f5   : > { %v1248_v13 = vpop.f32.mrf.mxu0 }
 0x2f6   : > { %v1313_v6 = vmul.f32 0.17677669, %v1248_v13  ;;  %v1330_v14 = vsel %vm1326_vm1, %v1315_v12, -1e+09 }
 0x2f7   : > { %v1343_v15 = vsel %vm1336_vm2, %v1330_v14, -inf }
 0x2f8   : > { %1344 = vmax.xlane.f32.xlu1 %v1343_v15  ;;  %v5769_v16 = vsel %vm1326_vm1, %v1313_v6, -1e+09 }
 0x2f9   : > { %v1337_v17 = vsel %vm1336_vm2, %v5769_v16, -inf }
 0x2fa   : > { %1338 = vmax.xlane.f32.xlu2 %v1337_v17 }
 0x2fb   : > { %v1270_v23 = vpop.f32.mrf.mxu3 }
 0x2fc   : > { %v1316_v31 = vmul.f32 0.17677669, %v1270_v23  ;;  %v1434_v23 = vunpack.c.l.b16 %v5790_v44 }
 0x2fd   : > { %v1250_v19 = vpop.f32.mrf.mxu0 }
 0x2fe   : > { %v1314_v20 = vmul.f32 0.17677669, %v1250_v19  ;;  %v1331_v35 = vsel %vm1327_vm3, %v1316_v31, -1e+09 }
 0x2ff   : > { %v1346_v51 = vsel %vm1336_vm2, %v1331_v35, -inf }
 0x300   : > { %v1329_v21 = vsel %vm1327_vm3, %v1314_v20, -1e+09 }
 0x301   : > { %v1340_v22 = vsel %vm1336_vm2, %v1329_v21, -inf }
 0x302   : > { %1341 = vmax.xlane.f32.xlu0 %v1340_v22  ;;  %v1433_v22 = vunpack.c.l.b16 %v5778_v32 }
 0x303   : > { %v1288_v36 = vpop.f32.mrf.mxu3 }
 0x304   : > { %v1317_v39 = vmul.f32 0.17677669, %v1288_v36  ;;  %v1441_v27 = vpack.c.b16 %v1434_v23, %v1433_v22 }
 0x305   : > { %v1308_v24 = vpop.f32.mrf.mxu0 }
 0x306   : > { %v1319_v26 = vmul.f32 0.17677669, %v1308_v24  ;;  %v1332_v40 = vsel %vm1326_vm1, %v1317_v39, -1e+09 }
 0x307   : > { %v1349_v42 = vsel %vm1336_vm2, %v1332_v40, -inf }
 0x308   : > { %v1334_v28 = vsel %vm1326_vm1, %v1319_v26, -1e+09 }
 0x309   : > { %v1355_v29 = vsel %vm1336_vm2, %v1334_v28, -inf }
 0x30a   : > { %1356 = vmax.xlane.f32.xlu2 %v1355_v29 }
 0x30b   : > { %v1290_v45 = vpop.f32.mrf.mxu3 }
 0x30c   : > { %v1318_v46 = vmul.f32 0.17677669, %v1290_v45 }
 0x30d   : > { %v1310_v33 = vpop.f32.mrf.mxu0 }
 0x30e   : > { %v1320_v34 = vmul.f32 0.17677669, %v1310_v33  ;;  %v1333_v47 = vsel %vm1327_vm3, %v1318_v46, -1e+09 }
 0x30f   : > { %v1352_v48 = vsel %vm1336_vm2, %v1333_v47, -inf }
 0x310   : > { %v1335_v37 = vsel %vm1327_vm3, %v1320_v34, -1e+09 }
 0x311   : > { %1140 = vrot.lane.b32.xlu1 %v5778_v32, %s5396_s20  ;;  %v1358_v38 = vsel %vm1336_vm2, %v1335_v37, -inf }
 0x312   : > { %1347 = vmax.xlane.f32.xlu2 %v1346_v51  ;;  %1359 = vmax.xlane.f32.xlu0 %v1358_v38 }
 0x319   : > { %1148 = vrot.lane.b32.xlu1 %v5778_v32, %s5394_s0 }
 0x31a   : > { %1350 = vmax.xlane.f32.xlu2 %v1349_v42 }
 0x321   : > { %1150 = vrot.lane.b32.xlu1 %v5790_v44, %s5394_s0 }
 0x326   : > { %1146 = vrot.lane.b32.xlu0 %v5790_v44, %s5395_s17 }
 0x332   : > { %1144 = vrot.lane.b32.xlu2 %v5778_v32, %s5395_s17 }
 0x350   : > { %1353 = vmax.xlane.f32.xlu0 %v1352_v48 }
 0x364   : > { %1142 = vrot.lane.b32.xlu0 %v5790_v44, %s5396_s20 }
 0x36b   : > { %v1345_v49 = vpop.xlane.xlu1 %1344 }
 0x36c   : > { %v1363_v52 = vsub.f32 %v1330_v14, %v1345_v49 }
 0x36d   : > { %v1339_v54 = vpop.xlane.xlu2 %1338 }
 0x36e   : > { %v1373_v53 = vmul.f32 1.442695, %v1363_v52  ;;  %v1361_v30 = vsub.f32 %v5769_v16, %v1339_v54 }
 0x370   : > { %4877 = vpow2.f32 %v1373_v53  ;;  %v1369_v33 = vmul.f32 1.442695, %v1361_v30 }
 0x375   : > { %v1342_v55 = vpop.xlane.xlu0 %1341 }
 0x376   : > { %v5802_v56 = vpop.eup %4877  ;;  %v1362_v57 = vsub.f32 %v1329_v21, %v1342_v55 }
 0x377   : > { %v1391_v58 = vsel %vm1336_vm2, %v5802_v56, 0.0 }
 0x378   : > { %v1371_v59 = vmul.f32 1.442695, %v1362_v57  ;;  %1392 = vadd.xlane.f32.xlu2 %v1391_v58 }
 0x37a   : > { %4879 = vpow2.f32 %v1371_v59 }
 0x37d   : > { %v1357_v60 = vpop.xlane.xlu2 %1356 }
 0x37e   : > { %v1367_v61 = vsub.f32 %v1334_v28, %v1357_v60 }
 0x380   : > { %v5806_v62 = vpop.eup %4879  ;;  %v1381_v63 = vmul.f32 1.442695, %v1367_v61 }
 0x381   : > { %v1388_v0 = vsel %vm1336_vm2, %v5806_v62, 0.0 }
 0x382   : > { %4881 = vpow2.f32 %v1381_v63  ;;  %1389 = vadd.xlane.f32.xlu2 %v1388_v0 }
 0x383   : > { %v1141_v18 = vpop.permute.xlu1 %1140 }
 0x384   : > { %v1435_v38 = vunpack.c.l.b16 %v1141_v18 }
 0x385   : > { %v1348_v1 = vpop.xlane.xlu2 %1347  ;;  %v1360_v2 = vpop.xlane.xlu0 %1359 }
 0x386   : > { %v1364_v50 = vsub.f32 %v1331_v35, %v1348_v1  ;;  %v1368_v5 = vsub.f32 %v1335_v37, %v1360_v2 }
 0x388   : > { %v5810_v3 = vpop.eup %4881  ;;  %v1375_v4 = vmul.f32 1.442695, %v1364_v50  ;;  %v1383_v8 = vmul.f32 1.442695, %v1368_v5 }
 0x389   : > { %v1403_v7 = vsel %vm1336_vm2, %v5810_v3, 0.0 }
 0x38a   : > { %4883 = vpow2.f32 %v1375_v4  ;;  %1404 = vadd.xlane.f32.xlu2 %v1403_v7 }
 0x38b   : > { %4885 = vpow2.f32 %v1383_v8  ;;  %v1149_v19 = vpop.permute.xlu1 %1148 }
 0x38c   : > { %v1439_v25 = vunpack.c.l.b16 %v1149_v19 }
 0x38d   : > { %v1351_v9 = vpop.xlane.xlu2 %1350 }
 0x38e   : > { %v1365_v10 = vsub.f32 %v1332_v40, %v1351_v9 }
 0x390   : > { %v4884_v11 = vpop.eup %4883  ;;  %v1377_v12 = vmul.f32 1.442695, %v1365_v10 }
 0x391   : > { %v1394_v13 = vsel %vm1336_vm2, %v4884_v11, 0.0  ;;  %v4886_v6 = vpop.eup %4885 }
 0x392   : > { %4887 = vpow2.f32 %v1377_v12  ;;  %1395 = vadd.xlane.f32.xlu0 %v1394_v13  ;;  %v1406_v17 = vsel %vm1336_vm2, %v4886_v6, 0.0 }
 0x393   : > { %v1151_v20 = vpop.permute.xlu1 %1150 }
 0x394   : > { %v1440_v24 = vunpack.c.l.b16 %v1151_v20 }
 0x395   : > { %v1145_v36 = vpop.permute.xlu2 %1144 }
 0x396   : > { %v1444_v26 = vpack.c.b16 %v1440_v24, %v1439_v25  ;;  %v1437_v39 = vunpack.c.l.b16 %v1145_v36 }
 0x398   : > { %v5815_v14 = vpop.eup %4887  ;;  %v1147_v21 = vpop.permute.xlu0 %1146 }
 0x399   : > { %v1397_v15 = vsel %vm1336_vm2, %v5815_v14, 0.0  ;;  %v1438_v37 = vunpack.c.l.b16 %v1147_v21 }
 0x39a   : > { %1398 = vadd.xlane.f32.xlu1 %v1397_v15  ;;  %1407 = vadd.xlane.f32.xlu0 %v1406_v17 }
 0x39b   : > { %v1443_v16 = vpack.c.b16 %v1438_v37, %v1437_v39 }
 0x3c3   : > { %4736 = vxpose.binary.xlu0.c.b16.start.end [1/2] (short) (narrow) %v1444_v26, %v1441_v27, 32  ;;  %v1354_v28 = vpop.xlane.xlu0 %1353 }
 0x3c4   : > { %v1366_v29 = vsub.f32 %v1333_v47, %v1354_v28 }
 0x3c6   : > { %v1379_v31 = vmul.f32 1.442695, %v1366_v29 }
 0x3c8   : > { %4889 = vpow2.f32 %v1379_v31 }
 0x3c9   : > { %4891 = vpow2.f32 %v1369_v33 }
 0x3ce   : > { %v4890_v34 = vpop.eup %4889 }
 0x3cf   : > { %v1400_v35 = vsel %vm1336_vm2, %v4890_v34, 0.0  ;;  %v5824_v32 = vpop.eup %4891 }
 0x3d0   : > { %1401 = vadd.xlane.f32.xlu1 %v1400_v35  ;;  %v1385_v41 = vsel %vm1336_vm2, %v5824_v32, 0.0 }
 0x3d6   : > { %v1143_v51 = vpop.permute.xlu0 %1142 }
 0x3d7   : > { %v1436_v40 = vunpack.c.l.b16 %v1143_v51 }
 0x3d8   : > { %1386 = vadd.xlane.f32.xlu1 %v1385_v41 }
 0x3d9   : > { %v1442_v42 = vpack.c.b16 %v1436_v40, %v1435_v38 }
 0x3db   : > { %4731 = vxpose.binary.xlu2.c.b16.start.end [1/2] (short) (narrow) %v1442_v42, %v1443_v16, 32 }
 0x3eb   : > { %v1393_v43 = vpop.xlane.xlu2 %1392 }
 0x3ec   : > { %4893 = vrcp.f32 %v1393_v43 }
 0x3f2   : > { %v4894_v46 = vpop.eup %4893 }
 0x3f3   : > { %v1419_v48 = vmul.f32 %v4894_v46, %v5802_v56 }
 0x3f5   : > { %v1390_v44 = vpop.xlane.xlu2 %1389  ;;  %v1427_v54 = vpack.c.bf16 %v1419_v48, %v1419_v48 }
 0x3f7   : > { %v1548_v58 = vunpack.c.l.b16 %v1427_v54 }
 0x3fd   : > { %v1405_v47 = vpop.xlane.xlu2 %1404 }
 0x405   : > { %v1396_v45 = vpop.xlane.xlu0 %1395 }
 0x406   : > { %4895 = vrcp.f32 %v1396_v45 }
 0x407   : > { %4897 = vrcp.f32 %v1405_v47 }
 0x40c   : > { %v4896_v49 = vpop.eup %4895 }
 0x40d   : > { %v1408_v52 = vpop.xlane.xlu0 %1407  ;;  %v1420_v53 = vmul.f32 %v4896_v49, %v4884_v11  ;;  %v4898_v55 = vpop.eup %4897 }
 0x40e   : > { %4899 = vrcp.f32 %v1408_v52  ;;  %v1423_v60 = vmul.f32 %v4898_v55, %v5810_v3  ;;  %v1399_v8 = vpop.xlane.xlu1 %1398 }
 0x40f   : > { %v1428_v57 = vpack.c.bf16 %v1420_v53, %v1420_v53  ;;  %4901 = vrcp.f32 %v1399_v8 }
 0x410   : > { %v1431_v2 = vpack.c.bf16 %v1423_v60, %v1423_v60 }
 0x411   : > { %v1549_v59 = vunpack.c.l.b16 %v1428_v57 }
 0x412   : > { %v1614_v56 = vunpack.c.l.b16 %v1431_v2 }
 0x413   : > { %v1550_v61 = vpack.c.b16 %v1549_v59, %v1548_v58 }
 0x414   : > { %v4900_v63 = vpop.eup %4899 }
 0x415   : > { %v1558_v0 = vsel %vm1336_vm2, %v1550_v61, 0  ;;  %v1424_v1 = vmul.f32 %v4900_v63, %v4886_v6  ;;  %v4902_v10 = vpop.eup %4901  ;;  %v5397_v63 = vmov 1983009808  }
 0x416   : > { %1567 = vmatpush.bf16.xpose.msrb.mxu2 %v1558_v0  ;;  %v1421_v3 = vmul.f32 %v4902_v10, %v5815_v14  ;;  %v1779_v0 = vunpack.c.l.s4 %v5397_v63 }
 0x417   : > { %v1432_v50 = vpack.c.bf16 %v1424_v1, %v1424_v1 }
 0x418   : > { %v1429_v6 = vpack.c.bf16 %v1421_v3, %v1421_v3 }
 0x419   : > { %v1615_v4 = vunpack.c.l.b16 %v1432_v50 }
 0x41a   : > { %v1581_v18 = vunpack.c.l.b16 %v1429_v6 }
 0x41b   : > { %v1616_v5 = vpack.c.b16 %v1615_v4, %v1614_v56  ;;  %v5845_v56 = vunpack.c.0.s8 %v1779_v0 }
 0x41d   : > { %v1624_v7 = vsel %vm1336_vm2, %v1616_v5, 0 }
 0x41e   : > { %1633 = vmatpush.bf16.xpose.msrb.mxu0 %v1624_v7  ;;  %v5398_v7 = vmov 1934713408  }
 0x41f   : > { %v1803_v8 = vunpack.c.l.s4 %v5398_v7 }
 0x443   : > { %v1402_v9 = vpop.xlane.xlu1 %1401 }
 0x444   : > { %4903 = vrcp.f32 %v1402_v9 }
 0x445   : > { %4905 = vrcp.f32 %v1390_v44 }
 0x44a   : > { %v4904_v11 = vpop.eup %4903 }
 0x44b   : > { %v1422_v12 = vmul.f32 %v4904_v11, %v4890_v34  ;;  %v1387_v13 = vpop.xlane.xlu1 %1386  ;;  %v4906_v15 = vpop.eup %4905 }
 0x44c   : > { %4907 = vrcp.f32 %v1387_v13  ;;  %v1418_v20 = vmul.f32 %v4906_v15, %v5806_v62 }
 0x44d   : > { %v1430_v17 = vpack.c.bf16 %v1422_v12, %v1422_v12 }
 0x44e   : > { %v1426_v25 = vpack.c.bf16 %v1418_v20, %v1418_v20 }
 0x44f   : > { %v1582_v19 = vunpack.c.l.b16 %v1430_v17 }
 0x450   : > { %v1516_v27 = vunpack.c.l.b16 %v1426_v25 }
 0x451   : > { %v1583_v21 = vpack.c.b16 %v1582_v19, %v1581_v18  ;;  %v5851_v18 = vunpack.c.0.s8 %v1803_v8 }
 0x452   : > { %v4908_v22 = vpop.eup %4907 }
 0x453   : > { %v1591_v23 = vsel %vm1336_vm2, %v1583_v21, 0  ;;  %v1417_v24 = vmul.f32 %v4908_v22, %v5824_v32 }
 0x454   : > { %1600 = vmatpush.bf16.xpose.msra.mxu3 %v1591_v23 }
 0x455   : > { %v1425_v14 = vpack.c.bf16 %v1417_v24, %v1417_v24 }
 0x457   : > { %v1515_v26 = vunpack.c.l.b16 %v1425_v14 }
 0x459   : > { %v1517_v28 = vpack.c.b16 %v1516_v27, %v1515_v26 }
 0x45b   : > { %v1525_v29 = vsel %vm1336_vm2, %v1517_v28, 0 }
 0x45c   : > { %1534 = vmatpush.bf16.xpose.msrb.mxu1 %v1525_v29 }
 0x46f   : > { %v4737_v30 = vpop.trf.xlu0 }
 0x470   : > { %4154 = vmatmul.msk.bf16.vlgmr.msrb.gmra.mxu1 %vm1336_vm2, %v4737_v30 }
 0x477   : > { %v4738_v31 = vpop.trf.xlu0 }
 0x478   : > { %4160 = vmatmul.msk.bf16.vlgmr.msrb.gmra.mxu0 %vm1336_vm2, %v4738_v31 }
 0x47c   : > { %v4732_v62 = vpop.trf.xlu2 }
 0x47d   : > { %4158 = vmatmul.msk.bf16.vlgmr.msra.gmra.mxu3 %vm1336_vm2, %v4732_v62 }
 0x47f   : > { %v4739_v33 = vpop.trf.xlu0 }
 0x480   : > { %4155 = vmatmul.msk.bf16.gmra.mxu1 %vm1336_vm2, %v4739_v33 }
 0x484   : > { %v4733_v34 = vpop.trf.xlu2 }
 0x485   : > { %4156 = vmatmul.msk.bf16.vlgmr.msrb.gmra.mxu2 %vm1336_vm2, %v4733_v34 }
 0x487   : > { %v4740_v35 = vpop.trf.xlu0 }
 0x488   : > { %4161 = vmatmul.msk.bf16.gmra.mxu0 %vm1336_vm2, %v4740_v35 }
 0x48c   : > { %v4734_v32 = vpop.trf.xlu2 }
 0x48d   : > { %4159 = vmatmul.msk.bf16.gmra.mxu3 %vm1336_vm2, %v4734_v32 }
 0x494   : > { %v4735_v36 = vpop.trf.xlu2 }
 0x495   : > { %4157 = vmatmul.msk.bf16.gmra.mxu2 %vm1336_vm2, %v4735_v36 }
 0x4ed   : > { %v1536_v37 = vpop.f32.mrf.mxu1 }
 0x4f5   : > { %v1538_v39 = vpop.f32.mrf.mxu1  ;;  %v1635_v40 = vpop.f32.mrf.mxu0 }
 0x4fd   : > { %v1541_v44 = vpop.f32.mrf.mxu1  ;;  %v1637_v45 = vpop.f32.mrf.mxu0 }
 0x500   : > { %v1602_v51 = vpop.f32.mrf.mxu3 }
 0x501   : > { %v4759_v38 = vpack.i.bf16 %v1536_v37, %v1602_v51 }
 0x503   : > { %4760 = vxpose.xlu1.b32.start [1/4] (short) (narrow) %v4759_v38, 16 }
 0x505   : > { %v1640_v52 = vpop.f32.mrf.mxu0  ;;  %v1543_v53 = vpop.f32.mrf.mxu1 }
 0x508   : > { %v1569_v41 = vpop.f32.mrf.mxu2  ;;  %v1604_v16 = vpop.f32.mrf.mxu3 }
 0x509   : > { %v4741_v42 = vpack.i.bf16 %v1569_v41, %v1635_v40  ;;  %v4761_v43 = vpack.i.bf16 %v1538_v39, %v1604_v16 }
 0x50b   : > { %4762 = vxpose.xlu1.b32.cont [2/4] (short) (narrow) %v4761_v43, 16  ;;  %4742 = vxpose.xlu2.b32.start [1/4] (short) (narrow) %v4741_v42, 16 }
 0x50d   : > { %v1642_v59 = vpop.f32.mrf.mxu0 }
 0x510   : > { %v1571_v46 = vpop.f32.mrf.mxu2  ;;  %v1607_v47 = vpop.f32.mrf.mxu3 }
 0x511   : > { %v4743_v48 = vpack.i.bf16 %v1571_v46, %v1637_v45  ;;  %v4763_v49 = vpack.i.bf16 %v1541_v44, %v1607_v47 }
 0x513   : > { %4744 = vxpose.xlu2.b32.cont [2/4] (short) (narrow) %v4743_v48, 16  ;;  %4764 = vxpose.xlu1.b32.cont [3/4] (short) (narrow) %v4763_v49, 16 }
 0x518   : > { %v1574_v54 = vpop.f32.mrf.mxu2  ;;  %v1609_v55 = vpop.f32.mrf.mxu3 }
 0x519   : > { %v4745_v57 = vpack.i.bf16 %v1574_v54, %v1640_v52  ;;  %v4765_v58 = vpack.i.bf16 %v1543_v53, %v1609_v55 }
 0x51b   : > { %4766 = vxpose.xlu1.b32.end [4/4] (short) (narrow) %v4765_v58, 16  ;;  %4746 = vxpose.xlu2.b32.cont [3/4] (short) (narrow) %v4745_v57, 16 }
 0x520   : > { %v1576_v60 = vpop.f32.mrf.mxu2 }
 0x521   : > { %v4747_v61 = vpack.i.bf16 %v1576_v60, %v1642_v59 }
 0x523   : > { %4748 = vxpose.xlu2.b32.end [4/4] (short) (narrow) %v4747_v61, 16 }
 0x5a4   : > { %v4749_v1 = vpop.trf.xlu2 }
 0x5a5   : > { %v4753_v2 = vunpack.i.h.bf16 %v4749_v1  ;;  %v4750_v50 = vunpack.i.l.bf16 %v4749_v1 }
 0x5a7   : > { %v1788_v4 = vrot.slane %v4753_v2, 4  ;;  %v1786_v5 = vrot.slane %v4750_v50, 4  ;;  %v4767_v9 = vpop.trf.xlu1 }
 0x5a8   : > { %v4771_v10 = vunpack.i.h.bf16 %v4767_v9  ;;  %v4768_v3 = vunpack.i.l.bf16 %v4767_v9 }
 0x5a9   : > { %v1787_v11 = vsel %vm1774_vm4, %v1786_v5, %v4753_v2  ;;  %v1789_v12 = vsel %vm1774_vm4, %v4750_v50, %v1788_v4 }
 0x5aa   : > { %v1793_v13 = vperm.slane %v1787_v11, %v5845_v56  ;;  %v1797_v6 = vperm.slane %v1789_v12, %v5845_v56  ;;  %v1776_v15 = vrot.slane %v4771_v10, 4  ;;  %v1773_v17 = vrot.slane %v4768_v3, 4 }
 0x5ac   : > { %v1798_v19 = vrot.slane %v1793_v13, 4  ;;  %v1810_v20 = vrot.slane %v1797_v6, 4  ;;  %v1775_v21 = vsel %vm1774_vm4, %v1773_v17, %v4771_v10  ;;  %v1777_v22 = vsel %vm1774_vm4, %v4768_v3, %v1776_v15  ;;  %v4754_v23 = vpop.trf.xlu2 }
 0x5ad   : > { %v1781_v24 = vperm.slane %v1775_v21, %v5845_v56  ;;  %v1785_v25 = vperm.slane %v1777_v22, %v5845_v56  ;;  %v4758_v14 = vunpack.i.h.bf16 %v4754_v23  ;;  %v4755_v26 = vunpack.i.l.bf16 %v4754_v23 }
 0x5af   : > { %v1799_v27 = vsel %vm1774_vm4, %v1798_v19, %v1781_v24  ;;  %v1800_v28 = vrot.slane %v1781_v24, 4  ;;  %v1811_v29 = vsel %vm1774_vm4, %v1810_v20, %v1785_v25  ;;  %v1812_v30 = vrot.slane %v1785_v25, 4  ;;  %v4772_v31 = vpop.trf.xlu1 }
 0x5b0   : > { %v1805_v62 = vperm.slane %v1799_v27, %v5851_v18  ;;  %v1817_v33 = vperm.slane %v1811_v29, %v5851_v18  ;;  %v1844_v34 = vrot.slane %v4758_v14, 4  ;;  %v1842_v35 = vrot.slane %v4755_v26, 4 }
 0x5b1   : > { %v1801_v32 = vsel %vm1774_vm4, %v1793_v13, %v1800_v28  ;;  %v1813_v36 = vsel %vm1774_vm4, %v1797_v6, %v1812_v30  ;;  %v4776_v37 = vunpack.i.h.bf16 %v4772_v31  ;;  %v4773_v47 = vunpack.i.l.bf16 %v4772_v31 }
 0x5b2   : > { %v1809_v51 = vperm.slane %v1801_v32, %v5851_v18  ;;  %v1821_v38 = vperm.slane %v1813_v36, %v5851_v18  ;;  %v1822_v39 = vrot.slane %v1805_v62, 4  ;;  %v1843_v40 = vsel %vm1774_vm4, %v1842_v35, %v4758_v14 }
 0x5b3   : > { %v1845_v41 = vsel %vm1774_vm4, %v4755_v26, %v1844_v34  ;;  %v1832_v16 = vrot.slane %v4776_v37, 4  ;;  %v1849_v44 = vperm.slane %v1843_v40, %v5845_v56  ;;  %v1826_v46 = vrot.slane %v1817_v33, 4 }
 0x5b4   : > { %v1824_v42 = vrot.slane %v1809_v51, 4  ;;  %v1828_v43 = vrot.slane %v1821_v38, 4  ;;  %v1853_v45 = vperm.slane %v1845_v41, %v5845_v56  ;;  %v1823_v48 = vsel %vm1774_vm4, 0.0, %v1822_v39 }
 0x5b5   : > { %v1854_v52 = vrot.slane %v1849_v44, 4  ;;  %v1830_v57 = vrot.slane %v4773_v47, 4  ;;  %v1833_v58 = vsel %vm1774_vm4, %v4773_v47, %v1832_v16  ;;  %v1827_v2 = vsel %vm1774_vm4, 0.0, %v1826_v46 }
 0x5b6   : > { %v1825_v49 = vsel %vm1774_vm4, 0.0, %v1824_v42  ;;  %v1866_v53 = vrot.slane %v1853_v45, 4  ;;  %v1829_v54 = vsel %vm1774_vm4, 0.0, %v1828_v43  ;;  %v1886_v59 = vsel %vm1774_vm4, %v1824_v42, %v1805_v62 }
 0x5b7   : > { %v1891_v55 = vrot.slane %v1825_v49, 4  ;;  %v1841_v60 = vperm.slane %v1833_v58, %v5845_v56  ;;  %v1890_v61 = vperm.slane %v1886_v59, %v5845_v56  ;;  %v1897_v63 = vsel %vm1774_vm4, %v1828_v43, %v1817_v33 }
 0x5b8   : > { %v1902_v0 = vrot.slane %v1829_v54, 4  ;;  %v1831_v1 = vsel %vm1774_vm4, %v1830_v57, %v4776_v37  ;;  %v1901_v4 = vperm.slane %v1897_v63, %v5845_v56 }
 0x5b9   : > { %v1892_v50 = vsel %vm1774_vm4, %v1891_v55, %v1823_v48  ;;  %v1837_v5 = vperm.slane %v1831_v1, %v5845_v56  ;;  %v1867_v7 = vsel %vm1774_vm4, %v1866_v53, %v1841_v60  ;;  %v1868_v8 = vrot.slane %v1841_v60, 4 }
 0x5ba   : > { %v1896_v9 = vperm.slane %v1892_v50, %v5845_v56  ;;  %v1873_v10 = vperm.slane %v1867_v7, %v5851_v18  ;;  %v1903_v3 = vsel %vm1774_vm4, %v1902_v0, %v1827_v2  ;;  %v1910_v11 = vrot.slane %v1890_v61, 4 }
 0x5bb   : > { %v1922_v12 = vrot.slane %v1901_v4, 4  ;;  %v1855_v13 = vsel %vm1774_vm4, %v1854_v52, %v1837_v5  ;;  %v1856_v6 = vrot.slane %v1837_v5, 4  ;;  %v1869_v15 = vsel %vm1774_vm4, %v1853_v45, %v1868_v8 }
 0x5bc   : > { %v1907_v17 = vperm.slane %v1903_v3, %v5845_v56  ;;  %v1861_v19 = vperm.slane %v1855_v13, %v5851_v18  ;;  %v1877_v20 = vperm.slane %v1869_v15, %v5851_v18  ;;  %v1882_v22 = vrot.slane %v1873_v10, 4 }
 0x5bd   : > { %v1857_v21 = vsel %vm1774_vm4, %v1849_v44, %v1856_v6  ;;  %v1908_v14 = vrot.slane %v1896_v9, 4  ;;  %v1911_v26 = vsel %vm1774_vm4, %v1896_v9, %v1910_v11 }
 0x5be   : > { %v1865_v23 = vperm.slane %v1857_v21, %v5851_v18  ;;  %v1884_v24 = vrot.slane %v1877_v20, 4  ;;  %v1923_v25 = vsel %vm1774_vm4, %v1907_v17, %v1922_v12  ;;  %v1920_v27 = vrot.slane %v1907_v17, 4  ;;  %v4499_v20 = vld [vmem:[#allocation10 + $0x38] sm:$0xff]  ;;  %v4498_v21 = vld [vmem:[#allocation10 + $0x30] sm:$0xff] }
 0x5bf   : > { %v1878_v28 = vrot.slane %v1861_v19, 4  ;;  %v1883_v62 = vsel %vm1774_vm4, 0.0, %v1882_v22  ;;  %v1931_v33 = vperm.slane %v1923_v25, %v5851_v18  ;;  %v1909_v37 = vsel %vm1774_vm4, %v1908_v14, %v1890_v61  ;;  %2095 = vmatpush.bf16.msra.mxu1 %v4499_v20  ;;  %v4497_v22 = vld [vmem:[#allocation10 + $0x28] sm:$0xff]  ;;  %v4494_v25 = vld [vmem:[#allocation10 + $0x10] sm:$0xff] }
 0x5c0   : > { %v1880_v29 = vrot.slane %v1865_v23, 4  ;;  %v1885_v30 = vsel %vm1774_vm4, 0.0, %v1884_v24  ;;  %v1951_v31 = vsel %vm1774_vm4, %v1884_v24, %v1873_v10  ;;  %v1921_v51 = vsel %vm1774_vm4, %v1920_v27, %v1901_v4  ;;  %v4496_v23 = vld [vmem:[#allocation10 + $0x20] sm:$0xff]  ;;  %v4495_v24 = vld [vmem:[#allocation10 + $0x18] sm:$0xff]  ;;  %v4493_v14 = vld [vmem:[#allocation10 + $0x8] sm:$0xff] }
 0x5c1   : > { %v1955_v34 = vperm.slane %v1951_v31, %v5845_v56  ;;  %v1956_v35 = vrot.slane %v1885_v30, 4  ;;  %v1879_v16 = vsel %vm1774_vm4, 0.0, %v1878_v28  ;;  %v1927_v43 = vperm.slane %v1921_v51, %v5851_v18  ;;  %v4284_v27 = vld [vmem:[#allocation14 + $0x70] sm:$0xf]  ;;  %v4523_v28 = vld [vmem:[#allocation14 + $0x74] sm:$0xf0] }
 0x5c2   : > { %v1881_v32 = vsel %vm1774_vm4, 0.0, %v1880_v29  ;;  %v1940_v36 = vsel %vm1774_vm4, %v1880_v29, %v1861_v19  ;;  %v1919_v44 = vperm.slane %v1911_v26, %v5851_v18  ;;  %v1936_v47 = vrot.slane %v1931_v33, 4  ;;  %v4492_v26 = vld [vmem:[#allocation10] sm:$0xff]  ;;  %v4521_v31 = vld [vmem:[#allocation14 + $0x64] sm:$0xf0] }
 0x5c3   : > { %v1945_v38 = vrot.slane %v1881_v32, 4  ;;  %v1944_v39 = vperm.slane %v1940_v36, %v5845_v56  ;;  %v1957_v40 = vsel %vm1774_vm4, %v1956_v35, %v1883_v62  ;;  %v1976_v41 = vrot.slane %v1955_v34, 4  ;;  %2096 = vmatpush.bf16.msra.mxu1 %v4498_v21  ;;  %v4276_v29 = vld [vmem:[#allocation14 + $0x60] sm:$0xf] }
 0x5c4   : > { %v1961_v42 = vperm.slane %v1957_v40, %v5845_v56  ;;  %v1915_v52 = vperm.slane %v1909_v37, %v5851_v18  ;;  %v1932_v53 = vrot.slane %v1927_v43, 4  ;;  %v1938_v60 = vrot.slane %v1919_v44, 4 }
 0x5c5   : > { %v1946_v45 = vsel %vm1774_vm4, %v1945_v38, %v1879_v16  ;;  %v1964_v46 = vrot.slane %v1944_v39, 4  ;;  %v1937_v1 = vsel %vm1774_vm4, %v1936_v47, %v1919_v44  ;;  %v4285_v30 = vor.u32 %v4523_v28, %v4284_v27 }
 0x5c6   : > { %v1950_v48 = vperm.slane %v1946_v45, %v5845_v56  ;;  %v1977_v49 = vsel %vm1774_vm4, %v1961_v42, %v1976_v41  ;;  %v1974_v55 = vrot.slane %v1961_v42, 4  ;;  %v5917_v59 = vsel %vm1774_vm4, %v1932_v53, %v1915_v52 }
 0x5c7   : > { %v1985_v54 = vperm.slane %v1977_v49, %v5851_v18  ;;  %v1934_v7 = vrot.slane %v1915_v52, 4  ;;  %v1939_v3 = vsel %vm1774_vm4, %v1931_v33, %v1938_v60  ;;  %2097 = vmatpush.bf16.msra.mxu1 %v4497_v22  ;;  %2362 = vmatpush.bf16.msrb.mxu3 %v4285_v30  ;;  %v4277_v62 = vor.u32 %v4521_v31, %v4276_v29  ;;  %v4268_v33 = vld [vmem:[#allocation14 + $0x50] sm:$0xf]  ;;  %v4260_v49 = vld [vmem:[#allocation14 + $0x40] sm:$0xf] }
 0x5c8   : > { %v1965_v57 = vsel %vm1774_vm4, %v1950_v48, %v1964_v46  ;;  %v1962_v58 = vrot.slane %v1950_v48, 4  ;;  %v1975_v0 = vsel %vm1774_vm4, %v1974_v55, %v1955_v34  ;;  %v4519_v34 = vld [vmem:[#allocation14 + $0x54] sm:$0xf0]  ;;  %v4517_v52 = vld [vmem:[#allocation14 + $0x44] sm:$0xf0]  ;;  %v5399_v20 = vmov 128.0  }
 0x5c9   : > { %v1973_v61 = vperm.slane %v1965_v57, %v5851_v18  ;;  %v1990_v63 = vrot.slane %v1985_v54, 4  ;;  %v1981_v50 = vperm.slane %v1975_v0, %v5851_v18  ;;  %v1935_v15 = vsel %vm1774_vm4, %v1927_v43, %v1934_v7  ;;  %v4515_v55 = vld [vmem:[#allocation14 + $0x34] sm:$0xf0]  ;;  %v5960_v30 = vld [vmem:[%s6295_s11] sm:$0x3] }
 0x5ca   : > { %v1963_v2 = vsel %vm1774_vm4, %v1962_v58, %v1944_v39  ;;  %v4269_v35 = vor.u32 %v4519_v34, %v4268_v33  ;;  %v4261_v53 = vor.u32 %v4517_v52, %v4260_v49  ;;  %v4244_v58 = vld [vmem:[#allocation14 + $0x20] sm:$0xf]  ;;  %4909 = vrcp.f32 %v5399_v20  ;;  %v4503_v52 = vld [vmem:[#allocation13 + $0x18] sm:$0xff]  ;;  %v4868_v20 = vld [vmem:[%s6364_s22] ss:$0 sm:$0xff] }
 0x5cb   : > { %v1992_v4 = vrot.slane %v1973_v61, 4  ;;  %v1991_v5 = vsel %vm1774_vm4, %v1990_v63, %v1973_v61  ;;  %v1969_v8 = vperm.slane %v1963_v2, %v5851_v18  ;;  %v1986_v10 = vrot.slane %v1981_v50, 4  ;;  %2098 = vmatpush.bf16.msra.mxu1 %v4496_v23  ;;  %2363 = vmatpush.bf16.msrb.mxu3 %v4277_v62  ;;  %v4236_v61 = vld [vmem:[#allocation14 + $0x10] sm:$0xf]  ;;  %v4511_v63 = vld [vmem:[#allocation14 + $0x14] sm:$0xf0] }
 0x5cc   : > { %v4782_v9 = vpack.i.bf16 %v1991_v5, %v1937_v1  ;;  %v4237_v0 = vor.u32 %v4511_v63, %v4236_v61  ;;  %v4228_v1 = vld [vmem:[#allocation14] sm:$0xf]  ;;  %v4509_v2 = vld [vmem:[#allocation14 + $0x4] sm:$0xf0]  ;;  %v2278_v62 = vperm.slane %v5960_v30, 0 }
 0x5cd   : > { %v1993_v11 = vsel %vm1774_vm4, %v1985_v54, %v1992_v4  ;;  %v1988_v12 = vrot.slane %v1969_v8, 4  ;;  %v1987_v6 = vsel %vm1774_vm4, %v1986_v10, %v1969_v8  ;;  %v4252_v54 = vld [vmem:[#allocation14 + $0x30] sm:$0xf]  ;;  %v4229_v4 = vor.u32 %v4509_v2, %v4228_v1  ;;  %v4867_v8 = vld [vmem:[#allocation11] ss:$0 sm:$0xff]  ;;  %v4504_v49 = vld [vmem:[#allocation13 + $0x20] sm:$0xff] }
 0x5ce   : > { %v4787_v13 = vpack.i.bf16 %v1993_v11, %v1939_v3  ;;  %4783 = vrot.lane.b32.xlu2 %v4782_v9, %s5395_s17  ;;  %v4253_v57 = vor.u32 %v4515_v55, %v4252_v54  ;;  %v2172_v5 = vld [vmem:[%s5710_s1 + $0x8] sm:$0xff]  ;;  %v2173_v9 = vld [vmem:[%s5710_s1 + $0x10] sm:$0xff] }
 0x5cf   : > { %v1989_v17 = vsel %vm1774_vm4, %v1981_v50, %v1988_v12  ;;  %2099 = vmatpush.bf16.msra.mxu1 %v4495_v24  ;;  %2364 = vmatpush.bf16.msrb.mxu3 %v4269_v35  ;;  %v2171_v50 = vld [vmem:[%s5710_s1] sm:$0xff]  ;;  %v5947_v3 = vpack.c.bf16 %v2173_v9, %v2173_v9  ;;  %s3842_s1 = sshll.u32 %s889_s25, 4  ;;  %s3843_s1 = int_to_ptr.vmem [resolvable:$true] %s3842_s1 }
 0x5d0   : > { %4788 = vrot.lane.b32.xlu1 %v4787_v13, %s5396_s20  ;;  %v4777_v19 = vpack.i.bf16 %v1989_v17, %v1935_v15  ;;  %v5943_v7 = vpack.c.bf16 %v2172_v5, %v2171_v50  ;;  %v4955_v12 = vld [vmem:[%s5702_s21] sm:$0xff]  ;;  %v4956_v17 = vld [vmem:[%s5702_s21 + $0x8] sm:$0xff]  ;;  %v4910_v21 = vpop.eup %4909 }
 0x5d1   : > { %v2118_v22 = vmul.f32 128.0, %v4910_v21  ;;  %vm2122_vm7 = vweird.f32 %v4910_v21  ;;  %v4501_v54 = vld [vmem:[#allocation13 + $0x8] sm:$0xff] }
 0x5d2   : > { %4778 = vrot.lane.b32.xlu0 %v4777_v19, %s5394_s0 }
 0x5d3   : > { %2100 = vmatpush.bf16.msra.mxu1 %v4494_v25  ;;  %2365 = vmatpush.bf16.msrb.mxu3 %v4261_v53  ;;  %v2119_v23 = vsub.f32 1.0, %v2118_v22  ;;  %v4502_v53 = vld [vmem:[#allocation13 + $0x10] sm:$0xff] }
 0x5d5   : > { %v2120_v24 = vmul.f32 %v4910_v21, %v2119_v23 }
 0x5d7   : > { %2101 = vmatpush.bf16.msra.mxu1 %v4493_v14  ;;  %2366 = vmatpush.bf16.msrb.mxu3 %v4253_v57  ;;  %v2121_v25 = vadd.f32 %v4910_v21, %v2120_v24 }
 0x5d9   : > { %v5952_v14 = vsel %vm2122_vm7, %v4910_v21, %v2121_v25  ;;  %v4522_v25 = vld [vmem:[#allocation14 + $0x74] sm:$0xf] }
 0x5db   : > { %2102 = vmatpush.bf16.msra.mxu1 %v4492_v26 }
 0x628   : > { %v4784_v32 = vpop.permute.xlu2 %4783 }
 0x629   : > { %v4786_v39 = vunpack.i.h.bf16 %v4784_v32  ;;  %v4785_v40 = vunpack.i.l.bf16 %v4784_v32 }
 0x642   : > { %v4789_v36 = vpop.permute.xlu1 %4788 }
 0x643   : > { %v4791_v41 = vunpack.i.h.bf16 %v4789_v36  ;;  %v4790_v16 = vunpack.i.l.bf16 %v4789_v36 }
 0x644   : > { %v4779_v37 = vpop.permute.xlu0 %4778 }
 0x645   : > { %v4781_v51 = vunpack.i.h.bf16 %v4779_v37  ;;  %v4780_v38 = vunpack.i.l.bf16 %v4779_v37 }
 0x647   : > { %v2019_v42 = vsel %vm1235_vm0, %v1987_v6, %v4781_v51  ;;  %v2018_v43 = vsel %vm1235_vm0, %v5917_v59, %v4780_v38  ;;  %v4513_v59 = vld [vmem:[#allocation14 + $0x24] sm:$0xf0] }
 0x648   : > { %v2022_v44 = vsel %vm2020_vm5, %v2019_v42, %v4786_v39  ;;  %v2021_v45 = vsel %vm2020_vm5, %v2018_v43, %v4785_v40  ;;  %v4245_v60 = vor.u32 %v4513_v59, %v4244_v58  ;;  %v4507_v43 = vld [vmem:[#allocation13 + $0x38] sm:$0xff]  ;;  %v4500_v58 = vld [vmem:[#allocation13] sm:$0xff] }
 0x649   : > { %v2024_v46 = vsel %vm2023_vm6, %v2021_v45, %v4790_v16  ;;  %v2025_v47 = vsel %vm2023_vm6, %v2022_v44, %v4791_v41  ;;  %2244 = vmatpush.bf16.msra.mxu2 %v4507_v43 }
 0x64a   : > { %v2026_v48 = vpack.c.bf16 %v2025_v47, %v2024_v46  ;;  %2367 = vmatpush.bf16.msrb.mxu3 %v4245_v60  ;;  %v4506_v46 = vld [vmem:[#allocation13 + $0x30] sm:$0xff]  ;;  %v4505_v47 = vld [vmem:[#allocation13 + $0x28] sm:$0xff] }
 0x64c   : > { %2103 = vmatmul.bf16.vlgmr.msra.gmra.mxu1 %v2026_v48 }
 0x64d   : > { %2245 = vmatpush.bf16.msra.mxu2 %v4506_v46  ;;  %v4514_v46 = vld [vmem:[#allocation14 + $0x34] sm:$0xf] }
 0x64e   : > { %2368 = vmatpush.bf16.msrb.mxu3 %v4237_v0 }
 0x651   : > { %2246 = vmatpush.bf16.msra.mxu2 %v4505_v47  ;;  %v4254_v47 = vld [vmem:[#allocation14 + $0x38] sm:$0xf0] }
 0x652   : > { %2369 = vmatpush.bf16.msrb.mxu3 %v4229_v4 }
 0x655   : > { %2370 = vmatmul.bf16.vlgmr.msrb.gmra.mxu3 %v5943_v7  ;;  %2247 = vmatpush.bf16.msra.mxu2 %v4504_v49  ;;  %v4257_v49 = vor.u32 %v4514_v46, %v4254_v47 }
 0x659   : > { %2248 = vmatpush.bf16.msra.mxu2 %v4503_v52 }
 0x65d   : > { %2249 = vmatpush.bf16.msra.mxu2 %v4502_v53  ;;  %v4512_v53 = vld [vmem:[#allocation14 + $0x24] sm:$0xf] }
 0x661   : > { %2250 = vmatpush.bf16.msra.mxu2 %v4501_v54  ;;  %v4246_v54 = vld [vmem:[#allocation14 + $0x28] sm:$0xf0] }
 0x665   : > { %2375 = vmatmul.bf16.gmra.mxu3 %v5947_v3  ;;  %2251 = vmatpush.bf16.msra.mxu2 %v4500_v58  ;;  %v4238_v58 = vld [vmem:[#allocation14 + $0x18] sm:$0xf0] }
 0x6c9   : > { %v2104_v10 = vpop.f32.mrf.mxu1 }
 0x6ca   : > { %v2105_v11 = vadd.f32 %v4867_v8, %v2104_v10 }
 0x6cc   : > { %v2109_v13 = vadd.f32 %v4955_v12, %v2105_v11 }
 0x6ce   : > { %2113 = vadd.xlane.f32.xlu0 %v2109_v13 }
 0x6d1   : > { %v2106_v6 = vpop.f32.mrf.mxu1 }
 0x6d2   : > { %v2107_v15 = vadd.f32 %v4867_v8, %v2106_v6 }
 0x6d4   : > { %v2110_v19 = vadd.f32 %v4956_v17, %v2107_v15 }
 0x6d6   : > { %2115 = vadd.xlane.f32.xlu2 %v2110_v19 }
 0x6d8   : > { %v2371_v26 = vpop.f32.mrf.mxu3 }
 0x6d9   : > { %v2372_v38 = vadd.f32 %v2371_v26, %v2278_v62  ;;  %v4286_v26 = vld [vmem:[#allocation14 + $0x78] sm:$0xf0] }
 0x6db   : > { %v2398_v40 = vpack.c.bf16 %v2372_v38, %v2372_v38 }
 0x6dd   : > { %v2460_v44 = vunpack.c.l.b16 %v2398_v40 }
 0x6e0   : > { %v2373_v33 = vpop.f32.mrf.mxu3 }
 0x6e1   : > { %v2374_v35 = vadd.f32 %v2373_v33, %v2278_v62  ;;  %v4278_v33 = vld [vmem:[#allocation14 + $0x68] sm:$0xf0] }
 0x6e3   : > { %v2399_v36 = vpack.c.bf16 %v2374_v35, %v2374_v35 }
 0x6e5   : > { %v2461_v45 = vunpack.c.l.b16 %v2399_v36 }
 0x6e7   : > { %v2472_v48 = vpack.c.b16 %v2461_v45, %v2460_v44 }
 0x6e8   : > { %v2376_v39 = vpop.f32.mrf.mxu3 }
 0x6e9   : > { %v2377_v16 = vadd.f32 %v2376_v39, %v2278_v62  ;;  %v4289_v62 = vor.u32 %v4522_v25, %v4286_v26 }
 0x6eb   : > { %v5974_v42 = vpack.c.bf16 %v2377_v16, %v2377_v16  ;;  %2380 = vmatpush.bf16.msra.mxu0 %v4289_v62  ;;  %v4262_v16 = vld [vmem:[#allocation14 + $0x48] sm:$0xf0]  ;;  %v6014_v62 = vperm.slane %v5960_v30, 1 }
 0x6ed   : > { %v2462_v45 = vunpack.c.l.b16 %v5974_v42 }
 0x6ee   : > { %2423 = vrot.lane.b32.xlu2 %v2399_v36, %s5396_s20 }
 0x6ef   : > { %v2473_v52 = vpack.c.b16 %v2462_v45, %v2462_v45 }
 0x6f0   : > { %v2378_v41 = vpop.f32.mrf.mxu3 }
 0x6f1   : > { %v4516_v41 = vld [vmem:[#allocation14 + $0x44] sm:$0xf] }
 0x6f2   : > { %v4265_v44 = vor.u32 %v4516_v41, %v4262_v16 }
 0x6f6   : > { %2427 = vrot.lane.b32.xlu2 %v2398_v40, %s5395_s17 }
 0x741   : > { %v2114_v27 = vpop.xlane.xlu0 %2113 }
 0x742   : > { %v2124_v28 = vmul.f32 %v5952_v14, %v2114_v27  ;;  %v4520_v27 = vld [vmem:[#allocation14 + $0x64] sm:$0xf] }
 0x743   : > { %v4281_v35 = vor.u32 %v4520_v27, %v4278_v33 }
 0x744   : > { %v5955_v29 = vsub.f32 %v2109_v13, %v2124_v28 }
 0x745   : > { %2381 = vmatpush.bf16.msra.mxu0 %v4281_v35 }
 0x746   : > { %v2128_v31 = vmul.f32 %v5955_v29, %v5955_v29 }
 0x748   : > { %2130 = vadd.xlane.f32.xlu1 %v2128_v31 }
 0x749   : > { %v2116_v34 = vpop.xlane.xlu2 %2115 }
 0x74a   : > { %v2125_v32 = vmul.f32 %v5952_v14, %v2116_v34 }
 0x74c   : > { %v5966_v37 = vsub.f32 %v2110_v19, %v2125_v32  ;;  %v4518_v32 = vld [vmem:[#allocation14 + $0x54] sm:$0xf] }
 0x74e   : > { %v2129_v51 = vmul.f32 %v5966_v37, %v5966_v37 }
 0x750   : > { %2132 = vadd.xlane.f32.xlu0 %v2129_v51 }
 0x751   : > { %v2424_v11 = vpop.permute.xlu2 %2423 }
 0x752   : > { %v2464_v15 = vunpack.c.l.b16 %v2424_v11 }
 0x759   : > { %v2428_v11 = vpop.permute.xlu2 %2427 }
 0x761   : > { %2433 = vrot.lane.b32.xlu1 %v2398_v40, %s5394_s0 }
 0x764   : > { %2421 = vrot.lane.b32.xlu0 %v2398_v40, %s5396_s20 }
 0x769   : > { %2431 = vrot.lane.b32.xlu1 %v5974_v42, %s5395_s17 }
 0x76c   : > { %2425 = vrot.lane.b32.xlu0 %v5974_v42, %s5396_s20 }
 0x774   : > { %2435 = vrot.lane.b32.xlu0 %v2399_v36, %s5394_s0 }
 0x77c   : > { %2437 = vrot.lane.b32.xlu0 %v5974_v42, %s5394_s0  ;;  %v4870_v42 = vld [vmem:[%s6293_s9] ss:$0 sm:$0xff] }
 0x784   : > { %2429 = vrot.lane.b32.xlu0 %v2399_v36, %s5395_s17  ;;  %v4270_v36 = vld [vmem:[#allocation14 + $0x58] sm:$0xf0] }
 0x785   : > { %v4273_v40 = vor.u32 %v4518_v32, %v4270_v36 }
 0x787   : > { %2382 = vmatpush.bf16.msra.mxu0 %v4273_v40 }
 0x78b   : > { %2383 = vmatpush.bf16.msra.mxu0 %v4265_v44 }
 0x78f   : > { %2384 = vmatpush.bf16.msra.mxu0 %v4257_v49 }
 0x7bb   : > { %v2131_v55 = vpop.xlane.xlu1 %2130 }
 0x7bc   : > { %v2134_v57 = vmul.f32 %v2131_v55, %v5952_v14  ;;  %v4249_v55 = vor.u32 %v4512_v53, %v4246_v54 }
 0x7be   : > { %v2136_v59 = vadd.f32 1e-12, %v2134_v57  ;;  %v4510_v57 = vld [vmem:[#allocation14 + $0x14] sm:$0xf]  ;;  %2385 = vmatpush.bf16.msra.mxu0 %v4249_v55 }
 0x7c0   : > { %4911 = vrsqrt.f32 %v2136_v59  ;;  %vm2144_vm9 = vweird.f32 %v2136_v59 }
 0x7c3   : > { %v2133_v60 = vpop.xlane.xlu0 %2132 }
 0x7c4   : > { %v2135_v61 = vmul.f32 %v2133_v60, %v5952_v14  ;;  %v4508_v60 = vld [vmem:[#allocation14 + $0x4] sm:$0xf] }
 0x7c6   : > { %v4912_v63 = vpop.eup %4911  ;;  %v2137_v0 = vadd.f32 1e-12, %v2135_v61  ;;  %v4230_v61 = vld [vmem:[#allocation14 + $0x8] sm:$0xf0] }
 0x7c7   : > { %v2139_v1 = vmul.f32 %v4912_v63, %v2136_v59  ;;  %vm2145_vm8 = vweird.f32 %v4912_v63  ;;  %v4241_v59 = vor.u32 %v4510_v57, %v4238_v58 }
 0x7c8   : > { %4913 = vrsqrt.f32 %v2137_v0  ;;  %vm2146_vm10 = vmor %vm2144_vm9, %vm2145_vm8  ;;  %vm2154_vm12 = vweird.f32 %v2137_v0 }
 0x7c9   : > { %v2140_v2 = vmul.f32 %v4912_v63, %v2139_v1  ;;  %2386 = vmatpush.bf16.msra.mxu0 %v4241_v59 }
 0x7cb   : > { %v2141_v50 = vmul.f32 0.5, %v2140_v2 }
 0x7cd   : > { %v2142_v4 = vsub.f32 1.5, %v2141_v50 }
 0x7ce   : > { %v4914_v5 = vpop.eup %4913 }
 0x7cf   : > { %v2143_v8 = vmul.f32 %v4912_v63, %v2142_v4  ;;  %v2149_v9 = vmul.f32 %v4914_v5, %v2137_v0  ;;  %vm2155_vm11 = vweird.f32 %v4914_v5 }
 0x7d0   : > { %vm2156_vm13 = vmor %vm2154_vm12, %vm2155_vm11 }
 0x7d1   : > { %v2150_v10 = vmul.f32 %v4914_v5, %v2149_v9  ;;  %v2147_v12 = vsel %vm2146_vm10, %v4912_v63, %v2143_v8  ;;  %v4233_v63 = vor.u32 %v4508_v60, %v4230_v61 }
 0x7d2   : > { %v2158_v17 = vmul.f32 %v2147_v12, %v5955_v29  ;;  %v4869_v29 = vld [vmem:[%s6291_s7] ss:$0 sm:$0xff] }
 0x7d3   : > { %v2151_v13 = vmul.f32 0.5, %v2150_v10  ;;  %2387 = vmatpush.bf16.msra.mxu0 %v4233_v63  ;;  %v2434_v8 = vpop.permute.xlu1 %2433 }
 0x7d4   : > { %v2163_v31 = vmul.f32 %v4868_v20, %v2158_v17 }
 0x7d5   : > { %v2152_v6 = vsub.f32 1.5, %v2151_v13 }
 0x7d6   : > { %v2422_v19 = vpop.permute.xlu0 %2421  ;;  %v5994_v51 = vadd.f32 %v4869_v29, %v2163_v31  ;;  %2388 = vmatmul.bf16.vlgmr.msra.gmra.mxu0 %v5943_v7 }
 0x7d7   : > { %v2153_v21 = vmul.f32 %v4914_v5, %v2152_v6  ;;  %v2463_v22 = vunpack.c.l.b16 %v2422_v19  ;;  %v2469_v19 = vunpack.c.l.b16 %v2434_v8 }
 0x7d9   : > { %v2157_v23 = vsel %vm2156_vm13, %v4914_v5, %v2153_v21  ;;  %v2474_v24 = vpack.c.b16 %v2464_v15, %v2463_v22  ;;  %v2466_v15 = vunpack.c.l.b16 %v2428_v11 }
 0x7da   : > { %v2159_v28 = vmul.f32 %v2157_v23, %v5966_v37 }
 0x7db   : > { %4792 = vxpose.binary.xlu1.c.b16.start [1/4] (short) (narrow) %v2472_v48, %v2474_v24, 32 }
 0x7dc   : > { %v2164_v34 = vmul.f32 %v4868_v20, %v2159_v28 }
 0x7de   : > { %v5996_v38 = vadd.f32 %v4869_v29, %v2164_v34  ;;  %v2426_v39 = vpop.permute.xlu0 %2425 }
 0x7df   : > { %v2465_v43 = vunpack.c.l.b16 %v2426_v39 }
 0x7e0   : > { %v2170_v37 = vpack.c.bf16 %v5996_v38, %v5994_v51 }
 0x7e1   : > { %v2475_v48 = vpack.c.b16 %v2465_v43, %v2465_v43 }
 0x7e2   : > { %2252 = vmatmul.bf16.vlgmr.msra.gmra.mxu2 %v2170_v37 }
 0x7e6   : > { %2393 = vmatmul.bf16.gmra.mxu0 %v5947_v3  ;;  %v2436_v7 = vpop.permute.xlu0 %2435  ;;  %v2432_v3 = vpop.permute.xlu1 %2431 }
 0x7e7   : > { %v2470_v6 = vunpack.c.l.b16 %v2436_v7  ;;  %v2468_v26 = vunpack.c.l.b16 %v2432_v3 }
 0x7e9   : > { %v2478_v21 = vpack.c.b16 %v2470_v6, %v2469_v19  ;;  %v2477_v29 = vpack.c.b16 %v2468_v26, %v2468_v26 }
 0x7eb   : > { %4793 = vxpose.binary.xlu1.c.b16.end [2/4] (short) (narrow) %v2473_v52, %v2475_v48, 32 }
 0x7ee   : > { %v2438_v9 = vpop.permute.xlu0 %2437 }
 0x7ef   : > { %v2471_v25 = vunpack.c.l.b16 %v2438_v9 }
 0x7f1   : > { %v2479_v31 = vpack.c.b16 %v2471_v25, %v2471_v25 }
 0x7f6   : > { %v2430_v12 = vpop.permute.xlu0 %2429 }
 0x7f7   : > { %v2467_v17 = vunpack.c.l.b16 %v2430_v12 }
 0x7f9   : > { %v2476_v20 = vpack.c.b16 %v2467_v17, %v2466_v15 }
 0x853   : > { %v2389_v33 = vpop.f32.mrf.mxu0 }
 0x854   : > { %v2390_v34 = vadd.f32 %v2389_v33, %v6014_v62 }
 0x856   : > { %v6017_v35 = vpack.c.bf16 %v2390_v34, %v2390_v34 }
 0x85b   : > { %v2391_v32 = vpop.f32.mrf.mxu0 }
 0x85c   : > { %v2392_v36 = vadd.f32 %v2391_v32, %v6014_v62 }
 0x85e   : > { %v6022_v37 = vpack.c.bf16 %v2392_v36, %v2392_v36 }
 0x863   : > { %v2394_v25 = vpop.f32.mrf.mxu0 }
 0x865   : > { %v2253_v0 = vpop.f32.mrf.mxu2 }
 0x866   : > { %v2254_v1 = vadd.f32 %v4870_v42, %v2253_v0 }
 0x868   : > { %v2258_v2 = vpack.c.bf16 %v2254_v1, %v2254_v1 }
 0x86a   : > { %2406 = vrot.lane.b32.xlu2 %v2258_v2, %s5396_s20  ;;  %v2552_v27 = vunpack.c.l.b16 %v2258_v2 }
 0x86b   : > { %v2396_v33 = vpop.f32.mrf.mxu0 }
 0x86d   : > { %v2255_v50 = vpop.f32.mrf.mxu2 }
 0x86e   : > { %v2256_v4 = vadd.f32 %v4870_v42, %v2255_v50 }
 0x870   : > { %v2259_v5 = vpack.c.bf16 %v2256_v4, %v2256_v4 }
 0x872   : > { %2408 = vrot.lane.b32.xlu0 %v2259_v5, %s5396_s20  ;;  %2414 = vrot.lane.b32.xlu2 %v2258_v2, %s5394_s0  ;;  %v2553_v24 = vunpack.c.l.b16 %v2259_v5 }
 0x874   : > { %v2554_v28 = vpack.c.b16 %v2553_v24, %v2552_v27 }
 0x87a   : > { %2416 = vrot.lane.b32.xlu0 %v2259_v5, %s5394_s0 }
 0x882   : > { %2410 = vrot.lane.b32.xlu0 %v2258_v2, %s5395_s17 }
 0x887   : > { %v4794_v10 = vpop.trf.xlu1 }
 0x88a   : > { %2412 = vrot.lane.b32.xlu0 %v2259_v5, %s5395_s17 }
 0x88f   : > { %v4795_v13 = vpop.trf.xlu1 }
 0x892   : > { %2454 = vrot.lane.b32.xlu0 %v6017_v35, %s5394_s0 }
 0x897   : > { %v4796_v22 = vpop.trf.xlu1 }
 0x898   : > { %4798 = vxpose.binary.xlu2.c.b16.start [1/4] (short) (narrow) %v2476_v20, %v2478_v21, 32 }
 0x899   : > { %2584 = vmatpush.bf16.msrb.mxu2 %v4796_v22 }
 0x89a   : > { %2456 = vrot.lane.b32.xlu0 %v6022_v37, %s5394_s0 }
 0x89d   : > { %2585 = vmatpush.bf16.msrb.mxu2 %v4794_v10 }
 0x89f   : > { %v4797_v23 = vpop.trf.xlu1 }
 0x8a0   : > { %2564 = vmatpush.bf16.msrb.mxu1 %v4797_v23 }
 0x8a2   : > { %2448 = vrot.lane.b32.xlu0 %v6017_v35, %s5395_s17 }
 0x8a4   : > { %2565 = vmatpush.bf16.msrb.mxu1 %v4795_v13 }
 0x8a7   : > { %4290 = vmatmul.msk.bf16.vlgmr.msrb.gmra.mxu1 %vm1235_vm0, %v2554_v28 }
 0x8a8   : > { %4799 = vxpose.binary.xlu2.c.b16.end [2/4] (short) (narrow) %v2477_v29, %v2479_v31, 32 }
 0x8aa   : > { %2450 = vrot.lane.b32.xlu0 %v6022_v37, %s5395_s17 }
 0x8c4   : > { %v2407_v30 = vpop.permute.xlu2 %2406 }
 0x8c5   : > { %v2572_v40 = vunpack.c.l.b16 %v2407_v30 }
 0x8cc   : > { %v2415_v49 = vpop.permute.xlu2 %2414 }
 0x8cd   : > { %v2612_v59 = vunpack.c.l.b16 %v2415_v49 }
 0x8e4   : > { %v2409_v39 = vpop.permute.xlu0 %2408 }
 0x8e5   : > { %v2573_v41 = vunpack.c.l.b16 %v2409_v39 }
 0x8e7   : > { %v2574_v16 = vpack.c.b16 %v2573_v41, %v2572_v40 }
 0x8e9   : > { %4291 = vmatmul.msk.bf16.vlgmr.msrb.gmra.mxu2 %vm1235_vm0, %v2574_v16  ;;  %v2395_v16 = vadd.f32 %v2394_v25, %v6014_v62 }
 0x8ec   : > { %v2417_v52 = vpop.permute.xlu0 %2416 }
 0x8ed   : > { %v2613_v58 = vunpack.c.l.b16 %v2417_v52 }
 0x8ef   : > { %v2614_v61 = vpack.c.b16 %v2613_v58, %v2612_v59 }
 0x8f4   : > { %v2411_v55 = vpop.permute.xlu0 %2410 }
 0x8f5   : > { %v2592_v0 = vunpack.c.l.b16 %v2411_v55 }
 0x8fc   : > { %v2413_v60 = vpop.permute.xlu0 %2412 }
 0x8fd   : > { %v2593_v42 = vunpack.c.l.b16 %v2413_v60 }
 0x8ff   : > { %v2594_v2 = vpack.c.b16 %v2593_v42, %v2592_v0 }
 0x904   : > { %v2455_v1 = vpop.permute.xlu0 %2454 }
 0x905   : > { %v2746_v50 = vunpack.c.l.b16 %v2455_v1 }
 0x90c   : > { %v2457_v4 = vpop.permute.xlu0 %2456 }
 0x90d   : > { %v2747_v5 = vunpack.c.l.b16 %v2457_v4 }
 0x90f   : > { %v6040_v8 = vpack.c.b16 %v2747_v5, %v2746_v50 }
 0x914   : > { %v2449_v7 = vpop.permute.xlu0 %2448 }
 0x915   : > { %v2743_v3 = vunpack.c.l.b16 %v2449_v7 }
 0x91c   : > { %v2451_v9 = vpop.permute.xlu0 %2450 }
 0x91d   : > { %v2744_v10 = vunpack.c.l.b16 %v2451_v9 }
 0x91f   : > { %v6042_v11 = vpack.c.b16 %v2744_v10, %v2743_v3 }
 0x924   : > { %v2567_v43 = vpop.f32.mrf.mxu1 }
 0x925   : > { %v6031_v44 = vmul.f32 0.17677669, %v2567_v43  ;;  %v6057_v43 = vpack.c.bf16 %v2395_v16, %v2395_v16 }
 0x927   : > { %v2641_v45 = vsel %vm2640_vm14, %v6031_v44, -inf }
 0x928   : > { %2642 = vmax.xlane.f32.xlu0 %v2641_v45 }
 0x92c   : > { %v2569_v46 = vpop.f32.mrf.mxu1 }
 0x92d   : > { %v2633_v47 = vmul.f32 0.17677669, %v2569_v46 }
 0x92f   : > { %v2644_v48 = vsel %vm2640_vm14, %v2633_v47, -inf }
 0x930   : > { %2645 = vmax.xlane.f32.xlu2 %v2644_v48 }
 0x939   : > { %v4800_v53 = vpop.trf.xlu2 }
 0x941   : > { %v4801_v54 = vpop.trf.xlu2 }
 0x948   : > { %2444 = vrot.lane.b32.xlu2 %v6022_v37, %s5396_s20 }
 0x949   : > { %v4802_v57 = vpop.trf.xlu2 }
 0x94a   : > { %2624 = vmatpush.bf16.msra.mxu2 %v4802_v57 }
 0x94e   : > { %2625 = vmatpush.bf16.msra.mxu2 %v4800_v53 }
 0x951   : > { %v4803_v63 = vpop.trf.xlu2  ;;  %4293 = vmatmul.msk.bf16.vlgmr.msra.gmra.mxu2 %vm1235_vm0, %v2614_v61 }
 0x952   : > { %2604 = vmatpush.bf16.msra.mxu1 %v4803_v63 }
 0x956   : > { %2605 = vmatpush.bf16.msra.mxu1 %v4801_v54 }
 0x959   : > { %4292 = vmatmul.msk.bf16.vlgmr.msra.gmra.mxu1 %vm1235_vm0, %v2594_v2 }
 0x96c   : > { %v2587_v12 = vpop.f32.mrf.mxu2 }
 0x96d   : > { %v2634_v27 = vmul.f32 0.17677669, %v2587_v12 }
 0x96f   : > { %v2647_v31 = vsel %vm2640_vm14, %v2634_v27, -inf }
 0x974   : > { %v2589_v6 = vpop.f32.mrf.mxu2 }
 0x975   : > { %v2635_v36 = vmul.f32 0.17677669, %v2589_v6 }
 0x977   : > { %v2650_v30 = vsel %vm2640_vm14, %v2635_v36, -inf }
 0x99b   : > { %v2643_v45 = vpop.xlane.xlu0 %2642 }
 0x99c   : > { %v2665_v46 = vsub.f32 %v6031_v44, %v2643_v45 }
 0x9a3   : > { %v2646_v13 = vpop.xlane.xlu2 %2645 }
 0x9a4   : > { %v2666_v15 = vsub.f32 %v2633_v47, %v2646_v13  ;;  %v2673_v47 = vmul.f32 1.442695, %v2665_v46 }
 0x9a6   : > { %v2675_v17 = vmul.f32 1.442695, %v2666_v15 }
 0x9a8   : > { %4915 = vpow2.f32 %v2675_v17 }
 0x9a9   : > { %4917 = vpow2.f32 %v2673_v47 }
 0x9ae   : > { %v6046_v26 = vpop.eup %4915 }
 0x9af   : > { %v2692_v28 = vsel %vm2640_vm14, %v6046_v26, 0.0  ;;  %v6066_v48 = vpop.eup %4917 }
 0x9b0   : > { %v2689_v62 = vsel %vm2640_vm14, %v6066_v48, 0.0 }
 0x9d4   : > { %v2627_v19 = vpop.f32.mrf.mxu2 }
 0x9d5   : > { %v2638_v20 = vmul.f32 0.17677669, %v2627_v19 }
 0x9d6   : > { %v2607_v21 = vpop.f32.mrf.mxu1 }
 0x9d7   : > { %v2636_v22 = vmul.f32 0.17677669, %v2607_v21  ;;  %v2659_v23 = vsel %vm2640_vm14, %v2638_v20, -inf  ;;  %v2737_v21 = vunpack.c.l.b16 %v6017_v35 }
 0x9d8   : > { %2660 = vmax.xlane.f32.xlu1 %v2659_v23 }
 0x9d9   : > { %v2653_v24 = vsel %vm2640_vm14, %v2636_v22, -inf }
 0x9da   : > { %2654 = vmax.xlane.f32.xlu0 %v2653_v24 }
 0x9dc   : > { %v2629_v39 = vpop.f32.mrf.mxu2 }
 0x9dd   : > { %v2639_v40 = vmul.f32 0.17677669, %v2629_v39 }
 0x9de   : > { %v2609_v29 = vpop.f32.mrf.mxu1 }
 0x9df   : > { %v2637_v34 = vmul.f32 0.17677669, %v2609_v29  ;;  %v2662_v41 = vsel %vm2640_vm14, %v2639_v40, -inf }
 0x9e0   : > { %2693 = vadd.xlane.f32.xlu1 %v2692_v28  ;;  %v2739_v28 = vunpack.c.l.b16 %v6057_v43 }
 0x9e1   : > { %v2656_v32 = vsel %vm2640_vm14, %v2637_v34, -inf }
 0x9e2   : > { %2648 = vmax.xlane.f32.xlu0 %v2647_v31  ;;  %v2750_v33 = vpack.c.b16 %v2739_v28, %v2739_v28 }
 0x9ea   : > { %2657 = vmax.xlane.f32.xlu0 %v2656_v32 }
 0x9f2   : > { %2651 = vmax.xlane.f32.xlu0 %v2650_v30 }
 0x9f9   : > { %2442 = vrot.lane.b32.xlu1 %v6017_v35, %s5396_s20 }
 0x9fa   : > { %2663 = vmax.xlane.f32.xlu0 %v2662_v41 }
 0xa01   : > { %2452 = vrot.lane.b32.xlu1 %v6057_v43, %s5395_s17 }
 0xa09   : > { %2446 = vrot.lane.b32.xlu1 %v6057_v43, %s5396_s20 }
 0xa0e   : > { %2458 = vrot.lane.b32.xlu0 %v6057_v43, %s5394_s0 }
 0xa38   : > { %2690 = vadd.xlane.f32.xlu0 %v2689_v62 }
 0xa4b   : > { %v2661_v49 = vpop.xlane.xlu1 %2660 }
 0xa4c   : > { %v2671_v52 = vsub.f32 %v2638_v20, %v2661_v49 }
 0xa4d   : > { %v2655_v53 = vpop.xlane.xlu0 %2654 }
 0xa4e   : > { %v2685_v54 = vmul.f32 1.442695, %v2671_v52  ;;  %v2669_v55 = vsub.f32 %v2636_v22, %v2655_v53  ;;  %v2738_v22 = vunpack.c.l.b16 %v6022_v37 }
 0xa50   : > { %4919 = vpow2.f32 %v2685_v54  ;;  %v2681_v57 = vmul.f32 1.442695, %v2669_v55  ;;  %v2749_v23 = vpack.c.b16 %v2738_v22, %v2737_v21 }
 0xa52   : > { %4921 = vpow2.f32 %v2681_v57 }
 0xa53   : > { %v2694_v24 = vpop.xlane.xlu1 %2693 }
 0xa55   : > { %v2649_v58 = vpop.xlane.xlu0 %2648 }
 0xa56   : > { %v6070_v59 = vpop.eup %4919  ;;  %v2667_v44 = vsub.f32 %v2634_v27, %v2649_v58 }
 0xa57   : > { %v2707_v60 = vsel %vm2640_vm14, %v6070_v59, 0.0 }
 0xa58   : > { %v6074_v61 = vpop.eup %4921  ;;  %v2677_v63 = vmul.f32 1.442695, %v2667_v44  ;;  %2708 = vadd.xlane.f32.xlu1 %v2707_v60 }
 0xa59   : > { %v2701_v42 = vsel %vm2640_vm14, %v6074_v61, 0.0 }
 0xa5a   : > { %4923 = vpow2.f32 %v2677_v63  ;;  %2702 = vadd.xlane.f32.xlu0 %v2701_v42 }
 0xa5d   : > { %v2658_v0 = vpop.xlane.xlu0 %2657 }
 0xa5e   : > { %v2670_v1 = vsub.f32 %v2637_v34, %v2658_v0  ;;  %v2445_v34 = vpop.permute.xlu2 %2444 }
 0xa60   : > { %v6078_v2 = vpop.eup %4923  ;;  %v2683_v50 = vmul.f32 1.442695, %v2670_v1 }
 0xa61   : > { %v2695_v4 = vsel %vm2640_vm14, %v6078_v2, 0.0 }
 0xa62   : > { %4925 = vpow2.f32 %v2683_v50  ;;  %2696 = vadd.xlane.f32.xlu0 %v2695_v4 }
 0xa65   : > { %v2652_v5 = vpop.xlane.xlu0 %2651 }
 0xa66   : > { %v2668_v7 = vsub.f32 %v2635_v36, %v2652_v5  ;;  %v2741_v36 = vunpack.c.l.b16 %v2445_v34 }
 0xa68   : > { %v6082_v3 = vpop.eup %4925  ;;  %v2679_v9 = vmul.f32 1.442695, %v2668_v7 }
 0xa69   : > { %v2704_v10 = vsel %vm2640_vm14, %v6082_v3, 0.0 }
 0xa6a   : > { %4927 = vpow2.f32 %v2679_v9  ;;  %2705 = vadd.xlane.f32.xlu2 %v2704_v10 }
 0xa6b   : > { %v2443_v29 = vpop.permute.xlu1 %2442 }
 0xa6c   : > { %v2740_v32 = vunpack.c.l.b16 %v2443_v29 }
 0xa6d   : > { %v2664_v12 = vpop.xlane.xlu0 %2663 }
 0xa6e   : > { %v2672_v13 = vsub.f32 %v2639_v40, %v2664_v12  ;;  %v2751_v39 = vpack.c.b16 %v2741_v36, %v2740_v32 }
 0xa70   : > { %v6086_v6 = vpop.eup %4927  ;;  %v2687_v15 = vmul.f32 1.442695, %v2672_v13 }
 0xa71   : > { %v2698_v17 = vsel %vm2640_vm14, %v6086_v6, 0.0 }
 0xa72   : > { %4929 = vpow2.f32 %v2687_v15  ;;  %2699 = vadd.xlane.f32.xlu1 %v2698_v17 }
 0xa73   : > { %v2453_v30 = vpop.permute.xlu1 %2452  ;;  %4931 = vrcp.f32 %v2694_v24 }
 0xa74   : > { %v2745_v40 = vunpack.c.l.b16 %v2453_v30 }
 0xa76   : > { %v2754_v43 = vpack.c.b16 %v2745_v40, %v2745_v40 }
 0xa78   : > { %v6090_v19 = vpop.eup %4929 }
 0xa79   : > { %v2710_v20 = vsel %vm2640_vm14, %v6090_v19, 0.0 }
 0xa7a   : > { %2711 = vadd.xlane.f32.xlu2 %v2710_v20 }
 0xa7b   : > { %v2447_v35 = vpop.permute.xlu1 %2446 }
 0xa7c   : > { %v2742_v41 = vunpack.c.l.b16 %v2447_v35 }
 0xa7e   : > { %v2752_v45 = vpack.c.b16 %v2742_v41, %v2742_v41 }
 0xa80   : > { %v2459_v25 = vpop.permute.xlu0 %2458 }
 0xa81   : > { %v2748_v27 = vunpack.c.l.b16 %v2459_v25 }
 0xa83   : > { %v2756_v31 = vpack.c.b16 %v2748_v27, %v2748_v27 }
 0xa8b   : > { %4804 = vxpose.binary.xlu0.c.b16.start [1/4] (short) (narrow) %v6040_v8, %v2749_v23, 32  ;;  %v4932_v8 = vpop.eup %4931 }
 0xa8c   : > { %v2722_v16 = vmul.f32 %v4932_v8, %v6046_v26 }
 0xa8e   : > { %v2730_v62 = vpack.c.bf16 %v2722_v16, %v2722_v16 }
 0xa90   : > { %v2832_v53 = vunpack.c.l.b16 %v2730_v62 }
 0xa9b   : > { %4805 = vxpose.binary.xlu0.c.b16.end [2/4] (short) (narrow) %v2756_v31, %v2750_v33, 32 }
 0xaa3   : > { %4810 = vxpose.binary.xlu2.c.b16.start [1/4] (short) (narrow) %v2751_v39, %v6042_v11, 32 }
 0xaab   : > { %v2691_v37 = vpop.xlane.xlu0 %2690 }
 0xaac   : > { %4933 = vrcp.f32 %v2691_v37 }
 0xab2   : > { %v4934_v46 = vpop.eup %4933 }
 0xab3   : > { %v2721_v47 = vmul.f32 %v4934_v46, %v6066_v48  ;;  %4811 = vxpose.binary.xlu2.c.b16.end [2/4] (short) (narrow) %v2752_v45, %v2754_v43, 32 }
 0xab5   : > { %v2729_v49 = vpack.c.bf16 %v2721_v47, %v2721_v47 }
 0xab7   : > { %v2831_v52 = vunpack.c.l.b16 %v2729_v49 }
 0xab9   : > { %v2833_v11 = vpack.c.b16 %v2832_v53, %v2831_v52 }
 0xabb   : > { %v2841_v54 = vsel %vm2640_vm14, %v2833_v11, 0 }
 0xabc   : > { %2850 = vmatpush.bf16.xpose.msra.mxu3 %v2841_v54 }
 0xacb   : > { %v2709_v57 = vpop.xlane.xlu1 %2708 }
 0xacd   : > { %v2703_v55 = vpop.xlane.xlu0 %2702 }
 0xace   : > { %4935 = vrcp.f32 %v2703_v55 }
 0xad4   : > { %v4936_v26 = vpop.eup %4935 }
 0xad5   : > { %v2697_v58 = vpop.xlane.xlu0 %2696  ;;  %v2725_v60 = vmul.f32 %v4936_v26, %v6074_v61 }
 0xad7   : > { %v2733_v0 = vpack.c.bf16 %v2725_v60, %v2725_v60 }
 0xad9   : > { %v2897_v5 = vunpack.c.l.b16 %v2733_v0 }
 0xadd   : > { %v2706_v44 = vpop.xlane.xlu2 %2705 }
 0xade   : > { %4937 = vrcp.f32 %v2706_v44 }
 0xadf   : > { %4939 = vrcp.f32 %v2697_v58 }
 0xae4   : > { %v4938_v48 = vpop.eup %4937 }
 0xae5   : > { %v2726_v63 = vmul.f32 %v4938_v48, %v6082_v3  ;;  %v2700_v42 = vpop.xlane.xlu1 %2699  ;;  %v4940_v1 = vpop.eup %4939 }
 0xae6   : > { %4941 = vrcp.f32 %v2700_v42  ;;  %v2723_v4 = vmul.f32 %v4940_v1, %v6078_v2 }
 0xae7   : > { %v2734_v50 = vpack.c.bf16 %v2726_v63, %v2726_v63  ;;  %4943 = vrcp.f32 %v2709_v57 }
 0xae8   : > { %v2731_v15 = vpack.c.bf16 %v2723_v4, %v2723_v4 }
 0xae9   : > { %v2898_v7 = vunpack.c.l.b16 %v2734_v50 }
 0xaea   : > { %v2864_v21 = vunpack.c.l.b16 %v2731_v15 }
 0xaeb   : > { %v2899_v9 = vpack.c.b16 %v2898_v7, %v2897_v5 }
 0xaec   : > { %v4942_v10 = vpop.eup %4941 }
 0xaed   : > { %v2724_v12 = vmul.f32 %v4942_v10, %v6086_v6  ;;  %v2712_v13 = vpop.xlane.xlu2 %2711  ;;  %v2907_v61 = vsel %vm2640_vm14, %v2899_v9, 0  ;;  %v4944_v17 = vpop.eup %4943 }
 0xaee   : > { %4945 = vrcp.f32 %v2712_v13  ;;  %2916 = vmatpush.bf16.xpose.msrb.mxu1 %v2907_v61  ;;  %v2727_v20 = vmul.f32 %v4944_v17, %v6070_v59 }
 0xaef   : > { %v2732_v3 = vpack.c.bf16 %v2724_v12, %v2724_v12 }
 0xaf0   : > { %v2735_v27 = vpack.c.bf16 %v2727_v20, %v2727_v20 }
 0xaf1   : > { %v2865_v22 = vunpack.c.l.b16 %v2732_v3 }
 0xaf2   : > { %v2930_v28 = vunpack.c.l.b16 %v2735_v27 }
 0xaf3   : > { %v2866_v23 = vpack.c.b16 %v2865_v22, %v2864_v21 }
 0xaf4   : > { %v4946_v2 = vpop.eup %4945 }
 0xaf5   : > { %v2728_v24 = vmul.f32 %v4946_v2, %v6090_v19  ;;  %v2874_v25 = vsel %vm2640_vm14, %v2866_v23, 0 }
 0xaf6   : > { %2883 = vmatpush.bf16.xpose.msrb.mxu0 %v2874_v25 }
 0xaf7   : > { %v2736_v6 = vpack.c.bf16 %v2728_v24, %v2728_v24 }
 0xaf9   : > { %v2931_v31 = vunpack.c.l.b16 %v2736_v6 }
 0xafb   : > { %v2932_v29 = vpack.c.b16 %v2931_v31, %v2930_v28 }
 0xafd   : > { %v2940_v33 = vsel %vm2640_vm14, %v2932_v29, 0 }
 0xafe   : > { %2949 = vmatpush.bf16.xpose.msrb.mxu2 %v2940_v33 }
 0xb37   : > { %v4806_v34 = vpop.trf.xlu0 }
 0xb38   : > { %4294 = vmatmul.msk.bf16.vlgmr.msra.gmra.mxu3 %vm2640_vm14, %v4806_v34 }
 0xb3f   : > { %v4807_v59 = vpop.trf.xlu0 }
 0xb40   : > { %4300 = vmatmul.msk.bf16.vlgmr.msrb.gmra.mxu2 %vm2640_vm14, %v4807_v59 }
 0xb44   : > { %v4812_v32 = vpop.trf.xlu2 }
 0xb45   : > { %4298 = vmatmul.msk.bf16.vlgmr.msrb.gmra.mxu1 %vm2640_vm14, %v4812_v32 }
 0xb47   : > { %v4808_v19 = vpop.trf.xlu0 }
 0xb48   : > { %4295 = vmatmul.msk.bf16.gmra.mxu3 %vm2640_vm14, %v4808_v19 }
 0xb4c   : > { %v4813_v36 = vpop.trf.xlu2 }
 0xb4d   : > { %4296 = vmatmul.msk.bf16.vlgmr.msrb.gmra.mxu0 %vm2640_vm14, %v4813_v36 }
 0xb4f   : > { %v4809_v30 = vpop.trf.xlu0 }
 0xb50   : > { %4301 = vmatmul.msk.bf16.gmra.mxu2 %vm2640_vm14, %v4809_v30 }
 0xb54   : > { %v4814_v39 = vpop.trf.xlu2 }
 0xb55   : > { %4299 = vmatmul.msk.bf16.gmra.mxu1 %vm2640_vm14, %v4814_v39 }
 0xb5c   : > { %v4815_v35 = vpop.trf.xlu2 }
 0xb5d   : > { %4297 = vmatmul.msk.bf16.gmra.mxu0 %vm2640_vm14, %v4815_v35  ;;  %v4531_v35 = vld [vmem:[#allocation16 + $0x38] sm:$0xff] }
 0xb5e   : > { %3408 = vmatpush.bf16.msrb.mxu3 %v4531_v35 }
 0xbbb   : > { %v2852_v37 = vpop.f32.mrf.mxu3 }
 0xbc2   : > { %v2918_v8 = vpop.f32.mrf.mxu1 }
 0xbc3   : > { %v4816_v40 = vpack.i.bf16 %v2852_v37, %v2918_v8  ;;  %v2951_v41 = vpop.f32.mrf.mxu2  ;;  %v2854_v16 = vpop.f32.mrf.mxu3 }
 0xbc5   : > { %4817 = vxpose.xlu1.b32.start [1/4] (short) (narrow) %v4816_v40, 16 }
 0xbca   : > { %v2885_v43 = vpop.f32.mrf.mxu0  ;;  %v2920_v45 = vpop.f32.mrf.mxu1 }
 0xbcb   : > { %v4834_v46 = vpack.i.bf16 %v2885_v43, %v2951_v41  ;;  %v4818_v47 = vpack.i.bf16 %v2854_v16, %v2920_v45  ;;  %v2953_v62 = vpop.f32.mrf.mxu2  ;;  %v2857_v49 = vpop.f32.mrf.mxu3 }
 0xbcd   : > { %4835 = vxpose.xlu0.b32.start [1/4] (short) (narrow) %v4834_v46, 16  ;;  %4819 = vxpose.xlu1.b32.cont [2/4] (short) (narrow) %v4818_v47, 16 }
 0xbd2   : > { %v2887_v52 = vpop.f32.mrf.mxu0  ;;  %v2923_v53 = vpop.f32.mrf.mxu1 }
 0xbd3   : > { %v4836_v11 = vpack.i.bf16 %v2887_v52, %v2953_v62  ;;  %v4820_v54 = vpack.i.bf16 %v2857_v49, %v2923_v53  ;;  %v2956_v55 = vpop.f32.mrf.mxu2  ;;  %v2859_v57 = vpop.f32.mrf.mxu3 }
 0xbd5   : > { %4837 = vxpose.xlu0.b32.cont [2/4] (short) (narrow) %v4836_v11, 16  ;;  %4821 = vxpose.xlu1.b32.cont [3/4] (short) (narrow) %v4820_v54, 16 }
 0xbda   : > { %v2890_v58 = vpop.f32.mrf.mxu0  ;;  %v2925_v44 = vpop.f32.mrf.mxu1 }
 0xbdb   : > { %v4838_v26 = vpack.i.bf16 %v2890_v58, %v2956_v55  ;;  %v4822_v60 = vpack.i.bf16 %v2859_v57, %v2925_v44  ;;  %v2958_v63 = vpop.f32.mrf.mxu2 }
 0xbdd   : > { %4839 = vxpose.xlu0.b32.cont [3/4] (short) (narrow) %v4838_v26, 16  ;;  %4823 = vxpose.xlu1.b32.end [4/4] (short) (narrow) %v4822_v60, 16 }
 0xbe2   : > { %v2892_v48 = vpop.f32.mrf.mxu0 }
 0xbe3   : > { %v4840_v42 = vpack.i.bf16 %v2892_v48, %v2958_v63 }
 0xbe5   : > { %4841 = vxpose.xlu0.b32.end [4/4] (short) (narrow) %v4840_v42, 16 }
 0xc69   : > { %v4824_v0 = vpop.trf.xlu1 }
 0xc6a   : > { %v4828_v1 = vunpack.i.h.bf16 %v4824_v0  ;;  %v4825_v50 = vunpack.i.l.bf16 %v4824_v0 }
 0xc6c   : > { %v3091_v4 = vrot.slane %v4828_v1, 4  ;;  %v3089_v5 = vrot.slane %v4825_v50, 4 }
 0xc6e   : > { %v3090_v7 = vsel %vm1774_vm4, %v3089_v5, %v4828_v1  ;;  %v3092_v9 = vsel %vm1774_vm4, %v4825_v50, %v3091_v4 }
 0xc6f   : > { %v3096_v10 = vperm.slane %v3090_v7, %v5845_v56  ;;  %v3100_v12 = vperm.slane %v3092_v9, %v5845_v56 }
 0xc71   : > { %v4842_v13 = vpop.trf.xlu0  ;;  %v4829_v61 = vpop.trf.xlu1  ;;  %v3115_v24 = vrot.slane %v3096_v10, 4  ;;  %v3127_v25 = vrot.slane %v3100_v12, 4 }
 0xc72   : > { %v4846_v15 = vunpack.i.h.bf16 %v4842_v13  ;;  %v4843_v17 = vunpack.i.l.bf16 %v4842_v13  ;;  %v4833_v3 = vunpack.i.h.bf16 %v4829_v61  ;;  %v4830_v20 = vunpack.i.l.bf16 %v4829_v61 }
 0xc74   : > { %v3103_v21 = vrot.slane %v4846_v15, 4  ;;  %v3101_v22 = vrot.slane %v4843_v17, 4  ;;  %v3147_v23 = vrot.slane %v4833_v3, 4  ;;  %v3145_v2 = vrot.slane %v4830_v20, 4 }
 0xc76   : > { %v3102_v27 = vsel %vm1774_vm4, %v3101_v22, %v4846_v15  ;;  %v3104_v6 = vsel %vm1774_vm4, %v4843_v17, %v3103_v21  ;;  %v3146_v29 = vsel %vm1774_vm4, %v3145_v2, %v4833_v3  ;;  %v3148_v33 = vsel %vm1774_vm4, %v4830_v20, %v3147_v23 }
 0xc77   : > { %v3108_v28 = vperm.slane %v3102_v27, %v5845_v56  ;;  %v3112_v31 = vperm.slane %v3104_v6, %v5845_v56  ;;  %v3152_v34 = vperm.slane %v3146_v29, %v5845_v56  ;;  %v3156_v59 = vperm.slane %v3148_v33, %v5845_v56 }
 0xc79   : > { %v3113_v32 = vrot.slane %v3108_v28, 4  ;;  %v3116_v19 = vsel %vm1774_vm4, %v3108_v28, %v3115_v24  ;;  %v3125_v36 = vrot.slane %v3112_v31, 4  ;;  %v3128_v30 = vsel %vm1774_vm4, %v3112_v31, %v3127_v25  ;;  %v4847_v39 = vpop.trf.xlu0 }
 0xc7a   : > { %v3124_v37 = vperm.slane %v3116_v19, %v5851_v18  ;;  %v3136_v8 = vperm.slane %v3128_v30, %v5851_v18  ;;  %v3171_v40 = vrot.slane %v3152_v34, 4  ;;  %v4851_v43 = vunpack.i.h.bf16 %v4847_v39 }
 0xc7b   : > { %v3114_v41 = vsel %vm1774_vm4, %v3113_v32, %v3096_v10  ;;  %v3126_v16 = vsel %vm1774_vm4, %v3125_v36, %v3100_v12  ;;  %v3183_v49 = vrot.slane %v3156_v59, 4  ;;  %v4848_v53 = vunpack.i.l.bf16 %v4847_v39 }
 0xc7c   : > { %v3120_v45 = vperm.slane %v3114_v41, %v5851_v18  ;;  %v3132_v46 = vperm.slane %v3126_v16, %v5851_v18  ;;  %v3139_v47 = vrot.slane %v3124_v37, 4  ;;  %v3143_v62 = vrot.slane %v3136_v8, 4 }
 0xc7d   : > { %v3159_v52 = vrot.slane %v4851_v43, 4  ;;  %v3157_v26 = vrot.slane %v4848_v53, 4 }
 0xc7e   : > { %v3137_v11 = vrot.slane %v3120_v45, 4  ;;  %v3140_v54 = vsel %vm1774_vm4, 0.0, %v3139_v47  ;;  %v3144_v55 = vsel %vm1774_vm4, 0.0, %v3143_v62  ;;  %v3141_v57 = vrot.slane %v3132_v46, 4 }
 0xc7f   : > { %v3206_v58 = vrot.slane %v3140_v54, 4  ;;  %v3217_v44 = vrot.slane %v3144_v55, 4  ;;  %v3160_v60 = vsel %vm1774_vm4, %v4848_v53, %v3159_v52  ;;  %v3201_v0 = vsel %vm1774_vm4, %v3139_v47, %v3120_v45 }
 0xc80   : > { %v3168_v48 = vperm.slane %v3160_v60, %v5845_v56  ;;  %v3138_v63 = vsel %vm1774_vm4, 0.0, %v3137_v11  ;;  %v3142_v42 = vsel %vm1774_vm4, 0.0, %v3141_v57  ;;  %v3158_v1 = vsel %vm1774_vm4, %v3157_v26, %v4851_v43 }
 0xc81   : > { %v3205_v50 = vperm.slane %v3201_v0, %v5845_v56  ;;  %v3207_v4 = vsel %vm1774_vm4, %v3206_v58, %v3138_v63  ;;  %v3212_v5 = vsel %vm1774_vm4, %v3143_v62, %v3132_v46  ;;  %v3164_v7 = vperm.slane %v3158_v1, %v5845_v56 }
 0xc82   : > { %v3181_v9 = vrot.slane %v3168_v48, 4  ;;  %v3184_v10 = vsel %vm1774_vm4, %v3168_v48, %v3183_v49  ;;  %v3211_v12 = vperm.slane %v3207_v4, %v5845_v56  ;;  %v3216_v61 = vperm.slane %v3212_v5, %v5845_v56 }
 0xc83   : > { %v3192_v13 = vperm.slane %v3184_v10, %v5851_v18  ;;  %v3218_v15 = vsel %vm1774_vm4, %v3217_v44, %v3142_v42  ;;  %v3225_v17 = vrot.slane %v3205_v50, 4  ;;  %v3169_v3 = vrot.slane %v3164_v7, 4 }
 0xc84   : > { %v3172_v20 = vsel %vm1774_vm4, %v3164_v7, %v3171_v40  ;;  %v3182_v21 = vsel %vm1774_vm4, %v3181_v9, %v3156_v59  ;;  %v3222_v22 = vperm.slane %v3218_v15, %v5845_v56  ;;  %v3237_v6 = vrot.slane %v3216_v61, 4 }
 0xc85   : > { %v3180_v23 = vperm.slane %v3172_v20, %v5851_v18  ;;  %v3188_v2 = vperm.slane %v3182_v21, %v5851_v18  ;;  %v3199_v24 = vrot.slane %v3192_v13, 4  ;;  %v3170_v25 = vsel %vm1774_vm4, %v3169_v3, %v3152_v34 }
 0xc86   : > { %v3226_v27 = vsel %vm1774_vm4, %v3211_v12, %v3225_v17  ;;  %v3176_v28 = vperm.slane %v3170_v25, %v5851_v18  ;;  %v3238_v59 = vsel %vm1774_vm4, %v3222_v22, %v3237_v6  ;;  %v3223_v36 = vrot.slane %v3211_v12, 4  ;;  %v4530_v25 = vld [vmem:[#allocation16 + $0x30] sm:$0xff]  ;;  %v4528_v6 = vld [vmem:[#allocation16 + $0x20] sm:$0xff] }
 0xc87   : > { %v3195_v31 = vrot.slane %v3180_v23, 4  ;;  %v3200_v29 = vsel %vm1774_vm4, 0.0, %v3199_v24  ;;  %v3197_v33 = vrot.slane %v3188_v2, 4  ;;  %v3266_v19 = vsel %vm1774_vm4, %v3199_v24, %v3188_v2  ;;  %3409 = vmatpush.bf16.msrb.mxu3 %v4530_v25  ;;  %v4539_v25 = vld [vmem:[#allocation17 + $0x34] sm:$0xf0] }
 0xc88   : > { %v3271_v32 = vrot.slane %v3200_v29, 4  ;;  %v3193_v30 = vrot.slane %v3176_v28, 4  ;;  %v3270_v8 = vperm.slane %v3266_v19, %v5845_v56  ;;  %v3234_v16 = vperm.slane %v3226_v27, %v5851_v18  ;;  %v4529_v27 = vld [vmem:[#allocation16 + $0x28] sm:$0xff] }
 0xc89   : > { %v3196_v39 = vsel %vm1774_vm4, 0.0, %v3195_v31  ;;  %v3198_v34 = vsel %vm1774_vm4, 0.0, %v3197_v33  ;;  %v3255_v37 = vsel %vm1774_vm4, %v3195_v31, %v3176_v28  ;;  %v3246_v43 = vperm.slane %v3238_v59, %v5851_v18  ;;  %v4527_v28 = vld [vmem:[#allocation16 + $0x18] sm:$0xff]  ;;  %v4526_v31 = vld [vmem:[#allocation16 + $0x10] sm:$0xff]  ;;  %v4525_v29 = vld [vmem:[#allocation16 + $0x8] sm:$0xff] }
 0xc8a   : > { %v3260_v35 = vrot.slane %v3196_v39, 4  ;;  %v3272_v40 = vsel %vm1774_vm4, %v3271_v32, %v3198_v34  ;;  %v3194_v41 = vsel %vm1774_vm4, 0.0, %v3193_v30  ;;  %v3259_v45 = vperm.slane %v3255_v37, %v5845_v56  ;;  %v4524_v33 = vld [vmem:[#allocation16] sm:$0xff] }
 0xc8b   : > { %v3276_v47 = vperm.slane %v3272_v40, %v5845_v56  ;;  %v3291_v62 = vrot.slane %v3270_v8, 4  ;;  %v3224_v49 = vsel %vm1774_vm4, %v3223_v36, %v3205_v50  ;;  %v3235_v55 = vrot.slane %v3222_v22, 4  ;;  %3410 = vmatpush.bf16.msrb.mxu3 %v4529_v27  ;;  %v4538_v27 = vld [vmem:[#allocation17 + $0x34] sm:$0xf] }
 0xc8c   : > { %v3261_v46 = vsel %vm1774_vm4, %v3260_v35, %v3194_v41  ;;  %v3279_v53 = vrot.slane %v3259_v45, 4  ;;  %v3230_v54 = vperm.slane %v3224_v49, %v5851_v18  ;;  %v3251_v58 = vrot.slane %v3246_v43, 4 }
 0xc8d   : > { %v3265_v52 = vperm.slane %v3261_v46, %v5845_v56  ;;  %v3292_v11 = vsel %vm1774_vm4, %v3276_v47, %v3291_v62  ;;  %v3289_v57 = vrot.slane %v3276_v47, 4  ;;  %v3253_v48 = vrot.slane %v3234_v16, 4  ;;  %v4871_v47 = vld [vmem:[%s6365_s30] ss:$0 sm:$0xff] }
 0xc8e   : > { %v3300_v26 = vperm.slane %v3292_v11, %v5851_v18  ;;  %v3236_v42 = vsel %vm1774_vm4, %v3235_v55, %v3216_v61  ;;  %v3249_v7 = vrot.slane %v3230_v54, 4  ;;  %v3252_v10 = vsel %vm1774_vm4, %v3251_v58, %v3234_v16 }
 0xc8f   : > { %v3280_v44 = vsel %vm1774_vm4, %v3265_v52, %v3279_v53  ;;  %v3277_v60 = vrot.slane %v3265_v52, 4  ;;  %v3290_v56 = vsel %vm1774_vm4, %v3289_v57, %v3270_v8  ;;  %v3242_v1 = vperm.slane %v3236_v42, %v5851_v18  ;;  %3411 = vmatpush.bf16.msrb.mxu3 %v4528_v6  ;;  %v4546_v42 = vld [vmem:[#allocation17 + $0x74] sm:$0xf] }
 0xc90   : > { %v3288_v63 = vperm.slane %v3280_v44, %v5851_v18  ;;  %v3305_v0 = vrot.slane %v3300_v26, 4  ;;  %v3296_v4 = vperm.slane %v3290_v56, %v5851_v18  ;;  %v3254_v61 = vsel %vm1774_vm4, %v3246_v43, %v3253_v48 }
 0xc91   : > { %v3278_v50 = vsel %vm1774_vm4, %v3277_v60, %v3259_v45  ;;  %v3247_v13 = vrot.slane %v3242_v1, 4 }
 0xc92   : > { %v3307_v5 = vrot.slane %v3288_v63, 4  ;;  %v3284_v9 = vperm.slane %v3278_v50, %v5851_v18  ;;  %v3306_v12 = vsel %vm1774_vm4, %v3305_v0, %v3288_v63  ;;  %v3301_v15 = vrot.slane %v3296_v4, 4  ;;  %v4547_v63 = vld [vmem:[#allocation17 + $0x74] sm:$0xf0]  ;;  %v4394_v0 = vld [vmem:[#allocation17 + $0x78] sm:$0xf0] }
 0xc93   : > { %v4857_v3 = vpack.i.bf16 %v3306_v12, %v3252_v10  ;;  %v3248_v23 = vsel %vm1774_vm4, %v3247_v13, %v3230_v54  ;;  %v3250_v18 = vsel %vm1774_vm4, %v3242_v1, %v3249_v7  ;;  %3412 = vmatpush.bf16.msrb.mxu3 %v4527_v28  ;;  %v4397_v1 = vor.u32 %v4546_v42, %v4394_v0  ;;  %v4384_v50 = vld [vmem:[#allocation17 + $0x60] sm:$0xf]  ;;  %v4376_v12 = vld [vmem:[#allocation17 + $0x50] sm:$0xf]  ;;  %v4543_v13 = vld [vmem:[#allocation17 + $0x54] sm:$0xf0] }
 0xc94   : > { %v3308_v17 = vsel %vm1774_vm4, %v3300_v26, %v3307_v5  ;;  %v3303_v20 = vrot.slane %v3284_v9, 4  ;;  %v3302_v22 = vsel %vm1774_vm4, %v3301_v15, %v3284_v9  ;;  %v4544_v5 = vld [vmem:[#allocation17 + $0x64] sm:$0xf]  ;;  %v4386_v9 = vld [vmem:[#allocation17 + $0x68] sm:$0xf0] }
 0xc95   : > { %v4862_v21 = vpack.i.bf16 %v3308_v17, %v3254_v61  ;;  %4858 = vrot.lane.b32.xlu0 %v4857_v3, %s5395_s17  ;;  %3593 = vmatpush.bf16.msra.mxu1 %v4397_v1  ;;  %v4389_v10 = vor.u32 %v4544_v5, %v4386_v9  ;;  %v4542_v15 = vld [vmem:[#allocation17 + $0x54] sm:$0xf]  ;;  %v4377_v61 = vor.u32 %v4543_v13, %v4376_v12  ;;  %v4378_v17 = vld [vmem:[#allocation17 + $0x58] sm:$0xf0]  ;;  %v4560_v1 = vld [vmem:[#allocation19 + $0x60] sm:$0xff] }
 0xc96   : > { %v3304_v2 = vsel %vm1774_vm4, %v3296_v4, %v3303_v20  ;;  %v4545_v4 = vld [vmem:[#allocation17 + $0x64] sm:$0xf0]  ;;  %v4381_v3 = vor.u32 %v4542_v15, %v4378_v17  ;;  %v4368_v20 = vld [vmem:[#allocation17 + $0x40] sm:$0xf]  ;;  %v4362_v28 = vld [vmem:[#allocation17 + $0x38] sm:$0xf0] }
 0xc97   : > { %4863 = vrot.lane.b32.xlu1 %v4862_v21, %s5396_s20  ;;  %v4852_v24 = vpack.i.bf16 %v3304_v2, %v3250_v18  ;;  %3413 = vmatpush.bf16.msrb.mxu3 %v4526_v31  ;;  %v4385_v7 = vor.u32 %v4545_v4, %v4384_v50  ;;  %v4541_v21 = vld [vmem:[#allocation17 + $0x44] sm:$0xf0]  ;;  %v4370_v18 = vld [vmem:[#allocation17 + $0x48] sm:$0xf0]  ;;  %v4365_v31 = vor.u32 %v4538_v27, %v4362_v28  ;;  %v4558_v27 = vld [vmem:[#allocation19 + $0x50] sm:$0xff] }
 0xc98   : > { %v4872_v15 = vld [vmem:[%s6366_s6] ss:$0 sm:$0xff]  ;;  %v4548_v28 = vld [vmem:[#allocation19] sm:$0xff]  ;;  %s3841_s6 = scalar_lea.hbm %s6372_s24, %s4564_s12 }
 0xc99   : > { %4853 = vrot.lane.b32.xlu2 %v4852_v24, %s5394_s0  ;;  %3594 = vmatpush.bf16.msra.mxu1 %v4389_v10  ;;  %v4360_v24 = vld [vmem:[#allocation17 + $0x30] sm:$0xf]  ;;  %s6367_s0 = sld [smem:[#allocation46_spill]] }
 0xc9a   : > { %v4361_v6 = vor.u32 %v4539_v25, %v4360_v24  ;;  %v4559_v24 = vld [vmem:[#allocation19 + $0x58] sm:$0xff]  ;;  %v4550_v25 = vld [vmem:[#allocation19 + $0x10] sm:$0xff] }
 0xc9b   : > { %3414 = vmatpush.bf16.msrb.mxu3 %v4525_v29  ;;  %v4352_v29 = vld [vmem:[#allocation17 + $0x20] sm:$0xf] }
 0xc9d   : > { %3595 = vmatpush.bf16.msra.mxu1 %v4381_v3 }
 0xc9f   : > { %3415 = vmatpush.bf16.msrb.mxu3 %v4524_v33  ;;  %v4537_v33 = vld [vmem:[#allocation17 + $0x24] sm:$0xf0] }
 0xcf3   : > { %v4854_v32 = vpop.permute.xlu2 %4853 }
 0xcf4   : > { %v4856_v59 = vunpack.i.h.bf16 %v4854_v32  ;;  %v4855_v19 = vunpack.i.l.bf16 %v4854_v32  ;;  %v4536_v32 = vld [vmem:[#allocation17 + $0x24] sm:$0xf] }
 0xcf6   : > { %v3334_v35 = vsel %vm1235_vm0, %v3302_v22, %v4856_v59  ;;  %v3333_v37 = vsel %vm1235_vm0, %v3248_v23, %v4855_v19  ;;  %v4540_v22 = vld [vmem:[#allocation17 + $0x44] sm:$0xf]  ;;  %v4369_v23 = vor.u32 %v4541_v21, %v4368_v20  ;;  %v4353_v19 = vor.u32 %v4537_v33, %v4352_v29  ;;  %v4873_v21 = vld [vmem:[%s6367_s0] ss:$0 sm:$0xff]  ;;  %s3844_s0 = sshll.u32 %s3841_s6, 4  ;;  %s3845_s0 = int_to_ptr.hbm [resolvable:$true] %s3844_s0 }
 0xcf7   : > { %v4373_v2 = vor.u32 %v4540_v22, %v4370_v18  ;;  %v3493_v29 = vld [vmem:[%s6368_s14] sm:$0x3]  ;;  %s5301_s17 = sshra.s32 %s3845_s0, 4  ;;  %s5302_s17 = int_to_ptr.hbm [resolvable:$true] %s5301_s17 }
 0xcf8   : > { %s5303_s20 = scalar_lea.hbm %s5302_s17, 16  ;;  %p5308_p7 = scmp.lt.s32.totalorder %s5302_s17, %s6372_s24 }
 0xcf9   : > { %3596 = vmatpush.bf16.msra.mxu1 %v4373_v2  ;;  %p5304_p1 = scmp.ne.s32.totalorder %s5302_s17, %s5303_s20  ;;  %p5309_p9 = scmp.lt.s32.totalorder %s5307_s23, %s5303_s20 }
 0xcfb   : > { %p5305_p3 = pnand %p5304_p1, %p5633_p0  ;;  %p5310_p5 = por %p5309_p9, %p5308_p7 }
 0xcfd   : > { %3597 = vmatpush.bf16.msra.mxu1 %v4365_v31  ;;  %v4556_v31 = vld [vmem:[#allocation19 + $0x40] sm:$0xff]  ;;  %p5306_p13 = pneg %p5305_p3 }
 0xcff   : > { %p5311_p8 = pnand %p5310_p5, %p5306_p13 }
 0xd07   : > { %v4859_v36 = vpop.permute.xlu0 %4858 }
 0xd08   : > { %v4861_v39 = vunpack.i.h.bf16 %v4859_v36  ;;  %v4860_v34 = vunpack.i.l.bf16 %v4859_v36  ;;  %v4354_v36 = vld [vmem:[#allocation17 + $0x28] sm:$0xf0] }
 0xd09   : > { %v4864_v30 = vpop.permute.xlu1 %4863 }
 0xd0a   : > { %v4866_v8 = vunpack.i.h.bf16 %v4864_v30  ;;  %v4865_v40 = vunpack.i.l.bf16 %v4864_v30  ;;  %v3335_v41 = vsel %vm2020_vm5, %v3333_v37, %v4860_v34  ;;  %v3336_v16 = vsel %vm2020_vm5, %v3334_v35, %v4861_v39  ;;  %v4344_v34 = vld [vmem:[#allocation17 + $0x10] sm:$0xf]  ;;  %v4535_v35 = vld [vmem:[#allocation17 + $0x14] sm:$0xf0]  ;;  %v4534_v37 = vld [vmem:[#allocation17 + $0x14] sm:$0xf] }
 0xd0b   : > { %v4357_v39 = vor.u32 %v4536_v32, %v4354_v36 }
 0xd0c   : > { %v3337_v43 = vsel %vm2023_vm6, %v3335_v41, %v4865_v40  ;;  %v3338_v45 = vsel %vm2023_vm6, %v3336_v16, %v4866_v8  ;;  %v4346_v8 = vld [vmem:[#allocation17 + $0x18] sm:$0xf0]  ;;  %v4345_v41 = vor.u32 %v4535_v35, %v4344_v34 }
 0xd0d   : > { %v3339_v46 = vpack.c.bf16 %v3338_v45, %v3337_v43  ;;  %3598 = vmatpush.bf16.msra.mxu1 %v4357_v39  ;;  %v4349_v16 = vor.u32 %v4534_v37, %v4346_v8  ;;  %v4336_v43 = vld [vmem:[#allocation17] sm:$0xf]  ;;  %v4533_v45 = vld [vmem:[#allocation17 + $0x4] sm:$0xf0] }
 0xd0f   : > { %3416 = vmatmul.bf16.vlgmr.msrb.gmra.mxu3 %v3339_v46  ;;  %v4532_v46 = vld [vmem:[#allocation17 + $0x4] sm:$0xf] }
 0xd11   : > { %3599 = vmatpush.bf16.msra.mxu1 %v4349_v16 }
 0xd92   : > { %v3417_v62 = vpop.f32.mrf.mxu3 }
 0xd93   : > { %v3418_v49 = vadd.f32 %v4871_v47, %v3417_v62  ;;  %v4555_v62 = vld [vmem:[#allocation19 + $0x38] sm:$0xff] }
 0xd94   : > { %3745 = vmatpush.bf16.msra.mxu2 %v4555_v62 }
 0xd95   : > { %v3422_v52 = vadd.f32 %v3418_v49, %v5994_v51  ;;  %v4563_v49 = vld [vmem:[#allocation19 + $0x78] sm:$0xff] }
 0xd96   : > { %3759 = vmatpush.bf16.msra.mxu3 %v4563_v49 }
 0xd97   : > { %3426 = vadd.xlane.f32.xlu2 %v3422_v52 }
 0xd9a   : > { %v3419_v53 = vpop.f32.mrf.mxu3 }
 0xd9b   : > { %v3420_v11 = vadd.f32 %v4871_v47, %v3419_v53  ;;  %v4338_v47 = vld [vmem:[#allocation17 + $0x8] sm:$0xf0]  ;;  %v4337_v53 = vor.u32 %v4533_v45, %v4336_v43 }
 0xd9d   : > { %v3423_v54 = vadd.f32 %v3420_v11, %v5996_v38  ;;  %v4392_v38 = vld [vmem:[#allocation17 + $0x70] sm:$0xf] }
 0xd9e   : > { %v4393_v56 = vor.u32 %v4547_v63, %v4392_v38  ;;  %v4561_v63 = vld [vmem:[#allocation19 + $0x68] sm:$0xff] }
 0xd9f   : > { %3428 = vadd.xlane.f32.xlu0 %v3423_v54 }
 0xda0   : > { %3579 = vmatpush.bf16.msra.mxu0 %v4393_v56  ;;  %v4552_v56 = vld [vmem:[#allocation19 + $0x20] sm:$0xff] }
 0xda4   : > { %3580 = vmatpush.bf16.msra.mxu0 %v4385_v7 }
 0xda8   : > { %3581 = vmatpush.bf16.msra.mxu0 %v4377_v61 }
 0xdac   : > { %3582 = vmatpush.bf16.msra.mxu0 %v4369_v23 }
 0xdb0   : > { %3583 = vmatpush.bf16.msra.mxu0 %v4361_v6  ;;  %v4557_v6 = vld [vmem:[#allocation19 + $0x48] sm:$0xff] }
 0xdb4   : > { %3584 = vmatpush.bf16.msra.mxu0 %v4353_v19  ;;  %v3496_v19 = vperm.slane %v3493_v29, 1 }
 0xdb8   : > { %3585 = vmatpush.bf16.msra.mxu0 %v4345_v41 }
 0xdbc   : > { %3586 = vmatpush.bf16.msra.mxu0 %v4337_v53 }
 0xe0a   : > { %v3427_v55 = vpop.xlane.xlu2 %3426 }
 0xe0b   : > { %v3430_v57 = vmul.f32 %v3427_v55, %v5952_v14  ;;  %v4554_v55 = vld [vmem:[#allocation19 + $0x30] sm:$0xff] }
 0xe0c   : > { %3746 = vmatpush.bf16.msra.mxu2 %v4554_v55 }
 0xe0d   : > { %v6214_v58 = vsub.f32 %v3422_v52, %v3430_v57  ;;  %v4562_v57 = vld [vmem:[#allocation19 + $0x70] sm:$0xff] }
 0xe0e   : > { %3760 = vmatpush.bf16.msra.mxu3 %v4562_v57 }
 0xe0f   : > { %v3434_v44 = vmul.f32 %v6214_v58, %v6214_v58 }
 0xe11   : > { %3436 = vadd.xlane.f32.xlu1 %v3434_v44 }
 0xe12   : > { %v3429_v26 = vpop.xlane.xlu0 %3428  ;;  %3761 = vmatpush.bf16.msra.mxu3 %v4561_v63 }
 0xe13   : > { %v3431_v60 = vmul.f32 %v3429_v26, %v5952_v14 }
 0xe15   : > { %v6219_v48 = vsub.f32 %v3423_v54, %v3431_v60  ;;  %v4341_v54 = vor.u32 %v4532_v46, %v4338_v47  ;;  %v4874_v46 = vld [vmem:[%s6369_s18] ss:$0 sm:$0xff] }
 0xe16   : > { %3762 = vmatpush.bf16.msra.mxu3 %v4560_v1 }
 0xe17   : > { %v3435_v51 = vmul.f32 %v6219_v48, %v6219_v48  ;;  %3600 = vmatpush.bf16.msra.mxu1 %v4341_v54 }
 0xe19   : > { %3438 = vadd.xlane.f32.xlu2 %v3435_v51  ;;  %v4553_v51 = vld [vmem:[#allocation19 + $0x28] sm:$0xff] }
 0xe1a   : > { %3747 = vmatpush.bf16.msra.mxu2 %v4553_v51  ;;  %3763 = vmatpush.bf16.msra.mxu3 %v4559_v24 }
 0xe1e   : > { %3748 = vmatpush.bf16.msra.mxu2 %v4552_v56  ;;  %3764 = vmatpush.bf16.msra.mxu3 %v4558_v27 }
 0xe22   : > { %3765 = vmatpush.bf16.msra.mxu3 %v4557_v6 }
 0xe26   : > { %3766 = vmatpush.bf16.msra.mxu3 %v4556_v31 }
 0xe84   : > { %v3437_v59 = vpop.xlane.xlu1 %3436 }
 0xe85   : > { %v3440_v30 = vmul.f32 %v3437_v59, %v5952_v14  ;;  %v3495_v59 = vperm.slane %v3493_v29, 0 }
 0xe87   : > { %v3442_v40 = vadd.f32 1e-12, %v3440_v30 }
 0xe89   : > { %4947 = vrsqrt.f32 %v3442_v40  ;;  %vm3450_vm0 = vweird.f32 %v3442_v40 }
 0xe8c   : > { %v3439_v52 = vpop.xlane.xlu2 %3438 }
 0xe8d   : > { %v3441_v11 = vmul.f32 %v3439_v52, %v5952_v14 }
 0xe8f   : > { %v4948_v44 = vpop.eup %4947  ;;  %v3443_v26 = vadd.f32 1e-12, %v3441_v11 }
 0xe90   : > { %v3445_v60 = vmul.f32 %v4948_v44, %v3442_v40  ;;  %vm3451_vm15 = vweird.f32 %v4948_v44 }
 0xe91   : > { %4949 = vrsqrt.f32 %v3443_v26  ;;  %vm3452_vm1 = vmor %vm3450_vm0, %vm3451_vm15  ;;  %vm3460_vm3 = vweird.f32 %v3443_v26 }
 0xe92   : > { %v3446_v38 = vmul.f32 %v4948_v44, %v3445_v60 }
 0xe94   : > { %v3447_v42 = vmul.f32 0.5, %v3446_v38 }
 0xe96   : > { %v3448_v0 = vsub.f32 1.5, %v3447_v42 }
 0xe97   : > { %v4950_v50 = vpop.eup %4949 }
 0xe98   : > { %v3449_v4 = vmul.f32 %v4948_v44, %v3448_v0  ;;  %v3455_v5 = vmul.f32 %v4950_v50, %v3443_v26  ;;  %vm3461_vm2 = vweird.f32 %v4950_v50 }
 0xe99   : > { %vm3462_vm4 = vmor %vm3460_vm3, %vm3461_vm2 }
 0xe9a   : > { %v3456_v7 = vmul.f32 %v4950_v50, %v3455_v5  ;;  %v3453_v9 = vsel %vm3452_vm1, %v4948_v44, %v3449_v4 }
 0xe9b   : > { %v3464_v13 = vmul.f32 %v3453_v9, %v6214_v58  ;;  %v4551_v58 = vld [vmem:[#allocation19 + $0x18] sm:$0xff] }
 0xe9c   : > { %v3457_v10 = vmul.f32 0.5, %v3456_v7  ;;  %3749 = vmatpush.bf16.msra.mxu2 %v4551_v58 }
 0xe9d   : > { %v3469_v20 = vmul.f32 %v4872_v15, %v3464_v13 }
 0xe9e   : > { %v3458_v12 = vsub.f32 1.5, %v3457_v10 }
 0xe9f   : > { %v3474_v23 = vadd.f32 %v4873_v21, %v3469_v20 }
 0xea0   : > { %v3459_v61 = vmul.f32 %v4950_v50, %v3458_v12  ;;  %3750 = vmatpush.bf16.msra.mxu2 %v4550_v25 }
 0xea2   : > { %v3463_v17 = vsel %vm3462_vm4, %v4950_v50, %v3459_v61 }
 0xea3   : > { %v3465_v3 = vmul.f32 %v3463_v17, %v6219_v48  ;;  %v4549_v48 = vld [vmem:[#allocation19 + $0x8] sm:$0xff] }
 0xea4   : > { %3751 = vmatpush.bf16.msra.mxu2 %v4549_v48 }
 0xea5   : > { %v3470_v22 = vmul.f32 %v4872_v15, %v3465_v3 }
 0xea7   : > { %v3475_v18 = vadd.f32 %v4873_v21, %v3470_v22  ;;  %v4875_v21 = vld [vmem:[%s6370_s2] ss:$0 sm:$0xff] }
 0xea8   : > { %3752 = vmatpush.bf16.msra.mxu2 %v4548_v28 }
 0xea9   : > { %v3476_v2 = vpack.c.bf16 %v3475_v18, %v3474_v23 }
 0xeab   : > { %3587 = vmatmul.bf16.vlgmr.msra.gmra.mxu0 %v3476_v2  ;;  %3601 = vmatmul.bf16.vlgmr.msra.gmra.mxu1 %v3476_v2 }
 0xf28   : > { %v3588_v33 = vpop.f32.mrf.mxu0  ;;  %v3602_v32 = vpop.f32.mrf.mxu1 }
 0xf29   : > { %v3589_v36 = vadd.f32 %v3588_v33, %v3495_v59  ;;  %v3603_v30 = vadd.f32 %v3602_v32, %v3496_v19 }
 0xf2b   : > { %v3607_v8 = vmax.f32 %v3589_v36, 0.0  ;;  %v3608_v40 = vmax.f32 %v3603_v30, 0.0 }
 0xf30   : > { %v3590_v39 = vpop.f32.mrf.mxu0  ;;  %v3604_v34 = vpop.f32.mrf.mxu1 }
 0xf31   : > { %v3591_v35 = vadd.f32 %v3590_v39, %v3495_v59  ;;  %v3605_v37 = vadd.f32 %v3604_v34, %v3496_v19 }
 0xf33   : > { %v3609_v41 = vmax.f32 %v3591_v35, 0.0  ;;  %v3610_v16 = vmax.f32 %v3605_v37, 0.0 }
 0xf35   : > { %v3611_v43 = vpack.c.bf16 %v3609_v41, %v3607_v8  ;;  %v3612_v45 = vpack.c.bf16 %v3610_v16, %v3608_v40 }
 0xf37   : > { %3753 = vmatmul.bf16.vlgmr.msra.gmra.mxu2 %v3611_v43  ;;  %3767 = vmatmul.bf16.vlgmr.msra.gmra.mxu3 %v3612_v45 }
 0xfba   : > { %v3754_v47 = vpop.f32.mrf.mxu2  ;;  %v3768_v62 = vpop.f32.mrf.mxu3 }
 0xfbb   : > { %v3755_v49 = vadd.f32 %v4874_v46, %v3754_v47 }
 0xfbd   : > { %v3769_v52 = vadd.f32 %v3768_v62, %v3755_v49 }
 0xfbf   : > { %v3773_v53 = vadd.f32 %v3769_v52, %v3474_v23  ;;  %v4876_v23 = vld [vmem:[%s6371_s29] ss:$0 sm:$0xff] }
 0xfc1   : > { %3777 = vadd.xlane.f32.xlu2 %v3773_v53 }
 0xfc2   : > { %v3756_v11 = vpop.f32.mrf.mxu2  ;;  %v3770_v55 = vpop.f32.mrf.mxu3 }
 0xfc3   : > { %v3757_v54 = vadd.f32 %v4874_v46, %v3756_v11 }
 0xfc5   : > { %v3771_v57 = vadd.f32 %v3770_v55, %v3757_v54 }
 0xfc7   : > { %v3774_v44 = vadd.f32 %v3771_v57, %v3475_v18 }
 0xfc9   : > { %3779 = vadd.xlane.f32.xlu2 %v3774_v44 }
0x1034   : > { %v3778_v26 = vpop.xlane.xlu2 %3777 }
0x1035   : > { %v3781_v60 = vmul.f32 %v3778_v26, %v5952_v14 }
0x1037   : > { %v3783_v51 = vsub.f32 %v3773_v53, %v3781_v60 }
0x1039   : > { %v3785_v38 = vmul.f32 %v3783_v51, %v3783_v51 }
0x103b   : > { %3787 = vadd.xlane.f32.xlu0 %v3785_v38 }
0x103c   : > { %v3780_v63 = vpop.xlane.xlu2 %3779 }
0x103d   : > { %v3782_v42 = vmul.f32 %v3780_v63, %v5952_v14 }
0x103f   : > { %v3784_v56 = vsub.f32 %v3774_v44, %v3782_v42 }
0x1041   : > { %v3786_v0 = vmul.f32 %v3784_v56, %v3784_v56 }
0x1043   : > { %3789 = vadd.xlane.f32.xlu1 %v3786_v0 }
0x10ae   : > { %v3788_v1 = vpop.xlane.xlu0 %3787 }
0x10af   : > { %v3791_v50 = vmul.f32 %v3788_v1, %v5952_v14 }
0x10b1   : > { %v3793_v4 = vadd.f32 1e-12, %v3791_v50 }
0x10b3   : > { %4951 = vrsqrt.f32 %v3793_v4  ;;  %vm3801_vm6 = vweird.f32 %v3793_v4 }
0x10b6   : > { %v3790_v5 = vpop.xlane.xlu1 %3789 }
0x10b7   : > { %v3792_v7 = vmul.f32 %v3790_v5, %v5952_v14 }
0x10b9   : > { %v4952_v9 = vpop.eup %4951  ;;  %v3794_v10 = vadd.f32 1e-12, %v3792_v7 }
0x10ba   : > { %v3796_v12 = vmul.f32 %v4952_v9, %v3793_v4  ;;  %vm3802_vm5 = vweird.f32 %v4952_v9 }
0x10bb   : > { %4953 = vrsqrt.f32 %v3794_v10  ;;  %vm3803_vm7 = vmor %vm3801_vm6, %vm3802_vm5  ;;  %vm3811_vm9 = vweird.f32 %v3794_v10 }
0x10bc   : > { %v3797_v13 = vmul.f32 %v4952_v9, %v3796_v12 }
0x10be   : > { %v3798_v15 = vmul.f32 0.5, %v3797_v13 }
0x10c0   : > { %v3799_v61 = vsub.f32 1.5, %v3798_v15 }
0x10c1   : > { %v4954_v17 = vpop.eup %4953 }
0x10c2   : > { %v3800_v3 = vmul.f32 %v4952_v9, %v3799_v61  ;;  %v3806_v20 = vmul.f32 %v4954_v17, %v3794_v10  ;;  %vm3812_vm8 = vweird.f32 %v4954_v17 }
0x10c3   : > { %vm3813_vm10 = vmor %vm3811_vm9, %vm3812_vm8 }
0x10c4   : > { %v3804_v14 = vsel %vm3803_vm7, %v4952_v9, %v3800_v3  ;;  %v3807_v22 = vmul.f32 %v4954_v17, %v3806_v20 }
0x10c5   : > { %v3815_v18 = vmul.f32 %v3804_v14, %v3783_v51 }
0x10c6   : > { %v3808_v2 = vmul.f32 0.5, %v3807_v22 }
0x10c7   : > { %v3820_v58 = vmul.f32 %v4875_v21, %v3815_v18 }
0x10c8   : > { %v3809_v24 = vsub.f32 1.5, %v3808_v2 }
0x10c9   : > { %v3825_v25 = vadd.f32 %v4876_v23, %v3820_v58 }
0x10ca   : > { %v3810_v27 = vmul.f32 %v4954_v17, %v3809_v24 }
0x10cb   : > { %3827 = vst [vmem:[%s889_s25] sm:$0xff] %v3825_v25 }
0x10cc   : > { %v3814_v48 = vsel %vm3813_vm10, %v4954_v17, %v3810_v27 }
0x10cd   : > { %v3816_v6 = vmul.f32 %v3814_v48, %v3784_v56 }
0x10cf   : > { %v3821_v28 = vmul.f32 %v4875_v21, %v3816_v6 }
0x10d1   : > { %v3826_v31 = vadd.f32 %v4876_v23, %v3821_v28 }
0x10d3   : > { %3828 = vst [vmem:[%s889_s25 + $0x8] sm:$0xff] %v3826_v31 }
0x10d4   : > { %5314 = shalt.err (!%p5311_p8)
}
0x10d5   : > { %s5400_s8 = smov 128   ;;  %s5401_s22 = smov 8  }
0x10d6   : > { %4608 = dma.vmem_to_hbm [thread:$0]  (%p5633_p0), %s3843_s1, 256, %s3845_s0, %s3830_s5, %s5400_s8, %s5400_s8, %s5401_s22  }
0x10d7 PF: > { %s6374_s2 = sld [smem:[#allocation30_spill]]  ;;  %s3859_s16 = sand.u32 1, %s5365_s3  }
0x10d8   : > { %s3860_s15 = scalar_lea.sflag [#allocation4], %s3859_s16 }
0x10dd   : > { %p6375_p10 = scmp.ge.s32.totalorder %s6374_s2, 2 }
0x10df   : > { %p4646_p11 = pnand %p6375_p10, %p5641_p6 }
0x10e1   : > { %p4647_p12 = pneg %p4646_p11 }
0x10e3   : > { %5360 = dma.done.wait (%p4647_p12), %s3860_s15, 256  }
0x10e4   : > { %5362 = vsyncadd (%p4647_p12), %s3860_s15, 4294967040  ;;  %s6376_s30 = sld [smem:[#allocation31_spill]]  ;;  %s6379_s3 = smov %s5369_s28 }
0x10e5   : > { %s6377_s29 = sld [smem:[#allocation29_spill]] }
0x10e6   : > { %s6378_s12 = sld [smem:[#allocation32_spill]] }
0x10ea   : > { %p42_p2 = scmp.ge.s32.totalorder %s6376_s30, 4  }
0x10eb   : > { %s6380_s28 = smov %s6377_s29 }
0x10ec   : > { %s6381_s29 = smov %s6378_s12  ;;  %44 = sbr.rel (!%p42_p2) target bundleno = 32 (0x20), region = 202 }
0x10f1   :  { %3866 = vsyncpa [#allocation3], 1 }
0x10f2   :  { %3868 = vsyncpa [#allocation3 + $0x1], 1 }
0x10f3   :  { %3869 = vsyncpa [#allocation6], 1 }
0x10f4   :  { %3871 = vsyncpa [#allocation6 + $0x1], 1 }
0x10f5   :  { %3872 = vsyncpa [#allocation9], 1 }
0x10f6   :  { %3873 = vsyncpa [#allocation12], 1 }
0x10f7   :  { %3874 = vsyncpa [#allocation15], 1 }
0x10f8   :  { %3875 = vsyncpa [#allocation18], 1 }
0x10f9   :  { %3876 = vsyncpa [#allocation4], 1 }
0x10fa   :  { %3878 = vsyncpa [#allocation4 + $0x1], 1 }

</bundles_post_ra>
